<compile_context>
chip_gen: v7x
topology: tpu7x:2x2x1
jax: 0.10.0
libtpu: 0.0.40
codegen_flags: <defaults>
</compile_context>

<pallas_src>
import functools
from math import pi, sqrt

import jax
import jax.numpy as jnp
from jax.experimental import pallas as pl
from jax.experimental.pallas import tpu as pltpu

NEG_INF = -100000.0
VMEM_LIMIT = 32 * 1024 * 1024   # <= default scoped VMEM on v6e/v7x, above v5e's default


# --------------------------------------------------------------------------
# small helpers
# --------------------------------------------------------------------------
def _row_tile(M):
    """Largest 8-multiple row tile (<=512) that divides M; else the full M."""
    for t in (512, 256, 128, 64, 32, 16, 8):
        if M % t == 0:
            return t
    return M


def _bcast_spec(shape):
    """BlockSpec for a weight that is resident (same full block) at every grid step."""
    zeros = (0,) * len(shape)
    return pl.BlockSpec(tuple(shape), lambda i, _z=zeros: _z)


def _layer_norm(x, g, b):
    mu = jnp.mean(x, axis=-1, keepdims=True)
    var = jnp.mean((x - mu) ** 2, axis=-1, keepdims=True)
    return (x - mu) * jax.lax.rsqrt(var + 1e-5) * g + b


def _compiler_params():
    return pltpu.CompilerParams(dimension_semantics=("parallel",),
                                vmem_limit_bytes=VMEM_LIMIT)


# --------------------------------------------------------------------------
# Fused attention residual block kernel
#   pre-LN -> QKV proj (per head) -> softmax(QK^T * scale) V -> out proj -> +residual
#   grid: one step per batch element, all heads handled inside the step.
# --------------------------------------------------------------------------
@functools.lru_cache(maxsize=None)
def _make_attn_block_kernel(n_heads, scale, causal, cross, has_mask):
    def kernel(*refs):
        idx = 0
        x_ref = refs[idx]; idx += 1
        mem_ref = None
        mask_ref = None
        if cross:
            mem_ref = refs[idx]; idx += 1
        if has_mask:
            mask_ref = refs[idx]; idx += 1
        (g_ref, bln_ref, wq_ref, bq_ref, wk_ref, bk_ref,
         wv_ref, bv_ref, wo_ref, bo_ref, o_ref) = refs[idx:]

        x = x_ref[...]                                    # (m, E) f32 residual input
        h = _layer_norm(x, g_ref[...], bln_ref[...])      # pre-LN, f32 stats
        h16 = h.astype(jnp.bfloat16)
        kv16 = mem_ref[...].astype(jnp.bfloat16) if cross else h16

        m_len = x.shape[0]
        n_len = kv16.shape[0]

        if has_mask:
            pad = mask_ref[...] > 0.5                     # (1, n) bool, broadcasts over m
        if causal:
            row = jax.lax.broadcasted_iota(jnp.int32, (m_len, n_len), 0)
            col = jax.lax.broadcasted_iota(jnp.int32, (m_len, n_len), 1)
            future = col > row                            # built in-kernel, no HBM mask

        out = jnp.zeros_like(x)
        for hh in range(n_heads):                         # static unroll over heads
            # per-head projections via leading-dim indexing of (heads, E, d) weights
            qh = jnp.dot(h16, wq_ref[hh], preferred_element_type=jnp.float32) + bq_ref[hh]
            kh = jnp.dot(kv16, wk_ref[hh], preferred_element_type=jnp.float32) + bk_ref[hh]
            vh = jnp.dot(kv16, wv_ref[hh], preferred_element_type=jnp.float32) + bv_ref[hh]
            # scores: contract on head_dim directly (MXU consumes K without a transpose)
            s = jax.lax.dot_general(
                qh.astype(jnp.bfloat16), kh.astype(jnp.bfloat16),
                (((1,), (1,)), ((), ())),
                preferred_element_type=jnp.float32) * scale          # (m, n) f32
            if has_mask:
                s = jnp.where(pad, NEG_INF, s)
            if causal:
                s = jnp.where(future, NEG_INF, s)
            s = s - jnp.max(s, axis=-1, keepdims=True)
            p = jnp.exp(s)
            p = p * pl.reciprocal(jnp.sum(p, axis=-1, keepdims=True), approx=True)
            ctx_h = jnp.dot(p.astype(jnp.bfloat16), vh.astype(jnp.bfloat16),
                            preferred_element_type=jnp.float32)      # (m, d)
            # output projection accumulated per head: sum_h ctx_h @ Wo[h]  == ctx @ Wo
            out = out + jnp.dot(ctx_h.astype(jnp.bfloat16), wo_ref[hh],
                                preferred_element_type=jnp.float32)  # (m, E)
        o_ref[...] = x + out + bo_ref[...]                # residual add
    return kernel


def pallas_attn_block(x, ap, *, n_heads, scale, causal, mem=None, mask=None):
    """x: (b, m, E) f32.  mem: (b, n, E) or None.  mask: (b, 1, n) f32 (1 = padded)."""
    b, m, E = x.shape
    cross = mem is not None
    has_mask = mask is not None
    n = mem.shape[1] if cross else m

    kern = _make_attn_block_kernel(n_heads, float(scale), causal, cross, has_mask)

    inputs = [x]
    in_specs = [pl.BlockSpec((None, m, E), lambda i: (i, 0, 0))]
    if cross:
        inputs.append(mem)
        in_specs.append(pl.BlockSpec((None, n, E), lambda i: (i, 0, 0)))
    if has_mask:
        inputs.append(mask)
        in_specs.append(pl.BlockSpec((None, 1, n), lambda i: (i, 0, 0)))
    for name in ("ln_g", "ln_b", "wq", "bq", "wk", "bk", "wv", "bv", "wo", "bo"):
        w = ap[name]
        inputs.append(w)
        in_specs.append(_bcast_spec(w.shape))

    return pl.pallas_call(
        kern,
        out_shape=jax.ShapeDtypeStruct((b, m, E), jnp.float32),
        grid=(b,),
        in_specs=in_specs,
        out_specs=pl.BlockSpec((None, m, E), lambda i: (i, 0, 0)),
        compiler_params=_compiler_params(),
    )(*inputs)


# --------------------------------------------------------------------------
# Fused FFN residual block:  pre-LN -> Linear -> ReLU -> Linear -> +residual
# optionally fused with a trailing LayerNorm (used for the encoder-output norm).
# --------------------------------------------------------------------------
@functools.lru_cache(maxsize=None)
def _make_ffn_block_kernel(final_ln):
    def kernel(*refs):
        if final_ln:
            (x_ref, g_ref, b_ref, w1_ref, b1_ref, w2_ref, b2_ref,
             gf_ref, bf_ref, o_ref) = refs
        else:
            (x_ref, g_ref, b_ref, w1_ref, b1_ref, w2_ref, b2_ref, o_ref) = refs
        x = x_ref[...]                                    # (tm, E) f32
        h = _layer_norm(x, g_ref[...], b_ref[...])
        h1 = jnp.dot(h.astype(jnp.bfloat16), w1_ref[...],
                     preferred_element_type=jnp.float32) + b1_ref[...]
        h1 = jnp.maximum(h1, 0.0)
        out = x + jnp.dot(h1.astype(jnp.bfloat16), w2_ref[...],
                          preferred_element_type=jnp.float32) + b2_ref[...]
        if final_ln:                                      # fused encoder-output norm
            out = _layer_norm(out, gf_ref[...], bf_ref[...])
        o_ref[...] = out
    return kernel


def pallas_ffn_block(x2d, fp, final_ln_params=None):
    M, E = x2d.shape
    H = fp["w1"].shape[1]
    tm = _row_tile(M)
    final_ln = final_ln_params is not None

    inputs = [x2d, fp["ln_g"], fp["ln_b"], fp["w1"], fp["b1"], fp["w2"], fp["b2"]]
    in_specs = [
        pl.BlockSpec((tm, E), lambda i: (i, 0)),
        _bcast_spec((1, E)), _bcast_spec((1, E)),
        _bcast_spec((E, H)), _bcast_spec((1, H)),
        _bcast_spec((H, E)), _bcast_spec((1, E)),
    ]
    if final_ln:
        gf, bf = final_ln_params
        inputs += [gf, bf]
        in_specs += [_bcast_spec((1, E)), _bcast_spec((1, E))]

    return pl.pallas_call(
        _make_ffn_block_kernel(final_ln),
        out_shape=jax.ShapeDtypeStruct((M, E), jnp.float32),
        grid=(M // tm,),
        in_specs=in_specs,
        out_specs=pl.BlockSpec((tm, E), lambda i: (i, 0)),
        compiler_params=_compiler_params(),
    )(*inputs)


# --------------------------------------------------------------------------
# Standalone layernorm (only used if an encoder has zero layers), row-tiled
# --------------------------------------------------------------------------
def _layernorm_kernel(x_ref, g_ref, b_ref, o_ref):
    o_ref[...] = _layer_norm(x_ref[...], g_ref[...], b_ref[...])


def pallas_layernorm(x2d, g, b):
    M, E = x2d.shape
    tm = _row_tile(M)
    return pl.pallas_call(
        _layernorm_kernel,
        out_shape=jax.ShapeDtypeStruct((M, E), jnp.float32),
        grid=(M // tm,),
        in_specs=[pl.BlockSpec((tm, E), lambda i: (i, 0)),
                  _bcast_spec((1, E)), _bcast_spec((1, E))],
        out_specs=pl.BlockSpec((tm, E), lambda i: (i, 0)),
        compiler_params=_compiler_params(),
    )(x2d, g, b)


# --------------------------------------------------------------------------
# Fused decoder head:  LN -> out_proj -> tied-embedding logits -> log_softmax
# --------------------------------------------------------------------------
def _head_kernel(x_ref, g_ref, b_ref, wo_ref, bo_ref, emb_ref, blog_ref, o_ref):
    x = x_ref[...]                                        # (tm, E) f32
    h = _layer_norm(x, g_ref[...], b_ref[...])
    h = jnp.dot(h.astype(jnp.bfloat16), wo_ref[...],
                preferred_element_type=jnp.float32) + bo_ref[...]
    # tied embedding logits: contract on E (no emb.T materialization)
    logits = jax.lax.dot_general(
        h.astype(jnp.bfloat16), emb_ref[...],
        (((1,), (1,)), ((), ())),
        preferred_element_type=jnp.float32) + blog_ref[...]          # (tm, V)
    mx = jnp.max(logits, axis=-1, keepdims=True)
    s = logits - mx
    lse = jnp.log(jnp.sum(jnp.exp(s), axis=-1, keepdims=True))
    o_ref[...] = s - lse


def pallas_head(x2d, params):
    M, E = x2d.shape
    V = params["emb"].shape[0]
    tm = _row_tile(M)
    return pl.pallas_call(
        _head_kernel,
        out_shape=jax.ShapeDtypeStruct((M, V), jnp.float32),
        grid=(M // tm,),
        in_specs=[pl.BlockSpec((tm, E), lambda i: (i, 0)),
                  _bcast_spec((1, E)), _bcast_spec((1, E)),
                  _bcast_spec((E, E)), _bcast_spec((1, E)),
                  _bcast_spec((V, E)), _bcast_spec((1, V))],
        out_specs=pl.BlockSpec((tm, V), lambda i: (i, 0)),
        compiler_params=_compiler_params(),
    )(x2d, params["ln_dec_g"], params["ln_dec_b"], params["out_w"],
      params["out_b"], params["emb"], params["logits_b"])


# --------------------------------------------------------------------------
# Model glue (embedding gathers / tiny reshapes in plain JAX)
# --------------------------------------------------------------------------
def sin_embeddings(max_pos, dim):
    dim_scale = 2.0 * (jnp.arange(dim) // 2).astype(jnp.float32) / dim
    dim_scale = jnp.power(jnp.full((dim,), 10000.0), dim_scale).reshape(1, -1)
    phase = jnp.zeros((1, dim), jnp.float32).at[0, 1::2].set(pi / 2)
    pos = jnp.arange(max_pos, dtype=jnp.float32).reshape(-1, 1)
    return jnp.sin(pos / dim_scale + phase)


def transformer_forward(params, src_tokens, tgt_tokens, src_mask, *, n_heads, E):
    # src_tokens: (n, b) int32, tgt_tokens: (m, b) int32, src_mask: (n, b) bool
    n, b = src_tokens.shape
    m = tgt_tokens.shape[0]
    emb = params["emb"]                                   # (V, E) bf16 (tied with logits)
    pos = params["pos"]                                   # (2048, E) f32
    scale = 1.0 / sqrt(E)                                 # reference divides by sqrt(embed_dim)

    # TODO(synk): token-embedding gather is data-dependent; kept in plain JAX as glue.
    x = emb[src_tokens.T].astype(jnp.float32) * sqrt(E) + pos[None, :n, :]   # (b, n, E)
    pad_mask = src_mask.T.astype(jnp.float32).reshape(b, 1, n)               # (b, 1, n)

    # --- encoder ---
    n_enc = len(params["enc_layers"])
    for li, lp in enumerate(params["enc_layers"]):
        x = pallas_attn_block(x, lp["sa"], n_heads=n_heads, scale=scale,
                              causal=False, mask=pad_mask)
        final_ln = (params["ln_enc_g"], params["ln_enc_b"]) if li == n_enc - 1 else None
        x = pallas_ffn_block(x.reshape(b * n, E), lp["ff"],
                             final_ln_params=final_ln).reshape(b, n, E)
    if n_enc == 0:                                        # degenerate case: still apply norm
        x = pallas_layernorm(x.reshape(b * n, E),
                             params["ln_enc_g"], params["ln_enc_b"]).reshape(b, n, E)
    enc = x

    # --- decoder ---
    h = emb[tgt_tokens.T].astype(jnp.float32) * sqrt(E) + pos[None, :m, :]   # (b, m, E)
    for lp in params["dec_layers"]:
        h = pallas_attn_block(h, lp["sa"], n_heads=n_heads, scale=scale, causal=True)
        h = pallas_attn_block(h, lp["ea"], n_heads=n_heads, scale=scale,
                              causal=False, mem=enc, mask=pad_mask)
        h = pallas_ffn_block(h.reshape(b * m, E), lp["ff"]).reshape(b, m, E)

    log_p = pallas_head(h.reshape(b * m, E), params)      # (b*m, V)
    V = log_p.shape[-1]
    return log_p.reshape(b, m, V).transpose(1, 0, 2)      # (m, b, V), module convention


# --------------------------------------------------------------------------
# Deterministic parameter init (matches the PyTorch shapes / init schemes)
# --------------------------------------------------------------------------
def init_params(key, n_layers, E, H, n_heads, V):
    d = E // n_heads
    keys = iter(jax.random.split(key, 512))

    def nk():
        return next(keys)

    def glorot(in_d, out_d):
        bound = sqrt(6.0 / (in_d + out_d))
        return jax.random.uniform(nk(), (in_d, out_d), jnp.float32, -bound, bound)

    def ln():
        return jnp.ones((1, E), jnp.float32), jnp.zeros((1, E), jnp.float32)

    def mha():
        g, be = ln()

        def per_head_in(w):   # (E, E) -> (heads, E, d): column block for each head
            return w.reshape(E, n_heads, d).transpose(1, 0, 2).astype(jnp.bfloat16)

        zhd = jnp.zeros((n_heads, 1, d), jnp.float32)
        return dict(
            ln_g=g, ln_b=be,
            wq=per_head_in(glorot(E, E)), bq=zhd,
            wk=per_head_in(glorot(E, E)), bk=zhd,
            wv=per_head_in(glorot(E, E)), bv=zhd,
            wo=glorot(E, E).reshape(n_heads, d, E).astype(jnp.bfloat16),
            bo=jnp.zeros((1, E), jnp.float32),
        )

    def ff():
        g, be = ln()
        return dict(ln_g=g, ln_b=be,
                    w1=glorot(E, H).astype(jnp.bfloat16),
                    b1=jnp.zeros((1, H), jnp.float32),
                    w2=glorot(H, E).astype(jnp.bfloat16),
                    b2=jnp.zeros((1, E), jnp.float32))

    enc_layers = [dict(sa=mha(), ff=ff()) for _ in range(n_layers)]
    dec_layers = [dict(sa=mha(), ea=mha(), ff=ff()) for _ in range(n_layers)]
    ln_enc_g, ln_enc_b = ln()
    ln_dec_g, ln_dec_b = ln()
    emb = jax.random.normal(nk(), (V, E), jnp.float32) / sqrt(E)
    emb = emb.at[0].set(0.0).astype(jnp.bfloat16)         # padding_idx=0 row is zero

    return dict(
        emb=emb,                                          # tied with the logits layer
        pos=sin_embeddings(2048, E),
        enc_layers=enc_layers,
        dec_layers=dec_layers,
        ln_enc_g=ln_enc_g, ln_enc_b=ln_enc_b,
        ln_dec_g=ln_dec_g, ln_dec_b=ln_dec_b,
        out_w=glorot(E, E).astype(jnp.bfloat16),
        out_b=jnp.zeros((1, E), jnp.float32),
        logits_b=jnp.zeros((1, V), jnp.float32),
    )


# --------------------------------------------------------------------------
if __name__ == "__main__":
    n_layers, embed_dim, hidden_dim, n_heads = 2, 32, 64, 4
    vocab_size = 64
    n_src, m_tgt, bsz = 8, 8, 2

    root = jax.random.PRNGKey(0)
    k_params, k_src, k_tgt = jax.random.split(root, 3)
    params = init_params(k_params, n_layers, embed_dim, hidden_dim, n_heads, vocab_size)

    src_tokens = jax.random.randint(k_src, (n_src, bsz), 1, vocab_size, dtype=jnp.int32)
    tgt_tokens = jax.random.randint(k_tgt, (m_tgt, bsz), 1, vocab_size, dtype=jnp.int32)
    src_tokens = src_tokens.at[-1, 0].set(0)          # one padding token
    src_mask = src_tokens == 0                        # (n, b), True = padding

    fwd = jax.jit(functools.partial(transformer_forward, n_heads=n_heads, E=embed_dim))
    log_p = fwd(params, src_tokens, tgt_tokens, src_mask)
    log_p = jax.block_until_ready(log_p)

    assert log_p.shape == (m_tgt, bsz, vocab_size)
    # probabilities sum to 1 per position (log_softmax is exactly normalized in f32)
    assert bool(jnp.allclose(jnp.exp(log_p).sum(-1), 1.0, atol=1e-4))
    print("KERNEL_OK")
</pallas_src>

<mosaic_0001>
module attributes {stable_mosaic.version = 11 : i64} {
  func.func @kernel(%arg0: i32, %arg1: memref<1x8x32xf32, #tpu.memory_space<vmem>>, %arg2: memref<1x32xf32, #tpu.memory_space<vmem>>, %arg3: memref<1x32xf32, #tpu.memory_space<vmem>>, %arg4: memref<4x32x8xbf16, #tpu.memory_space<vmem>>, %arg5: memref<4x1x8xf32, #tpu.memory_space<vmem>>, %arg6: memref<4x32x8xbf16, #tpu.memory_space<vmem>>, %arg7: memref<4x1x8xf32, #tpu.memory_space<vmem>>, %arg8: memref<4x32x8xbf16, #tpu.memory_space<vmem>>, %arg9: memref<4x1x8xf32, #tpu.memory_space<vmem>>, %arg10: memref<4x8x32xbf16, #tpu.memory_space<vmem>>, %arg11: memref<1x32xf32, #tpu.memory_space<vmem>>, %arg12: memref<1x8x32xf32, #tpu.memory_space<vmem>>) attributes {dimension_semantics = [#tpu.dimension_semantics<parallel>], iteration_bounds = array<i64: 2>, scalar_prefetch = 0 : i64, scratch_operands = 0 : i64, tpu.core_type = #tpu.core_type<tc>, window_params = [{transform_indices = @transform_0, window_bounds = array<i64: 1, 8, 32>}, {pipeline_mode = #tpu.pipeline_mode<synchronous>, transform_indices = @transform_1, window_bounds = array<i64: 1, 32>}, {pipeline_mode = #tpu.pipeline_mode<synchronous>, transform_indices = @transform_2, window_bounds = array<i64: 1, 32>}, {pipeline_mode = #tpu.pipeline_mode<synchronous>, transform_indices = @transform_3, window_bounds = array<i64: 4, 32, 8>}, {pipeline_mode = #tpu.pipeline_mode<synchronous>, transform_indices = @transform_4, window_bounds = array<i64: 4, 1, 8>}, {pipeline_mode = #tpu.pipeline_mode<synchronous>, transform_indices = @transform_5, window_bounds = array<i64: 4, 32, 8>}, {pipeline_mode = #tpu.pipeline_mode<synchronous>, transform_indices = @transform_6, window_bounds = array<i64: 4, 1, 8>}, {pipeline_mode = #tpu.pipeline_mode<synchronous>, transform_indices = @transform_7, window_bounds = array<i64: 4, 32, 8>}, {pipeline_mode = #tpu.pipeline_mode<synchronous>, transform_indices = @transform_8, window_bounds = array<i64: 4, 1, 8>}, {pipeline_mode = #tpu.pipeline_mode<synchronous>, transform_indices = @transform_9, window_bounds = array<i64: 4, 8, 32>}, {pipeline_mode = #tpu.pipeline_mode<synchronous>, transform_indices = @transform_10, window_bounds = array<i64: 1, 32>}, {transform_indices = @transform_11, window_bounds = array<i64: 1, 8, 32>}]} {
    %c0 = arith.constant 0 : index
    %c0_0 = arith.constant 0 : index
    %c0_1 = arith.constant 0 : index
    %0 = vector.load %arg1[%c0, %c0_0, %c0_1] : memref<1x8x32xf32, #tpu.memory_space<vmem>>, vector<1x8x32xf32>
    %1 = vector.shape_cast %0 : vector<1x8x32xf32> to vector<8x32xf32>
    %c0_2 = arith.constant 0 : index
    %c0_3 = arith.constant 0 : index
    %2 = vector.load %arg2[%c0_2, %c0_3] : memref<1x32xf32, #tpu.memory_space<vmem>>, vector<1x32xf32>
    %c0_4 = arith.constant 0 : index
    %c0_5 = arith.constant 0 : index
    %3 = vector.load %arg3[%c0_4, %c0_5] : memref<1x32xf32, #tpu.memory_space<vmem>>, vector<1x32xf32>
    %cst = arith.constant dense<0.000000e+00> : vector<8xf32>
    %4 = vector.multi_reduction <add>, %1, %cst [1] : vector<8x32xf32> to vector<8xf32>
    %5 = vector.shape_cast %4 : vector<8xf32> to vector<8x1xf32>
    %cst_6 = arith.constant 3.200000e+01 : f32
    %6 = vector.broadcast %cst_6 : f32 to vector<8x1xf32>
    %7 = arith.divf %5, %6 : vector<8x1xf32>
    %8 = vector.broadcast %7 : vector<8x1xf32> to vector<8x32xf32>
    %9 = arith.subf %1, %8 : vector<8x32xf32>
    %10 = arith.mulf %9, %9 : vector<8x32xf32>
    %cst_7 = arith.constant dense<0.000000e+00> : vector<8xf32>
    %11 = vector.multi_reduction <add>, %10, %cst_7 [1] : vector<8x32xf32> to vector<8xf32>
    %12 = vector.shape_cast %11 : vector<8xf32> to vector<8x1xf32>
    %cst_8 = arith.constant 3.200000e+01 : f32
    %13 = vector.broadcast %cst_8 : f32 to vector<8x1xf32>
    %14 = arith.divf %12, %13 : vector<8x1xf32>
    %15 = vector.broadcast %7 : vector<8x1xf32> to vector<8x32xf32>
    %16 = arith.subf %1, %15 : vector<8x32xf32>
    %cst_9 = arith.constant 9.99999974E-6 : f32
    %17 = vector.broadcast %cst_9 : f32 to vector<8x1xf32>
    %18 = arith.addf %14, %17 : vector<8x1xf32>
    %19 = math.rsqrt %18 : vector<8x1xf32>
    %20 = vector.broadcast %19 : vector<8x1xf32> to vector<8x32xf32>
    %21 = arith.mulf %16, %20 : vector<8x32xf32>
    %22 = vector.broadcast %2 : vector<1x32xf32> to vector<8x32xf32>
    %23 = arith.mulf %21, %22 : vector<8x32xf32>
    %24 = vector.broadcast %3 : vector<1x32xf32> to vector<8x32xf32>
    %25 = arith.addf %23, %24 : vector<8x32xf32>
    %26 = arith.truncf %25 : vector<8x32xf32> to vector<8x32xbf16>
    %27 = tpu.iota {dimensions = array<i32: 0>} : vector<8x8xi32>
    %28 = tpu.iota {dimensions = array<i32: 1>} : vector<8x8xi32>
    %29 = arith.cmpi sgt, %28, %27 : vector<8x8xi32>
    %cst_10 = arith.constant 0.000000e+00 : f32
    %30 = vector.broadcast %cst_10 : f32 to vector<8x32xf32>
    %c0_11 = arith.constant 0 : index
    %c0_12 = arith.constant 0 : index
    %c0_13 = arith.constant 0 : index
    %31 = vector.load %arg4[%c0_11, %c0_12, %c0_13] : memref<4x32x8xbf16, #tpu.memory_space<vmem>>, vector<1x32x8xbf16>
    %32 = vector.shape_cast %31 : vector<1x32x8xbf16> to vector<32x8xbf16>
    %cst_14 = arith.constant dense<0.000000e+00> : vector<8x8xf32>
    %33 = tpu.matmul %26, %32, %cst_14 {dimension_numbers = #tpu.dot_dimension_numbers<[1], [0], [0], [1], [0, 0, 1, 1], [], []>} : vector<8x32xbf16>, vector<32x8xbf16>, vector<8x8xf32> -> vector<8x8xf32>
    %c0_15 = arith.constant 0 : index
    %c0_16 = arith.constant 0 : index
    %c0_17 = arith.constant 0 : index
    %34 = vector.load %arg5[%c0_15, %c0_16, %c0_17] : memref<4x1x8xf32, #tpu.memory_space<vmem>>, vector<1x1x8xf32>
    %35 = vector.shape_cast %34 : vector<1x1x8xf32> to vector<1x8xf32>
    %36 = vector.broadcast %35 : vector<1x8xf32> to vector<8x8xf32>
    %37 = arith.addf %33, %36 : vector<8x8xf32>
    %c0_18 = arith.constant 0 : index
    %c0_19 = arith.constant 0 : index
    %c0_20 = arith.constant 0 : index
    %38 = vector.load %arg6[%c0_18, %c0_19, %c0_20] : memref<4x32x8xbf16, #tpu.memory_space<vmem>>, vector<1x32x8xbf16>
    %39 = vector.shape_cast %38 : vector<1x32x8xbf16> to vector<32x8xbf16>
    %cst_21 = arith.constant dense<0.000000e+00> : vector<8x8xf32>
    %40 = tpu.matmul %26, %39, %cst_21 {dimension_numbers = #tpu.dot_dimension_numbers<[1], [0], [0], [1], [0, 0, 1, 1], [], []>} : vector<8x32xbf16>, vector<32x8xbf16>, vector<8x8xf32> -> vector<8x8xf32>
    %c0_22 = arith.constant 0 : index
    %c0_23 = arith.constant 0 : index
    %c0_24 = arith.constant 0 : index
    %41 = vector.load %arg7[%c0_22, %c0_23, %c0_24] : memref<4x1x8xf32, #tpu.memory_space<vmem>>, vector<1x1x8xf32>
    %42 = vector.shape_cast %41 : vector<1x1x8xf32> to vector<1x8xf32>
    %43 = vector.broadcast %42 : vector<1x8xf32> to vector<8x8xf32>
    %44 = arith.addf %40, %43 : vector<8x8xf32>
    %c0_25 = arith.constant 0 : index
    %c0_26 = arith.constant 0 : index
    %c0_27 = arith.constant 0 : index
    %45 = vector.load %arg8[%c0_25, %c0_26, %c0_27] : memref<4x32x8xbf16, #tpu.memory_space<vmem>>, vector<1x32x8xbf16>
    %46 = vector.shape_cast %45 : vector<1x32x8xbf16> to vector<32x8xbf16>
    %cst_28 = arith.constant dense<0.000000e+00> : vector<8x8xf32>
    %47 = tpu.matmul %26, %46, %cst_28 {dimension_numbers = #tpu.dot_dimension_numbers<[1], [0], [0], [1], [0, 0, 1, 1], [], []>} : vector<8x32xbf16>, vector<32x8xbf16>, vector<8x8xf32> -> vector<8x8xf32>
    %c0_29 = arith.constant 0 : index
    %c0_30 = arith.constant 0 : index
    %c0_31 = arith.constant 0 : index
    %48 = vector.load %arg9[%c0_29, %c0_30, %c0_31] : memref<4x1x8xf32, #tpu.memory_space<vmem>>, vector<1x1x8xf32>
    %49 = vector.shape_cast %48 : vector<1x1x8xf32> to vector<1x8xf32>
    %50 = vector.broadcast %49 : vector<1x8xf32> to vector<8x8xf32>
    %51 = arith.addf %47, %50 : vector<8x8xf32>
    %52 = arith.truncf %37 : vector<8x8xf32> to vector<8x8xbf16>
    %53 = arith.truncf %44 : vector<8x8xf32> to vector<8x8xbf16>
    %cst_32 = arith.constant dense<0.000000e+00> : vector<8x8xf32>
    %54 = tpu.matmul %52, %53, %cst_32 {dimension_numbers = #tpu.dot_dimension_numbers<[1], [1], [0], [0], [0, 0, 1, 0], [], []>} : vector<8x8xbf16>, vector<8x8xbf16>, vector<8x8xf32> -> vector<8x8xf32>
    %cst_33 = arith.constant 0.176776692 : f32
    %55 = vector.broadcast %cst_33 : f32 to vector<8x8xf32>
    %56 = arith.mulf %54, %55 : vector<8x8xf32>
    %cst_34 = arith.constant -1.000000e+05 : f32
    %57 = vector.broadcast %cst_34 : f32 to vector<8x8xf32>
    %58 = arith.select %29, %57, %56 : vector<8x8xi1>, vector<8x8xf32>
    %cst_35 = arith.constant dense<0xFF800000> : vector<8xf32>
    %59 = vector.multi_reduction <maximumf>, %58, %cst_35 [1] : vector<8x8xf32> to vector<8xf32>
    %60 = vector.shape_cast %59 : vector<8xf32> to vector<8x1xf32>
    %61 = vector.broadcast %60 : vector<8x1xf32> to vector<8x8xf32>
    %62 = arith.subf %58, %61 : vector<8x8xf32>
    %63 = math.exp %62 : vector<8x8xf32>
    %cst_36 = arith.constant dense<0.000000e+00> : vector<8xf32>
    %64 = vector.multi_reduction <add>, %63, %cst_36 [1] : vector<8x8xf32> to vector<8xf32>
    %65 = vector.shape_cast %64 : vector<8xf32> to vector<8x1xf32>
    %66 = tpu.reciprocal %65 {approx = true} : vector<8x1xf32> -> vector<8x1xf32>
    %67 = vector.broadcast %66 : vector<8x1xf32> to vector<8x8xf32>
    %68 = arith.mulf %63, %67 : vector<8x8xf32>
    %69 = arith.truncf %68 : vector<8x8xf32> to vector<8x8xbf16>
    %70 = arith.truncf %51 : vector<8x8xf32> to vector<8x8xbf16>
    %cst_37 = arith.constant dense<0.000000e+00> : vector<8x8xf32>
    %71 = tpu.matmul %69, %70, %cst_37 {dimension_numbers = #tpu.dot_dimension_numbers<[1], [0], [0], [1], [0, 0, 1, 1], [], []>} : vector<8x8xbf16>, vector<8x8xbf16>, vector<8x8xf32> -> vector<8x8xf32>
    %72 = arith.truncf %71 : vector<8x8xf32> to vector<8x8xbf16>
    %c0_38 = arith.constant 0 : index
    %c0_39 = arith.constant 0 : index
    %c0_40 = arith.constant 0 : index
    %73 = vector.load %arg10[%c0_38, %c0_39, %c0_40] : memref<4x8x32xbf16, #tpu.memory_space<vmem>>, vector<1x8x32xbf16>
    %74 = vector.shape_cast %73 : vector<1x8x32xbf16> to vector<8x32xbf16>
    %cst_41 = arith.constant dense<0.000000e+00> : vector<8x32xf32>
    %75 = tpu.matmul %72, %74, %cst_41 {dimension_numbers = #tpu.dot_dimension_numbers<[1], [0], [0], [1], [0, 0, 1, 1], [], []>} : vector<8x8xbf16>, vector<8x32xbf16>, vector<8x32xf32> -> vector<8x32xf32>
    %76 = arith.addf %30, %75 : vector<8x32xf32>
    %c1 = arith.constant 1 : index
    %c0_42 = arith.constant 0 : index
    %c0_43 = arith.constant 0 : index
    %77 = vector.load %arg4[%c1, %c0_42, %c0_43] : memref<4x32x8xbf16, #tpu.memory_space<vmem>>, vector<1x32x8xbf16>
    %78 = vector.shape_cast %77 : vector<1x32x8xbf16> to vector<32x8xbf16>
    %cst_44 = arith.constant dense<0.000000e+00> : vector<8x8xf32>
    %79 = tpu.matmul %26, %78, %cst_44 {dimension_numbers = #tpu.dot_dimension_numbers<[1], [0], [0], [1], [0, 0, 1, 1], [], []>} : vector<8x32xbf16>, vector<32x8xbf16>, vector<8x8xf32> -> vector<8x8xf32>
    %c1_45 = arith.constant 1 : index
    %c0_46 = arith.constant 0 : index
    %c0_47 = arith.constant 0 : index
    %80 = vector.load %arg5[%c1_45, %c0_46, %c0_47] : memref<4x1x8xf32, #tpu.memory_space<vmem>>, vector<1x1x8xf32>
    %81 = vector.shape_cast %80 : vector<1x1x8xf32> to vector<1x8xf32>
    %82 = vector.broadcast %81 : vector<1x8xf32> to vector<8x8xf32>
    %83 = arith.addf %79, %82 : vector<8x8xf32>
    %c1_48 = arith.constant 1 : index
    %c0_49 = arith.constant 0 : index
    %c0_50 = arith.constant 0 : index
    %84 = vector.load %arg6[%c1_48, %c0_49, %c0_50] : memref<4x32x8xbf16, #tpu.memory_space<vmem>>, vector<1x32x8xbf16>
    %85 = vector.shape_cast %84 : vector<1x32x8xbf16> to vector<32x8xbf16>
    %cst_51 = arith.constant dense<0.000000e+00> : vector<8x8xf32>
    %86 = tpu.matmul %26, %85, %cst_51 {dimension_numbers = #tpu.dot_dimension_numbers<[1], [0], [0], [1], [0, 0, 1, 1], [], []>} : vector<8x32xbf16>, vector<32x8xbf16>, vector<8x8xf32> -> vector<8x8xf32>
    %c1_52 = arith.constant 1 : index
    %c0_53 = arith.constant 0 : index
    %c0_54 = arith.constant 0 : index
    %87 = vector.load %arg7[%c1_52, %c0_53, %c0_54] : memref<4x1x8xf32, #tpu.memory_space<vmem>>, vector<1x1x8xf32>
    %88 = vector.shape_cast %87 : vector<1x1x8xf32> to vector<1x8xf32>
    %89 = vector.broadcast %88 : vector<1x8xf32> to vector<8x8xf32>
    %90 = arith.addf %86, %89 : vector<8x8xf32>
    %c1_55 = arith.constant 1 : index
    %c0_56 = arith.constant 0 : index
    %c0_57 = arith.constant 0 : index
    %91 = vector.load %arg8[%c1_55, %c0_56, %c0_57] : memref<4x32x8xbf16, #tpu.memory_space<vmem>>, vector<1x32x8xbf16>
    %92 = vector.shape_cast %91 : vector<1x32x8xbf16> to vector<32x8xbf16>
    %cst_58 = arith.constant dense<0.000000e+00> : vector<8x8xf32>
    %93 = tpu.matmul %26, %92, %cst_58 {dimension_numbers = #tpu.dot_dimension_numbers<[1], [0], [0], [1], [0, 0, 1, 1], [], []>} : vector<8x32xbf16>, vector<32x8xbf16>, vector<8x8xf32> -> vector<8x8xf32>
    %c1_59 = arith.constant 1 : index
    %c0_60 = arith.constant 0 : index
    %c0_61 = arith.constant 0 : index
    %94 = vector.load %arg9[%c1_59, %c0_60, %c0_61] : memref<4x1x8xf32, #tpu.memory_space<vmem>>, vector<1x1x8xf32>
    %95 = vector.shape_cast %94 : vector<1x1x8xf32> to vector<1x8xf32>
    %96 = vector.broadcast %95 : vector<1x8xf32> to vector<8x8xf32>
    %97 = arith.addf %93, %96 : vector<8x8xf32>
    %98 = arith.truncf %83 : vector<8x8xf32> to vector<8x8xbf16>
    %99 = arith.truncf %90 : vector<8x8xf32> to vector<8x8xbf16>
    %cst_62 = arith.constant dense<0.000000e+00> : vector<8x8xf32>
    %100 = tpu.matmul %98, %99, %cst_62 {dimension_numbers = #tpu.dot_dimension_numbers<[1], [1], [0], [0], [0, 0, 1, 0], [], []>} : vector<8x8xbf16>, vector<8x8xbf16>, vector<8x8xf32> -> vector<8x8xf32>
    %cst_63 = arith.constant 0.176776692 : f32
    %101 = vector.broadcast %cst_63 : f32 to vector<8x8xf32>
    %102 = arith.mulf %100, %101 : vector<8x8xf32>
    %cst_64 = arith.constant -1.000000e+05 : f32
    %103 = vector.broadcast %cst_64 : f32 to vector<8x8xf32>
    %104 = arith.select %29, %103, %102 : vector<8x8xi1>, vector<8x8xf32>
    %cst_65 = arith.constant dense<0xFF800000> : vector<8xf32>
    %105 = vector.multi_reduction <maximumf>, %104, %cst_65 [1] : vector<8x8xf32> to vector<8xf32>
    %106 = vector.shape_cast %105 : vector<8xf32> to vector<8x1xf32>
    %107 = vector.broadcast %106 : vector<8x1xf32> to vector<8x8xf32>
    %108 = arith.subf %104, %107 : vector<8x8xf32>
    %109 = math.exp %108 : vector<8x8xf32>
    %cst_66 = arith.constant dense<0.000000e+00> : vector<8xf32>
    %110 = vector.multi_reduction <add>, %109, %cst_66 [1] : vector<8x8xf32> to vector<8xf32>
    %111 = vector.shape_cast %110 : vector<8xf32> to vector<8x1xf32>
    %112 = tpu.reciprocal %111 {approx = true} : vector<8x1xf32> -> vector<8x1xf32>
    %113 = vector.broadcast %112 : vector<8x1xf32> to vector<8x8xf32>
    %114 = arith.mulf %109, %113 : vector<8x8xf32>
    %115 = arith.truncf %114 : vector<8x8xf32> to vector<8x8xbf16>
    %116 = arith.truncf %97 : vector<8x8xf32> to vector<8x8xbf16>
    %cst_67 = arith.constant dense<0.000000e+00> : vector<8x8xf32>
    %117 = tpu.matmul %115, %116, %cst_67 {dimension_numbers = #tpu.dot_dimension_numbers<[1], [0], [0], [1], [0, 0, 1, 1], [], []>} : vector<8x8xbf16>, vector<8x8xbf16>, vector<8x8xf32> -> vector<8x8xf32>
    %118 = arith.truncf %117 : vector<8x8xf32> to vector<8x8xbf16>
    %c1_68 = arith.constant 1 : index
    %c0_69 = arith.constant 0 : index
    %c0_70 = arith.constant 0 : index
    %119 = vector.load %arg10[%c1_68, %c0_69, %c0_70] : memref<4x8x32xbf16, #tpu.memory_space<vmem>>, vector<1x8x32xbf16>
    %120 = vector.shape_cast %119 : vector<1x8x32xbf16> to vector<8x32xbf16>
    %cst_71 = arith.constant dense<0.000000e+00> : vector<8x32xf32>
    %121 = tpu.matmul %118, %120, %cst_71 {dimension_numbers = #tpu.dot_dimension_numbers<[1], [0], [0], [1], [0, 0, 1, 1], [], []>} : vector<8x8xbf16>, vector<8x32xbf16>, vector<8x32xf32> -> vector<8x32xf32>
    %122 = arith.addf %76, %121 : vector<8x32xf32>
    %c2 = arith.constant 2 : index
    %c0_72 = arith.constant 0 : index
    %c0_73 = arith.constant 0 : index
    %123 = vector.load %arg4[%c2, %c0_72, %c0_73] : memref<4x32x8xbf16, #tpu.memory_space<vmem>>, vector<1x32x8xbf16>
    %124 = vector.shape_cast %123 : vector<1x32x8xbf16> to vector<32x8xbf16>
    %cst_74 = arith.constant dense<0.000000e+00> : vector<8x8xf32>
    %125 = tpu.matmul %26, %124, %cst_74 {dimension_numbers = #tpu.dot_dimension_numbers<[1], [0], [0], [1], [0, 0, 1, 1], [], []>} : vector<8x32xbf16>, vector<32x8xbf16>, vector<8x8xf32> -> vector<8x8xf32>
    %c2_75 = arith.constant 2 : index
    %c0_76 = arith.constant 0 : index
    %c0_77 = arith.constant 0 : index
    %126 = vector.load %arg5[%c2_75, %c0_76, %c0_77] : memref<4x1x8xf32, #tpu.memory_space<vmem>>, vector<1x1x8xf32>
    %127 = vector.shape_cast %126 : vector<1x1x8xf32> to vector<1x8xf32>
    %128 = vector.broadcast %127 : vector<1x8xf32> to vector<8x8xf32>
    %129 = arith.addf %125, %128 : vector<8x8xf32>
    %c2_78 = arith.constant 2 : index
    %c0_79 = arith.constant 0 : index
    %c0_80 = arith.constant 0 : index
    %130 = vector.load %arg6[%c2_78, %c0_79, %c0_80] : memref<4x32x8xbf16, #tpu.memory_space<vmem>>, vector<1x32x8xbf16>
    %131 = vector.shape_cast %130 : vector<1x32x8xbf16> to vector<32x8xbf16>
    %cst_81 = arith.constant dense<0.000000e+00> : vector<8x8xf32>
    %132 = tpu.matmul %26, %131, %cst_81 {dimension_numbers = #tpu.dot_dimension_numbers<[1], [0], [0], [1], [0, 0, 1, 1], [], []>} : vector<8x32xbf16>, vector<32x8xbf16>, vector<8x8xf32> -> vector<8x8xf32>
    %c2_82 = arith.constant 2 : index
    %c0_83 = arith.constant 0 : index
    %c0_84 = arith.constant 0 : index
    %133 = vector.load %arg7[%c2_82, %c0_83, %c0_84] : memref<4x1x8xf32, #tpu.memory_space<vmem>>, vector<1x1x8xf32>
    %134 = vector.shape_cast %133 : vector<1x1x8xf32> to vector<1x8xf32>
    %135 = vector.broadcast %134 : vector<1x8xf32> to vector<8x8xf32>
    %136 = arith.addf %132, %135 : vector<8x8xf32>
    %c2_85 = arith.constant 2 : index
    %c0_86 = arith.constant 0 : index
    %c0_87 = arith.constant 0 : index
    %137 = vector.load %arg8[%c2_85, %c0_86, %c0_87] : memref<4x32x8xbf16, #tpu.memory_space<vmem>>, vector<1x32x8xbf16>
    %138 = vector.shape_cast %137 : vector<1x32x8xbf16> to vector<32x8xbf16>
    %cst_88 = arith.constant dense<0.000000e+00> : vector<8x8xf32>
    %139 = tpu.matmul %26, %138, %cst_88 {dimension_numbers = #tpu.dot_dimension_numbers<[1], [0], [0], [1], [0, 0, 1, 1], [], []>} : vector<8x32xbf16>, vector<32x8xbf16>, vector<8x8xf32> -> vector<8x8xf32>
    %c2_89 = arith.constant 2 : index
    %c0_90 = arith.constant 0 : index
    %c0_91 = arith.constant 0 : index
    %140 = vector.load %arg9[%c2_89, %c0_90, %c0_91] : memref<4x1x8xf32, #tpu.memory_space<vmem>>, vector<1x1x8xf32>
    %141 = vector.shape_cast %140 : vector<1x1x8xf32> to vector<1x8xf32>
    %142 = vector.broadcast %141 : vector<1x8xf32> to vector<8x8xf32>
    %143 = arith.addf %139, %142 : vector<8x8xf32>
    %144 = arith.truncf %129 : vector<8x8xf32> to vector<8x8xbf16>
    %145 = arith.truncf %136 : vector<8x8xf32> to vector<8x8xbf16>
    %cst_92 = arith.constant dense<0.000000e+00> : vector<8x8xf32>
    %146 = tpu.matmul %144, %145, %cst_92 {dimension_numbers = #tpu.dot_dimension_numbers<[1], [1], [0], [0], [0, 0, 1, 0], [], []>} : vector<8x8xbf16>, vector<8x8xbf16>, vector<8x8xf32> -> vector<8x8xf32>
    %cst_93 = arith.constant 0.176776692 : f32
    %147 = vector.broadcast %cst_93 : f32 to vector<8x8xf32>
    %148 = arith.mulf %146, %147 : vector<8x8xf32>
    %cst_94 = arith.constant -1.000000e+05 : f32
    %149 = vector.broadcast %cst_94 : f32 to vector<8x8xf32>
    %150 = arith.select %29, %149, %148 : vector<8x8xi1>, vector<8x8xf32>
    %cst_95 = arith.constant dense<0xFF800000> : vector<8xf32>
    %151 = vector.multi_reduction <maximumf>, %150, %cst_95 [1] : vector<8x8xf32> to vector<8xf32>
    %152 = vector.shape_cast %151 : vector<8xf32> to vector<8x1xf32>
    %153 = vector.broadcast %152 : vector<8x1xf32> to vector<8x8xf32>
    %154 = arith.subf %150, %153 : vector<8x8xf32>
    %155 = math.exp %154 : vector<8x8xf32>
    %cst_96 = arith.constant dense<0.000000e+00> : vector<8xf32>
    %156 = vector.multi_reduction <add>, %155, %cst_96 [1] : vector<8x8xf32> to vector<8xf32>
    %157 = vector.shape_cast %156 : vector<8xf32> to vector<8x1xf32>
    %158 = tpu.reciprocal %157 {approx = true} : vector<8x1xf32> -> vector<8x1xf32>
    %159 = vector.broadcast %158 : vector<8x1xf32> to vector<8x8xf32>
    %160 = arith.mulf %155, %159 : vector<8x8xf32>
    %161 = arith.truncf %160 : vector<8x8xf32> to vector<8x8xbf16>
    %162 = arith.truncf %143 : vector<8x8xf32> to vector<8x8xbf16>
    %cst_97 = arith.constant dense<0.000000e+00> : vector<8x8xf32>
    %163 = tpu.matmul %161, %162, %cst_97 {dimension_numbers = #tpu.dot_dimension_numbers<[1], [0], [0], [1], [0, 0, 1, 1], [], []>} : vector<8x8xbf16>, vector<8x8xbf16>, vector<8x8xf32> -> vector<8x8xf32>
    %164 = arith.truncf %163 : vector<8x8xf32> to vector<8x8xbf16>
    %c2_98 = arith.constant 2 : index
    %c0_99 = arith.constant 0 : index
    %c0_100 = arith.constant 0 : index
    %165 = vector.load %arg10[%c2_98, %c0_99, %c0_100] : memref<4x8x32xbf16, #tpu.memory_space<vmem>>, vector<1x8x32xbf16>
    %166 = vector.shape_cast %165 : vector<1x8x32xbf16> to vector<8x32xbf16>
    %cst_101 = arith.constant dense<0.000000e+00> : vector<8x32xf32>
    %167 = tpu.matmul %164, %166, %cst_101 {dimension_numbers = #tpu.dot_dimension_numbers<[1], [0], [0], [1], [0, 0, 1, 1], [], []>} : vector<8x8xbf16>, vector<8x32xbf16>, vector<8x32xf32> -> vector<8x32xf32>
    %168 = arith.addf %122, %167 : vector<8x32xf32>
    %c3 = arith.constant 3 : index
    %c0_102 = arith.constant 0 : index
    %c0_103 = arith.constant 0 : index
    %169 = vector.load %arg4[%c3, %c0_102, %c0_103] : memref<4x32x8xbf16, #tpu.memory_space<vmem>>, vector<1x32x8xbf16>
    %170 = vector.shape_cast %169 : vector<1x32x8xbf16> to vector<32x8xbf16>
    %cst_104 = arith.constant dense<0.000000e+00> : vector<8x8xf32>
    %171 = tpu.matmul %26, %170, %cst_104 {dimension_numbers = #tpu.dot_dimension_numbers<[1], [0], [0], [1], [0, 0, 1, 1], [], []>} : vector<8x32xbf16>, vector<32x8xbf16>, vector<8x8xf32> -> vector<8x8xf32>
    %c3_105 = arith.constant 3 : index
    %c0_106 = arith.constant 0 : index
    %c0_107 = arith.constant 0 : index
    %172 = vector.load %arg5[%c3_105, %c0_106, %c0_107] : memref<4x1x8xf32, #tpu.memory_space<vmem>>, vector<1x1x8xf32>
    %173 = vector.shape_cast %172 : vector<1x1x8xf32> to vector<1x8xf32>
    %174 = vector.broadcast %173 : vector<1x8xf32> to vector<8x8xf32>
    %175 = arith.addf %171, %174 : vector<8x8xf32>
    %c3_108 = arith.constant 3 : index
    %c0_109 = arith.constant 0 : index
    %c0_110 = arith.constant 0 : index
    %176 = vector.load %arg6[%c3_108, %c0_109, %c0_110] : memref<4x32x8xbf16, #tpu.memory_space<vmem>>, vector<1x32x8xbf16>
    %177 = vector.shape_cast %176 : vector<1x32x8xbf16> to vector<32x8xbf16>
    %cst_111 = arith.constant dense<0.000000e+00> : vector<8x8xf32>
    %178 = tpu.matmul %26, %177, %cst_111 {dimension_numbers = #tpu.dot_dimension_numbers<[1], [0], [0], [1], [0, 0, 1, 1], [], []>} : vector<8x32xbf16>, vector<32x8xbf16>, vector<8x8xf32> -> vector<8x8xf32>
    %c3_112 = arith.constant 3 : index
    %c0_113 = arith.constant 0 : index
    %c0_114 = arith.constant 0 : index
    %179 = vector.load %arg7[%c3_112, %c0_113, %c0_114] : memref<4x1x8xf32, #tpu.memory_space<vmem>>, vector<1x1x8xf32>
    %180 = vector.shape_cast %179 : vector<1x1x8xf32> to vector<1x8xf32>
    %181 = vector.broadcast %180 : vector<1x8xf32> to vector<8x8xf32>
    %182 = arith.addf %178, %181 : vector<8x8xf32>
    %c3_115 = arith.constant 3 : index
    %c0_116 = arith.constant 0 : index
    %c0_117 = arith.constant 0 : index
    %183 = vector.load %arg8[%c3_115, %c0_116, %c0_117] : memref<4x32x8xbf16, #tpu.memory_space<vmem>>, vector<1x32x8xbf16>
    %184 = vector.shape_cast %183 : vector<1x32x8xbf16> to vector<32x8xbf16>
    %cst_118 = arith.constant dense<0.000000e+00> : vector<8x8xf32>
    %185 = tpu.matmul %26, %184, %cst_118 {dimension_numbers = #tpu.dot_dimension_numbers<[1], [0], [0], [1], [0, 0, 1, 1], [], []>} : vector<8x32xbf16>, vector<32x8xbf16>, vector<8x8xf32> -> vector<8x8xf32>
    %c3_119 = arith.constant 3 : index
    %c0_120 = arith.constant 0 : index
    %c0_121 = arith.constant 0 : index
    %186 = vector.load %arg9[%c3_119, %c0_120, %c0_121] : memref<4x1x8xf32, #tpu.memory_space<vmem>>, vector<1x1x8xf32>
    %187 = vector.shape_cast %186 : vector<1x1x8xf32> to vector<1x8xf32>
    %188 = vector.broadcast %187 : vector<1x8xf32> to vector<8x8xf32>
    %189 = arith.addf %185, %188 : vector<8x8xf32>
    %190 = arith.truncf %175 : vector<8x8xf32> to vector<8x8xbf16>
    %191 = arith.truncf %182 : vector<8x8xf32> to vector<8x8xbf16>
    %cst_122 = arith.constant dense<0.000000e+00> : vector<8x8xf32>
    %192 = tpu.matmul %190, %191, %cst_122 {dimension_numbers = #tpu.dot_dimension_numbers<[1], [1], [0], [0], [0, 0, 1, 0], [], []>} : vector<8x8xbf16>, vector<8x8xbf16>, vector<8x8xf32> -> vector<8x8xf32>
    %cst_123 = arith.constant 0.176776692 : f32
    %193 = vector.broadcast %cst_123 : f32 to vector<8x8xf32>
    %194 = arith.mulf %192, %193 : vector<8x8xf32>
    %cst_124 = arith.constant -1.000000e+05 : f32
    %195 = vector.broadcast %cst_124 : f32 to vector<8x8xf32>
    %196 = arith.select %29, %195, %194 : vector<8x8xi1>, vector<8x8xf32>
    %cst_125 = arith.constant dense<0xFF800000> : vector<8xf32>
    %197 = vector.multi_reduction <maximumf>, %196, %cst_125 [1] : vector<8x8xf32> to vector<8xf32>
    %198 = vector.shape_cast %197 : vector<8xf32> to vector<8x1xf32>
    %199 = vector.broadcast %198 : vector<8x1xf32> to vector<8x8xf32>
    %200 = arith.subf %196, %199 : vector<8x8xf32>
    %201 = math.exp %200 : vector<8x8xf32>
    %cst_126 = arith.constant dense<0.000000e+00> : vector<8xf32>
    %202 = vector.multi_reduction <add>, %201, %cst_126 [1] : vector<8x8xf32> to vector<8xf32>
    %203 = vector.shape_cast %202 : vector<8xf32> to vector<8x1xf32>
    %204 = tpu.reciprocal %203 {approx = true} : vector<8x1xf32> -> vector<8x1xf32>
    %205 = vector.broadcast %204 : vector<8x1xf32> to vector<8x8xf32>
    %206 = arith.mulf %201, %205 : vector<8x8xf32>
    %207 = arith.truncf %206 : vector<8x8xf32> to vector<8x8xbf16>
    %208 = arith.truncf %189 : vector<8x8xf32> to vector<8x8xbf16>
    %cst_127 = arith.constant dense<0.000000e+00> : vector<8x8xf32>
    %209 = tpu.matmul %207, %208, %cst_127 {dimension_numbers = #tpu.dot_dimension_numbers<[1], [0], [0], [1], [0, 0, 1, 1], [], []>} : vector<8x8xbf16>, vector<8x8xbf16>, vector<8x8xf32> -> vector<8x8xf32>
    %210 = arith.truncf %209 : vector<8x8xf32> to vector<8x8xbf16>
    %c3_128 = arith.constant 3 : index
    %c0_129 = arith.constant 0 : index
    %c0_130 = arith.constant 0 : index
    %211 = vector.load %arg10[%c3_128, %c0_129, %c0_130] : memref<4x8x32xbf16, #tpu.memory_space<vmem>>, vector<1x8x32xbf16>
    %212 = vector.shape_cast %211 : vector<1x8x32xbf16> to vector<8x32xbf16>
    %cst_131 = arith.constant dense<0.000000e+00> : vector<8x32xf32>
    %213 = tpu.matmul %210, %212, %cst_131 {dimension_numbers = #tpu.dot_dimension_numbers<[1], [0], [0], [1], [0, 0, 1, 1], [], []>} : vector<8x8xbf16>, vector<8x32xbf16>, vector<8x32xf32> -> vector<8x32xf32>
    %214 = arith.addf %168, %213 : vector<8x32xf32>
    %215 = arith.addf %1, %214 : vector<8x32xf32>
    %c0_132 = arith.constant 0 : index
    %c0_133 = arith.constant 0 : index
    %216 = vector.load %arg11[%c0_132, %c0_133] : memref<1x32xf32, #tpu.memory_space<vmem>>, vector<1x32xf32>
    %217 = vector.broadcast %216 : vector<1x32xf32> to vector<8x32xf32>
    %218 = arith.addf %215, %217 : vector<8x32xf32>
    %c0_134 = arith.constant 0 : index
    %c0_135 = arith.constant 0 : index
    %c0_136 = arith.constant 0 : index
    %219 = vector.load %arg12[%c0_134, %c0_135, %c0_136] : memref<1x8x32xf32, #tpu.memory_space<vmem>>, vector<1x8x32xf32>
    %220 = vector.shape_cast %219 : vector<1x8x32xf32> to vector<8x32xf32>
    %221 = vector.shape_cast %218 : vector<8x32xf32> to vector<1x8x32xf32>
    tpu.vector_store %arg12[%c0_134, %c0_135, %c0_136], %221 {strides = array<i32>} : memref<1x8x32xf32, #tpu.memory_space<vmem>>, vector<1x8x32xf32>,
    return
  }
  func.func @transform_0(%arg0: i32) -> (i32, i32, i32) {
    %c0_i32 = arith.constant 0 : i32
    %c0_i32_0 = arith.constant 0 : i32
    %c0_i32_1 = arith.constant 0 : i32
    return %arg0, %c0_i32, %c0_i32_0 : i32, i32, i32
  }
  func.func @transform_1(%arg0: i32) -> (i32, i32) {
    %c0_i32 = arith.constant 0 : i32
    %c0_i32_0 = arith.constant 0 : i32
    %c0_i32_1 = arith.constant 0 : i32
    return %c0_i32, %c0_i32_0 : i32, i32
  }
  func.func @transform_2(%arg0: i32) -> (i32, i32) {
    %c0_i32 = arith.constant 0 : i32
    %c0_i32_0 = arith.constant 0 : i32
    %c0_i32_1 = arith.constant 0 : i32
    return %c0_i32, %c0_i32_0 : i32, i32
  }
  func.func @transform_3(%arg0: i32) -> (i32, i32, i32) {
    %c0_i32 = arith.constant 0 : i32
    %c0_i32_0 = arith.constant 0 : i32
    %c0_i32_1 = arith.constant 0 : i32
    %c0_i32_2 = arith.constant 0 : i32
    return %c0_i32, %c0_i32_0, %c0_i32_1 : i32, i32, i32
  }
  func.func @transform_4(%arg0: i32) -> (i32, i32, i32) {
    %c0_i32 = arith.constant 0 : i32
    %c0_i32_0 = arith.constant 0 : i32
    %c0_i32_1 = arith.constant 0 : i32
    %c0_i32_2 = arith.constant 0 : i32
    return %c0_i32, %c0_i32_0, %c0_i32_1 : i32, i32, i32
  }
  func.func @transform_5(%arg0: i32) -> (i32, i32, i32) {
    %c0_i32 = arith.constant 0 : i32
    %c0_i32_0 = arith.constant 0 : i32
    %c0_i32_1 = arith.constant 0 : i32
    %c0_i32_2 = arith.constant 0 : i32
    return %c0_i32, %c0_i32_0, %c0_i32_1 : i32, i32, i32
  }
  func.func @transform_6(%arg0: i32) -> (i32, i32, i32) {
    %c0_i32 = arith.constant 0 : i32
    %c0_i32_0 = arith.constant 0 : i32
    %c0_i32_1 = arith.constant 0 : i32
    %c0_i32_2 = arith.constant 0 : i32
    return %c0_i32, %c0_i32_0, %c0_i32_1 : i32, i32, i32
  }
  func.func @transform_7(%arg0: i32) -> (i32, i32, i32) {
    %c0_i32 = arith.constant 0 : i32
    %c0_i32_0 = arith.constant 0 : i32
    %c0_i32_1 = arith.constant 0 : i32
    %c0_i32_2 = arith.constant 0 : i32
    return %c0_i32, %c0_i32_0, %c0_i32_1 : i32, i32, i32
  }
  func.func @transform_8(%arg0: i32) -> (i32, i32, i32) {
    %c0_i32 = arith.constant 0 : i32
    %c0_i32_0 = arith.constant 0 : i32
    %c0_i32_1 = arith.constant 0 : i32
    %c0_i32_2 = arith.constant 0 : i32
    return %c0_i32, %c0_i32_0, %c0_i32_1 : i32, i32, i32
  }
  func.func @transform_9(%arg0: i32) -> (i32, i32, i32) {
    %c0_i32 = arith.constant 0 : i32
    %c0_i32_0 = arith.constant 0 : i32
    %c0_i32_1 = arith.constant 0 : i32
    %c0_i32_2 = arith.constant 0 : i32
    return %c0_i32, %c0_i32_0, %c0_i32_1 : i32, i32, i32
  }
  func.func @transform_10(%arg0: i32) -> (i32, i32) {
    %c0_i32 = arith.constant 0 : i32
    %c0_i32_0 = arith.constant 0 : i32
    %c0_i32_1 = arith.constant 0 : i32
    return %c0_i32, %c0_i32_0 : i32, i32
  }
  func.func @transform_11(%arg0: i32) -> (i32, i32, i32) {
    %c0_i32 = arith.constant 0 : i32
    %c0_i32_0 = arith.constant 0 : i32
    %c0_i32_1 = arith.constant 0 : i32
    return %arg0, %c0_i32, %c0_i32_0 : i32, i32, i32
  }
}

module attributes {stable_mosaic.version = 11 : i64} {
  func.func @kernel(%arg0: i32, %arg1: memref<1x8x32xf32, #tpu.memory_space<vmem>>, %arg2: memref<1x1x8xf32, #tpu.memory_space<vmem>>, %arg3: memref<1x32xf32, #tpu.memory_space<vmem>>, %arg4: memref<1x32xf32, #tpu.memory_space<vmem>>, %arg5: memref<4x32x8xbf16, #tpu.memory_space<vmem>>, %arg6: memref<4x1x8xf32, #tpu.memory_space<vmem>>, %arg7: memref<4x32x8xbf16, #tpu.memory_space<vmem>>, %arg8: memref<4x1x8xf32, #tpu.memory_space<vmem>>, %arg9: memref<4x32x8xbf16, #tpu.memory_space<vmem>>, %arg10: memref<4x1x8xf32, #tpu.memory_space<vmem>>, %arg11: memref<4x8x32xbf16, #tpu.memory_space<vmem>>, %arg12: memref<1x32xf32, #tpu.memory_space<vmem>>, %arg13: memref<1x8x32xf32, #tpu.memory_space<vmem>>) attributes {dimension_semantics = [#tpu.dimension_semantics<parallel>], iteration_bounds = array<i64: 2>, scalar_prefetch = 0 : i64, scratch_operands = 0 : i64, tpu.core_type = #tpu.core_type<tc>, window_params = [{transform_indices = @transform_0, window_bounds = array<i64: 1, 8, 32>}, {transform_indices = @transform_1, window_bounds = array<i64: 1, 1, 8>}, {pipeline_mode = #tpu.pipeline_mode<synchronous>, transform_indices = @transform_2, window_bounds = array<i64: 1, 32>}, {pipeline_mode = #tpu.pipeline_mode<synchronous>, transform_indices = @transform_3, window_bounds = array<i64: 1, 32>}, {pipeline_mode = #tpu.pipeline_mode<synchronous>, transform_indices = @transform_4, window_bounds = array<i64: 4, 32, 8>}, {pipeline_mode = #tpu.pipeline_mode<synchronous>, transform_indices = @transform_5, window_bounds = array<i64: 4, 1, 8>}, {pipeline_mode = #tpu.pipeline_mode<synchronous>, transform_indices = @transform_6, window_bounds = array<i64: 4, 32, 8>}, {pipeline_mode = #tpu.pipeline_mode<synchronous>, transform_indices = @transform_7, window_bounds = array<i64: 4, 1, 8>}, {pipeline_mode = #tpu.pipeline_mode<synchronous>, transform_indices = @transform_8, window_bounds = array<i64: 4, 32, 8>}, {pipeline_mode = #tpu.pipeline_mode<synchronous>, transform_indices = @transform_9, window_bounds = array<i64: 4, 1, 8>}, {pipeline_mode = #tpu.pipeline_mode<synchronous>, transform_indices = @transform_10, window_bounds = array<i64: 4, 8, 32>}, {pipeline_mode = #tpu.pipeline_mode<synchronous>, transform_indices = @transform_11, window_bounds = array<i64: 1, 32>}, {transform_indices = @transform_12, window_bounds = array<i64: 1, 8, 32>}]} {
    %c0 = arith.constant 0 : index
    %c0_0 = arith.constant 0 : index
    %c0_1 = arith.constant 0 : index
    %0 = vector.load %arg1[%c0, %c0_0, %c0_1] : memref<1x8x32xf32, #tpu.memory_space<vmem>>, vector<1x8x32xf32>
    %1 = vector.shape_cast %0 : vector<1x8x32xf32> to vector<8x32xf32>
    %c0_2 = arith.constant 0 : index
    %c0_3 = arith.constant 0 : index
    %2 = vector.load %arg3[%c0_2, %c0_3] : memref<1x32xf32, #tpu.memory_space<vmem>>, vector<1x32xf32>
    %c0_4 = arith.constant 0 : index
    %c0_5 = arith.constant 0 : index
    %3 = vector.load %arg4[%c0_4, %c0_5] : memref<1x32xf32, #tpu.memory_space<vmem>>, vector<1x32xf32>
    %cst = arith.constant dense<0.000000e+00> : vector<8xf32>
    %4 = vector.multi_reduction <add>, %1, %cst [1] : vector<8x32xf32> to vector<8xf32>
    %5 = vector.shape_cast %4 : vector<8xf32> to vector<8x1xf32>
    %cst_6 = arith.constant 3.200000e+01 : f32
    %6 = vector.broadcast %cst_6 : f32 to vector<8x1xf32>
    %7 = arith.divf %5, %6 : vector<8x1xf32>
    %8 = vector.broadcast %7 : vector<8x1xf32> to vector<8x32xf32>
    %9 = arith.subf %1, %8 : vector<8x32xf32>
    %10 = arith.mulf %9, %9 : vector<8x32xf32>
    %cst_7 = arith.constant dense<0.000000e+00> : vector<8xf32>
    %11 = vector.multi_reduction <add>, %10, %cst_7 [1] : vector<8x32xf32> to vector<8xf32>
    %12 = vector.shape_cast %11 : vector<8xf32> to vector<8x1xf32>
    %cst_8 = arith.constant 3.200000e+01 : f32
    %13 = vector.broadcast %cst_8 : f32 to vector<8x1xf32>
    %14 = arith.divf %12, %13 : vector<8x1xf32>
    %15 = vector.broadcast %7 : vector<8x1xf32> to vector<8x32xf32>
    %16 = arith.subf %1, %15 : vector<8x32xf32>
    %cst_9 = arith.constant 9.99999974E-6 : f32
    %17 = vector.broadcast %cst_9 : f32 to vector<8x1xf32>
    %18 = arith.addf %14, %17 : vector<8x1xf32>
    %19 = math.rsqrt %18 : vector<8x1xf32>
    %20 = vector.broadcast %19 : vector<8x1xf32> to vector<8x32xf32>
    %21 = arith.mulf %16, %20 : vector<8x32xf32>
    %22 = vector.broadcast %2 : vector<1x32xf32> to vector<8x32xf32>
    %23 = arith.mulf %21, %22 : vector<8x32xf32>
    %24 = vector.broadcast %3 : vector<1x32xf32> to vector<8x32xf32>
    %25 = arith.addf %23, %24 : vector<8x32xf32>
    %26 = arith.truncf %25 : vector<8x32xf32> to vector<8x32xbf16>
    %c0_10 = arith.constant 0 : index
    %c0_11 = arith.constant 0 : index
    %c0_12 = arith.constant 0 : index
    %27 = vector.load %arg2[%c0_10, %c0_11, %c0_12] : memref<1x1x8xf32, #tpu.memory_space<vmem>>, vector<1x1x8xf32>
    %28 = vector.shape_cast %27 : vector<1x1x8xf32> to vector<1x8xf32>
    %cst_13 = arith.constant 5.000000e-01 : f32
    %29 = vector.broadcast %cst_13 : f32 to vector<1x8xf32>
    %30 = arith.cmpf ogt, %28, %29 : vector<1x8xf32>
    %cst_14 = arith.constant 0.000000e+00 : f32
    %31 = vector.broadcast %cst_14 : f32 to vector<8x32xf32>
    %c0_15 = arith.constant 0 : index
    %c0_16 = arith.constant 0 : index
    %c0_17 = arith.constant 0 : index
    %32 = vector.load %arg5[%c0_15, %c0_16, %c0_17] : memref<4x32x8xbf16, #tpu.memory_space<vmem>>, vector<1x32x8xbf16>
    %33 = vector.shape_cast %32 : vector<1x32x8xbf16> to vector<32x8xbf16>
    %cst_18 = arith.constant dense<0.000000e+00> : vector<8x8xf32>
    %34 = tpu.matmul %26, %33, %cst_18 {dimension_numbers = #tpu.dot_dimension_numbers<[1], [0], [0], [1], [0, 0, 1, 1], [], []>} : vector<8x32xbf16>, vector<32x8xbf16>, vector<8x8xf32> -> vector<8x8xf32>
    %c0_19 = arith.constant 0 : index
    %c0_20 = arith.constant 0 : index
    %c0_21 = arith.constant 0 : index
    %35 = vector.load %arg6[%c0_19, %c0_20, %c0_21] : memref<4x1x8xf32, #tpu.memory_space<vmem>>, vector<1x1x8xf32>
    %36 = vector.shape_cast %35 : vector<1x1x8xf32> to vector<1x8xf32>
    %37 = vector.broadcast %36 : vector<1x8xf32> to vector<8x8xf32>
    %38 = arith.addf %34, %37 : vector<8x8xf32>
    %c0_22 = arith.constant 0 : index
    %c0_23 = arith.constant 0 : index
    %c0_24 = arith.constant 0 : index
    %39 = vector.load %arg7[%c0_22, %c0_23, %c0_24] : memref<4x32x8xbf16, #tpu.memory_space<vmem>>, vector<1x32x8xbf16>
    %40 = vector.shape_cast %39 : vector<1x32x8xbf16> to vector<32x8xbf16>
    %cst_25 = arith.constant dense<0.000000e+00> : vector<8x8xf32>
    %41 = tpu.matmul %26, %40, %cst_25 {dimension_numbers = #tpu.dot_dimension_numbers<[1], [0], [0], [1], [0, 0, 1, 1], [], []>} : vector<8x32xbf16>, vector<32x8xbf16>, vector<8x8xf32> -> vector<8x8xf32>
    %c0_26 = arith.constant 0 : index
    %c0_27 = arith.constant 0 : index
    %c0_28 = arith.constant 0 : index
    %42 = vector.load %arg8[%c0_26, %c0_27, %c0_28] : memref<4x1x8xf32, #tpu.memory_space<vmem>>, vector<1x1x8xf32>
    %43 = vector.shape_cast %42 : vector<1x1x8xf32> to vector<1x8xf32>
    %44 = vector.broadcast %43 : vector<1x8xf32> to vector<8x8xf32>
    %45 = arith.addf %41, %44 : vector<8x8xf32>
    %c0_29 = arith.constant 0 : index
    %c0_30 = arith.constant 0 : index
    %c0_31 = arith.constant 0 : index
    %46 = vector.load %arg9[%c0_29, %c0_30, %c0_31] : memref<4x32x8xbf16, #tpu.memory_space<vmem>>, vector<1x32x8xbf16>
    %47 = vector.shape_cast %46 : vector<1x32x8xbf16> to vector<32x8xbf16>
    %cst_32 = arith.constant dense<0.000000e+00> : vector<8x8xf32>
    %48 = tpu.matmul %26, %47, %cst_32 {dimension_numbers = #tpu.dot_dimension_numbers<[1], [0], [0], [1], [0, 0, 1, 1], [], []>} : vector<8x32xbf16>, vector<32x8xbf16>, vector<8x8xf32> -> vector<8x8xf32>
    %c0_33 = arith.constant 0 : index
    %c0_34 = arith.constant 0 : index
    %c0_35 = arith.constant 0 : index
    %49 = vector.load %arg10[%c0_33, %c0_34, %c0_35] : memref<4x1x8xf32, #tpu.memory_space<vmem>>, vector<1x1x8xf32>
    %50 = vector.shape_cast %49 : vector<1x1x8xf32> to vector<1x8xf32>
    %51 = vector.broadcast %50 : vector<1x8xf32> to vector<8x8xf32>
    %52 = arith.addf %48, %51 : vector<8x8xf32>
    %53 = arith.truncf %38 : vector<8x8xf32> to vector<8x8xbf16>
    %54 = arith.truncf %45 : vector<8x8xf32> to vector<8x8xbf16>
    %cst_36 = arith.constant dense<0.000000e+00> : vector<8x8xf32>
    %55 = tpu.matmul %53, %54, %cst_36 {dimension_numbers = #tpu.dot_dimension_numbers<[1], [1], [0], [0], [0, 0, 1, 0], [], []>} : vector<8x8xbf16>, vector<8x8xbf16>, vector<8x8xf32> -> vector<8x8xf32>
    %cst_37 = arith.constant 0.176776692 : f32
    %56 = vector.broadcast %cst_37 : f32 to vector<8x8xf32>
    %57 = arith.mulf %55, %56 : vector<8x8xf32>
    %cst_38 = arith.constant -1.000000e+05 : f32
    %58 = vector.shape_cast %30 : vector<1x8xi1> to vector<1x8xi1>
    %59 = vector.broadcast %58 : vector<1x8xi1> to vector<8x8xi1>
    %60 = vector.broadcast %cst_38 : f32 to vector<8x8xf32>
    %61 = arith.select %59, %60, %57 : vector<8x8xi1>, vector<8x8xf32>
    %cst_39 = arith.constant dense<0xFF800000> : vector<8xf32>
    %62 = vector.multi_reduction <maximumf>, %61, %cst_39 [1] : vector<8x8xf32> to vector<8xf32>
    %63 = vector.shape_cast %62 : vector<8xf32> to vector<8x1xf32>
    %64 = vector.broadcast %63 : vector<8x1xf32> to vector<8x8xf32>
    %65 = arith.subf %61, %64 : vector<8x8xf32>
    %66 = math.exp %65 : vector<8x8xf32>
    %cst_40 = arith.constant dense<0.000000e+00> : vector<8xf32>
    %67 = vector.multi_reduction <add>, %66, %cst_40 [1] : vector<8x8xf32> to vector<8xf32>
    %68 = vector.shape_cast %67 : vector<8xf32> to vector<8x1xf32>
    %69 = tpu.reciprocal %68 {approx = true} : vector<8x1xf32> -> vector<8x1xf32>
    %70 = vector.broadcast %69 : vector<8x1xf32> to vector<8x8xf32>
    %71 = arith.mulf %66, %70 : vector<8x8xf32>
    %72 = arith.truncf %71 : vector<8x8xf32> to vector<8x8xbf16>
    %73 = arith.truncf %52 : vector<8x8xf32> to vector<8x8xbf16>
    %cst_41 = arith.constant dense<0.000000e+00> : vector<8x8xf32>
    %74 = tpu.matmul %72, %73, %cst_41 {dimension_numbers = #tpu.dot_dimension_numbers<[1], [0], [0], [1], [0, 0, 1, 1], [], []>} : vector<8x8xbf16>, vector<8x8xbf16>, vector<8x8xf32> -> vector<8x8xf32>
    %75 = arith.truncf %74 : vector<8x8xf32> to vector<8x8xbf16>
    %c0_42 = arith.constant 0 : index
    %c0_43 = arith.constant 0 : index
    %c0_44 = arith.constant 0 : index
    %76 = vector.load %arg11[%c0_42, %c0_43, %c0_44] : memref<4x8x32xbf16, #tpu.memory_space<vmem>>, vector<1x8x32xbf16>
    %77 = vector.shape_cast %76 : vector<1x8x32xbf16> to vector<8x32xbf16>
    %cst_45 = arith.constant dense<0.000000e+00> : vector<8x32xf32>
    %78 = tpu.matmul %75, %77, %cst_45 {dimension_numbers = #tpu.dot_dimension_numbers<[1], [0], [0], [1], [0, 0, 1, 1], [], []>} : vector<8x8xbf16>, vector<8x32xbf16>, vector<8x32xf32> -> vector<8x32xf32>
    %79 = arith.addf %31, %78 : vector<8x32xf32>
    %c1 = arith.constant 1 : index
    %c0_46 = arith.constant 0 : index
    %c0_47 = arith.constant 0 : index
    %80 = vector.load %arg5[%c1, %c0_46, %c0_47] : memref<4x32x8xbf16, #tpu.memory_space<vmem>>, vector<1x32x8xbf16>
    %81 = vector.shape_cast %80 : vector<1x32x8xbf16> to vector<32x8xbf16>
    %cst_48 = arith.constant dense<0.000000e+00> : vector<8x8xf32>
    %82 = tpu.matmul %26, %81, %cst_48 {dimension_numbers = #tpu.dot_dimension_numbers<[1], [0], [0], [1], [0, 0, 1, 1], [], []>} : vector<8x32xbf16>, vector<32x8xbf16>, vector<8x8xf32> -> vector<8x8xf32>
    %c1_49 = arith.constant 1 : index
    %c0_50 = arith.constant 0 : index
    %c0_51 = arith.constant 0 : index
    %83 = vector.load %arg6[%c1_49, %c0_50, %c0_51] : memref<4x1x8xf32, #tpu.memory_space<vmem>>, vector<1x1x8xf32>
    %84 = vector.shape_cast %83 : vector<1x1x8xf32> to vector<1x8xf32>
    %85 = vector.broadcast %84 : vector<1x8xf32> to vector<8x8xf32>
    %86 = arith.addf %82, %85 : vector<8x8xf32>
    %c1_52 = arith.constant 1 : index
    %c0_53 = arith.constant 0 : index
    %c0_54 = arith.constant 0 : index
    %87 = vector.load %arg7[%c1_52, %c0_53, %c0_54] : memref<4x32x8xbf16, #tpu.memory_space<vmem>>, vector<1x32x8xbf16>
    %88 = vector.shape_cast %87 : vector<1x32x8xbf16> to vector<32x8xbf16>
    %cst_55 = arith.constant dense<0.000000e+00> : vector<8x8xf32>
    %89 = tpu.matmul %26, %88, %cst_55 {dimension_numbers = #tpu.dot_dimension_numbers<[1], [0], [0], [1], [0, 0, 1, 1], [], []>} : vector<8x32xbf16>, vector<32x8xbf16>, vector<8x8xf32> -> vector<8x8xf32>
    %c1_56 = arith.constant 1 : index
    %c0_57 = arith.constant 0 : index
    %c0_58 = arith.constant 0 : index
    %90 = vector.load %arg8[%c1_56, %c0_57, %c0_58] : memref<4x1x8xf32, #tpu.memory_space<vmem>>, vector<1x1x8xf32>
    %91 = vector.shape_cast %90 : vector<1x1x8xf32> to vector<1x8xf32>
    %92 = vector.broadcast %91 : vector<1x8xf32> to vector<8x8xf32>
    %93 = arith.addf %89, %92 : vector<8x8xf32>
    %c1_59 = arith.constant 1 : index
    %c0_60 = arith.constant 0 : index
    %c0_61 = arith.constant 0 : index
    %94 = vector.load %arg9[%c1_59, %c0_60, %c0_61] : memref<4x32x8xbf16, #tpu.memory_space<vmem>>, vector<1x32x8xbf16>
    %95 = vector.shape_cast %94 : vector<1x32x8xbf16> to vector<32x8xbf16>
    %cst_62 = arith.constant dense<0.000000e+00> : vector<8x8xf32>
    %96 = tpu.matmul %26, %95, %cst_62 {dimension_numbers = #tpu.dot_dimension_numbers<[1], [0], [0], [1], [0, 0, 1, 1], [], []>} : vector<8x32xbf16>, vector<32x8xbf16>, vector<8x8xf32> -> vector<8x8xf32>
    %c1_63 = arith.constant 1 : index
    %c0_64 = arith.constant 0 : index
    %c0_65 = arith.constant 0 : index
    %97 = vector.load %arg10[%c1_63, %c0_64, %c0_65] : memref<4x1x8xf32, #tpu.memory_space<vmem>>, vector<1x1x8xf32>
    %98 = vector.shape_cast %97 : vector<1x1x8xf32> to vector<1x8xf32>
    %99 = vector.broadcast %98 : vector<1x8xf32> to vector<8x8xf32>
    %100 = arith.addf %96, %99 : vector<8x8xf32>
    %101 = arith.truncf %86 : vector<8x8xf32> to vector<8x8xbf16>
    %102 = arith.truncf %93 : vector<8x8xf32> to vector<8x8xbf16>
    %cst_66 = arith.constant dense<0.000000e+00> : vector<8x8xf32>
    %103 = tpu.matmul %101, %102, %cst_66 {dimension_numbers = #tpu.dot_dimension_numbers<[1], [1], [0], [0], [0, 0, 1, 0], [], []>} : vector<8x8xbf16>, vector<8x8xbf16>, vector<8x8xf32> -> vector<8x8xf32>
    %cst_67 = arith.constant 0.176776692 : f32
    %104 = vector.broadcast %cst_67 : f32 to vector<8x8xf32>
    %105 = arith.mulf %103, %104 : vector<8x8xf32>
    %cst_68 = arith.constant -1.000000e+05 : f32
    %106 = vector.shape_cast %30 : vector<1x8xi1> to vector<1x8xi1>
    %107 = vector.broadcast %106 : vector<1x8xi1> to vector<8x8xi1>
    %108 = vector.broadcast %cst_68 : f32 to vector<8x8xf32>
    %109 = arith.select %107, %108, %105 : vector<8x8xi1>, vector<8x8xf32>
    %cst_69 = arith.constant dense<0xFF800000> : vector<8xf32>
    %110 = vector.multi_reduction <maximumf>, %109, %cst_69 [1] : vector<8x8xf32> to vector<8xf32>
    %111 = vector.shape_cast %110 : vector<8xf32> to vector<8x1xf32>
    %112 = vector.broadcast %111 : vector<8x1xf32> to vector<8x8xf32>
    %113 = arith.subf %109, %112 : vector<8x8xf32>
    %114 = math.exp %113 : vector<8x8xf32>
    %cst_70 = arith.constant dense<0.000000e+00> : vector<8xf32>
    %115 = vector.multi_reduction <add>, %114, %cst_70 [1] : vector<8x8xf32> to vector<8xf32>
    %116 = vector.shape_cast %115 : vector<8xf32> to vector<8x1xf32>
    %117 = tpu.reciprocal %116 {approx = true} : vector<8x1xf32> -> vector<8x1xf32>
    %118 = vector.broadcast %117 : vector<8x1xf32> to vector<8x8xf32>
    %119 = arith.mulf %114, %118 : vector<8x8xf32>
    %120 = arith.truncf %119 : vector<8x8xf32> to vector<8x8xbf16>
    %121 = arith.truncf %100 : vector<8x8xf32> to vector<8x8xbf16>
    %cst_71 = arith.constant dense<0.000000e+00> : vector<8x8xf32>
    %122 = tpu.matmul %120, %121, %cst_71 {dimension_numbers = #tpu.dot_dimension_numbers<[1], [0], [0], [1], [0, 0, 1, 1], [], []>} : vector<8x8xbf16>, vector<8x8xbf16>, vector<8x8xf32> -> vector<8x8xf32>
    %123 = arith.truncf %122 : vector<8x8xf32> to vector<8x8xbf16>
    %c1_72 = arith.constant 1 : index
    %c0_73 = arith.constant 0 : index
    %c0_74 = arith.constant 0 : index
    %124 = vector.load %arg11[%c1_72, %c0_73, %c0_74] : memref<4x8x32xbf16, #tpu.memory_space<vmem>>, vector<1x8x32xbf16>
    %125 = vector.shape_cast %124 : vector<1x8x32xbf16> to vector<8x32xbf16>
    %cst_75 = arith.constant dense<0.000000e+00> : vector<8x32xf32>
    %126 = tpu.matmul %123, %125, %cst_75 {dimension_numbers = #tpu.dot_dimension_numbers<[1], [0], [0], [1], [0, 0, 1, 1], [], []>} : vector<8x8xbf16>, vector<8x32xbf16>, vector<8x32xf32> -> vector<8x32xf32>
    %127 = arith.addf %79, %126 : vector<8x32xf32>
    %c2 = arith.constant 2 : index
    %c0_76 = arith.constant 0 : index
    %c0_77 = arith.constant 0 : index
    %128 = vector.load %arg5[%c2, %c0_76, %c0_77] : memref<4x32x8xbf16, #tpu.memory_space<vmem>>, vector<1x32x8xbf16>
    %129 = vector.shape_cast %128 : vector<1x32x8xbf16> to vector<32x8xbf16>
    %cst_78 = arith.constant dense<0.000000e+00> : vector<8x8xf32>
    %130 = tpu.matmul %26, %129, %cst_78 {dimension_numbers = #tpu.dot_dimension_numbers<[1], [0], [0], [1], [0, 0, 1, 1], [], []>} : vector<8x32xbf16>, vector<32x8xbf16>, vector<8x8xf32> -> vector<8x8xf32>
    %c2_79 = arith.constant 2 : index
    %c0_80 = arith.constant 0 : index
    %c0_81 = arith.constant 0 : index
    %131 = vector.load %arg6[%c2_79, %c0_80, %c0_81] : memref<4x1x8xf32, #tpu.memory_space<vmem>>, vector<1x1x8xf32>
    %132 = vector.shape_cast %131 : vector<1x1x8xf32> to vector<1x8xf32>
    %133 = vector.broadcast %132 : vector<1x8xf32> to vector<8x8xf32>
    %134 = arith.addf %130, %133 : vector<8x8xf32>
    %c2_82 = arith.constant 2 : index
    %c0_83 = arith.constant 0 : index
    %c0_84 = arith.constant 0 : index
    %135 = vector.load %arg7[%c2_82, %c0_83, %c0_84] : memref<4x32x8xbf16, #tpu.memory_space<vmem>>, vector<1x32x8xbf16>
    %136 = vector.shape_cast %135 : vector<1x32x8xbf16> to vector<32x8xbf16>
    %cst_85 = arith.constant dense<0.000000e+00> : vector<8x8xf32>
    %137 = tpu.matmul %26, %136, %cst_85 {dimension_numbers = #tpu.dot_dimension_numbers<[1], [0], [0], [1], [0, 0, 1, 1], [], []>} : vector<8x32xbf16>, vector<32x8xbf16>, vector<8x8xf32> -> vector<8x8xf32>
    %c2_86 = arith.constant 2 : index
    %c0_87 = arith.constant 0 : index
    %c0_88 = arith.constant 0 : index
    %138 = vector.load %arg8[%c2_86, %c0_87, %c0_88] : memref<4x1x8xf32, #tpu.memory_space<vmem>>, vector<1x1x8xf32>
    %139 = vector.shape_cast %138 : vector<1x1x8xf32> to vector<1x8xf32>
    %140 = vector.broadcast %139 : vector<1x8xf32> to vector<8x8xf32>
    %141 = arith.addf %137, %140 : vector<8x8xf32>
    %c2_89 = arith.constant 2 : index
    %c0_90 = arith.constant 0 : index
    %c0_91 = arith.constant 0 : index
    %142 = vector.load %arg9[%c2_89, %c0_90, %c0_91] : memref<4x32x8xbf16, #tpu.memory_space<vmem>>, vector<1x32x8xbf16>
    %143 = vector.shape_cast %142 : vector<1x32x8xbf16> to vector<32x8xbf16>
    %cst_92 = arith.constant dense<0.000000e+00> : vector<8x8xf32>
    %144 = tpu.matmul %26, %143, %cst_92 {dimension_numbers = #tpu.dot_dimension_numbers<[1], [0], [0], [1], [0, 0, 1, 1], [], []>} : vector<8x32xbf16>, vector<32x8xbf16>, vector<8x8xf32> -> vector<8x8xf32>
    %c2_93 = arith.constant 2 : index
    %c0_94 = arith.constant 0 : index
    %c0_95 = arith.constant 0 : index
    %145 = vector.load %arg10[%c2_93, %c0_94, %c0_95] : memref<4x1x8xf32, #tpu.memory_space<vmem>>, vector<1x1x8xf32>
    %146 = vector.shape_cast %145 : vector<1x1x8xf32> to vector<1x8xf32>
    %147 = vector.broadcast %146 : vector<1x8xf32> to vector<8x8xf32>
    %148 = arith.addf %144, %147 : vector<8x8xf32>
    %149 = arith.truncf %134 : vector<8x8xf32> to vector<8x8xbf16>
    %150 = arith.truncf %141 : vector<8x8xf32> to vector<8x8xbf16>
    %cst_96 = arith.constant dense<0.000000e+00> : vector<8x8xf32>
    %151 = tpu.matmul %149, %150, %cst_96 {dimension_numbers = #tpu.dot_dimension_numbers<[1], [1], [0], [0], [0, 0, 1, 0], [], []>} : vector<8x8xbf16>, vector<8x8xbf16>, vector<8x8xf32> -> vector<8x8xf32>
    %cst_97 = arith.constant 0.176776692 : f32
    %152 = vector.broadcast %cst_97 : f32 to vector<8x8xf32>
    %153 = arith.mulf %151, %152 : vector<8x8xf32>
    %cst_98 = arith.constant -1.000000e+05 : f32
    %154 = vector.shape_cast %30 : vector<1x8xi1> to vector<1x8xi1>
    %155 = vector.broadcast %154 : vector<1x8xi1> to vector<8x8xi1>
    %156 = vector.broadcast %cst_98 : f32 to vector<8x8xf32>
    %157 = arith.select %155, %156, %153 : vector<8x8xi1>, vector<8x8xf32>
    %cst_99 = arith.constant dense<0xFF800000> : vector<8xf32>
    %158 = vector.multi_reduction <maximumf>, %157, %cst_99 [1] : vector<8x8xf32> to vector<8xf32>
    %159 = vector.shape_cast %158 : vector<8xf32> to vector<8x1xf32>
    %160 = vector.broadcast %159 : vector<8x1xf32> to vector<8x8xf32>
    %161 = arith.subf %157, %160 : vector<8x8xf32>
    %162 = math.exp %161 : vector<8x8xf32>
    %cst_100 = arith.constant dense<0.000000e+00> : vector<8xf32>
    %163 = vector.multi_reduction <add>, %162, %cst_100 [1] : vector<8x8xf32> to vector<8xf32>
    %164 = vector.shape_cast %163 : vector<8xf32> to vector<8x1xf32>
    %165 = tpu.reciprocal %164 {approx = true} : vector<8x1xf32> -> vector<8x1xf32>
    %166 = vector.broadcast %165 : vector<8x1xf32> to vector<8x8xf32>
    %167 = arith.mulf %162, %166 : vector<8x8xf32>
    %168 = arith.truncf %167 : vector<8x8xf32> to vector<8x8xbf16>
    %169 = arith.truncf %148 : vector<8x8xf32> to vector<8x8xbf16>
    %cst_101 = arith.constant dense<0.000000e+00> : vector<8x8xf32>
    %170 = tpu.matmul %168, %169, %cst_101 {dimension_numbers = #tpu.dot_dimension_numbers<[1], [0], [0], [1], [0, 0, 1, 1], [], []>} : vector<8x8xbf16>, vector<8x8xbf16>, vector<8x8xf32> -> vector<8x8xf32>
    %171 = arith.truncf %170 : vector<8x8xf32> to vector<8x8xbf16>
    %c2_102 = arith.constant 2 : index
    %c0_103 = arith.constant 0 : index
    %c0_104 = arith.constant 0 : index
    %172 = vector.load %arg11[%c2_102, %c0_103, %c0_104] : memref<4x8x32xbf16, #tpu.memory_space<vmem>>, vector<1x8x32xbf16>
    %173 = vector.shape_cast %172 : vector<1x8x32xbf16> to vector<8x32xbf16>
    %cst_105 = arith.constant dense<0.000000e+00> : vector<8x32xf32>
    %174 = tpu.matmul %171, %173, %cst_105 {dimension_numbers = #tpu.dot_dimension_numbers<[1], [0], [0], [1], [0, 0, 1, 1], [], []>} : vector<8x8xbf16>, vector<8x32xbf16>, vector<8x32xf32> -> vector<8x32xf32>
    %175 = arith.addf %127, %174 : vector<8x32xf32>
    %c3 = arith.constant 3 : index
    %c0_106 = arith.constant 0 : index
    %c0_107 = arith.constant 0 : index
    %176 = vector.load %arg5[%c3, %c0_106, %c0_107] : memref<4x32x8xbf16, #tpu.memory_space<vmem>>, vector<1x32x8xbf16>
    %177 = vector.shape_cast %176 : vector<1x32x8xbf16> to vector<32x8xbf16>
    %cst_108 = arith.constant dense<0.000000e+00> : vector<8x8xf32>
    %178 = tpu.matmul %26, %177, %cst_108 {dimension_numbers = #tpu.dot_dimension_numbers<[1], [0], [0], [1], [0, 0, 1, 1], [], []>} : vector<8x32xbf16>, vector<32x8xbf16>, vector<8x8xf32> -> vector<8x8xf32>
    %c3_109 = arith.constant 3 : index
    %c0_110 = arith.constant 0 : index
    %c0_111 = arith.constant 0 : index
    %179 = vector.load %arg6[%c3_109, %c0_110, %c0_111] : memref<4x1x8xf32, #tpu.memory_space<vmem>>, vector<1x1x8xf32>
    %180 = vector.shape_cast %179 : vector<1x1x8xf32> to vector<1x8xf32>
    %181 = vector.broadcast %180 : vector<1x8xf32> to vector<8x8xf32>
    %182 = arith.addf %178, %181 : vector<8x8xf32>
    %c3_112 = arith.constant 3 : index
    %c0_113 = arith.constant 0 : index
    %c0_114 = arith.constant 0 : index
    %183 = vector.load %arg7[%c3_112, %c0_113, %c0_114] : memref<4x32x8xbf16, #tpu.memory_space<vmem>>, vector<1x32x8xbf16>
    %184 = vector.shape_cast %183 : vector<1x32x8xbf16> to vector<32x8xbf16>
    %cst_115 = arith.constant dense<0.000000e+00> : vector<8x8xf32>
    %185 = tpu.matmul %26, %184, %cst_115 {dimension_numbers = #tpu.dot_dimension_numbers<[1], [0], [0], [1], [0, 0, 1, 1], [], []>} : vector<8x32xbf16>, vector<32x8xbf16>, vector<8x8xf32> -> vector<8x8xf32>
    %c3_116 = arith.constant 3 : index
    %c0_117 = arith.constant 0 : index
    %c0_118 = arith.constant 0 : index
    %186 = vector.load %arg8[%c3_116, %c0_117, %c0_118] : memref<4x1x8xf32, #tpu.memory_space<vmem>>, vector<1x1x8xf32>
    %187 = vector.shape_cast %186 : vector<1x1x8xf32> to vector<1x8xf32>
    %188 = vector.broadcast %187 : vector<1x8xf32> to vector<8x8xf32>
    %189 = arith.addf %185, %188 : vector<8x8xf32>
    %c3_119 = arith.constant 3 : index
    %c0_120 = arith.constant 0 : index
    %c0_121 = arith.constant 0 : index
    %190 = vector.load %arg9[%c3_119, %c0_120, %c0_121] : memref<4x32x8xbf16, #tpu.memory_space<vmem>>, vector<1x32x8xbf16>
    %191 = vector.shape_cast %190 : vector<1x32x8xbf16> to vector<32x8xbf16>
    %cst_122 = arith.constant dense<0.000000e+00> : vector<8x8xf32>
    %192 = tpu.matmul %26, %191, %cst_122 {dimension_numbers = #tpu.dot_dimension_numbers<[1], [0], [0], [1], [0, 0, 1, 1], [], []>} : vector<8x32xbf16>, vector<32x8xbf16>, vector<8x8xf32> -> vector<8x8xf32>
    %c3_123 = arith.constant 3 : index
    %c0_124 = arith.constant 0 : index
    %c0_125 = arith.constant 0 : index
    %193 = vector.load %arg10[%c3_123, %c0_124, %c0_125] : memref<4x1x8xf32, #tpu.memory_space<vmem>>, vector<1x1x8xf32>
    %194 = vector.shape_cast %193 : vector<1x1x8xf32> to vector<1x8xf32>
    %195 = vector.broadcast %194 : vector<1x8xf32> to vector<8x8xf32>
    %196 = arith.addf %192, %195 : vector<8x8xf32>
    %197 = arith.truncf %182 : vector<8x8xf32> to vector<8x8xbf16>
    %198 = arith.truncf %189 : vector<8x8xf32> to vector<8x8xbf16>
    %cst_126 = arith.constant dense<0.000000e+00> : vector<8x8xf32>
    %199 = tpu.matmul %197, %198, %cst_126 {dimension_numbers = #tpu.dot_dimension_numbers<[1], [1], [0], [0], [0, 0, 1, 0], [], []>} : vector<8x8xbf16>, vector<8x8xbf16>, vector<8x8xf32> -> vector<8x8xf32>
    %cst_127 = arith.constant 0.176776692 : f32
    %200 = vector.broadcast %cst_127 : f32 to vector<8x8xf32>
    %201 = arith.mulf %199, %200 : vector<8x8xf32>
    %cst_128 = arith.constant -1.000000e+05 : f32
    %202 = vector.shape_cast %30 : vector<1x8xi1> to vector<1x8xi1>
    %203 = vector.broadcast %202 : vector<1x8xi1> to vector<8x8xi1>
    %204 = vector.broadcast %cst_128 : f32 to vector<8x8xf32>
    %205 = arith.select %203, %204, %201 : vector<8x8xi1>, vector<8x8xf32>
    %cst_129 = arith.constant dense<0xFF800000> : vector<8xf32>
    %206 = vector.multi_reduction <maximumf>, %205, %cst_129 [1] : vector<8x8xf32> to vector<8xf32>
    %207 = vector.shape_cast %206 : vector<8xf32> to vector<8x1xf32>
    %208 = vector.broadcast %207 : vector<8x1xf32> to vector<8x8xf32>
    %209 = arith.subf %205, %208 : vector<8x8xf32>
    %210 = math.exp %209 : vector<8x8xf32>
    %cst_130 = arith.constant dense<0.000000e+00> : vector<8xf32>
    %211 = vector.multi_reduction <add>, %210, %cst_130 [1] : vector<8x8xf32> to vector<8xf32>
    %212 = vector.shape_cast %211 : vector<8xf32> to vector<8x1xf32>
    %213 = tpu.reciprocal %212 {approx = true} : vector<8x1xf32> -> vector<8x1xf32>
    %214 = vector.broadcast %213 : vector<8x1xf32> to vector<8x8xf32>
    %215 = arith.mulf %210, %214 : vector<8x8xf32>
    %216 = arith.truncf %215 : vector<8x8xf32> to vector<8x8xbf16>
    %217 = arith.truncf %196 : vector<8x8xf32> to vector<8x8xbf16>
    %cst_131 = arith.constant dense<0.000000e+00> : vector<8x8xf32>
    %218 = tpu.matmul %216, %217, %cst_131 {dimension_numbers = #tpu.dot_dimension_numbers<[1], [0], [0], [1], [0, 0, 1, 1], [], []>} : vector<8x8xbf16>, vector<8x8xbf16>, vector<8x8xf32> -> vector<8x8xf32>
    %219 = arith.truncf %218 : vector<8x8xf32> to vector<8x8xbf16>
    %c3_132 = arith.constant 3 : index
    %c0_133 = arith.constant 0 : index
    %c0_134 = arith.constant 0 : index
    %220 = vector.load %arg11[%c3_132, %c0_133, %c0_134] : memref<4x8x32xbf16, #tpu.memory_space<vmem>>, vector<1x8x32xbf16>
    %221 = vector.shape_cast %220 : vector<1x8x32xbf16> to vector<8x32xbf16>
    %cst_135 = arith.constant dense<0.000000e+00> : vector<8x32xf32>
    %222 = tpu.matmul %219, %221, %cst_135 {dimension_numbers = #tpu.dot_dimension_numbers<[1], [0], [0], [1], [0, 0, 1, 1], [], []>} : vector<8x8xbf16>, vector<8x32xbf16>, vector<8x32xf32> -> vector<8x32xf32>
    %223 = arith.addf %175, %222 : vector<8x32xf32>
    %224 = arith.addf %1, %223 : vector<8x32xf32>
    %c0_136 = arith.constant 0 : index
    %c0_137 = arith.constant 0 : index
    %225 = vector.load %arg12[%c0_136, %c0_137] : memref<1x32xf32, #tpu.memory_space<vmem>>, vector<1x32xf32>
    %226 = vector.broadcast %225 : vector<1x32xf32> to vector<8x32xf32>
    %227 = arith.addf %224, %226 : vector<8x32xf32>
    %c0_138 = arith.constant 0 : index
    %c0_139 = arith.constant 0 : index
    %c0_140 = arith.constant 0 : index
    %228 = vector.load %arg13[%c0_138, %c0_139, %c0_140] : memref<1x8x32xf32, #tpu.memory_space<vmem>>, vector<1x8x32xf32>
    %229 = vector.shape_cast %228 : vector<1x8x32xf32> to vector<8x32xf32>
    %230 = vector.shape_cast %227 : vector<8x32xf32> to vector<1x8x32xf32>
    tpu.vector_store %arg13[%c0_138, %c0_139, %c0_140], %230 {strides = array<i32>} : memref<1x8x32xf32, #tpu.memory_space<vmem>>, vector<1x8x32xf32>,
    return
  }
  func.func @transform_0(%arg0: i32) -> (i32, i32, i32) {
    %c0_i32 = arith.constant 0 : i32
    %c0_i32_0 = arith.constant 0 : i32
    %c0_i32_1 = arith.constant 0 : i32
    return %arg0, %c0_i32, %c0_i32_0 : i32, i32, i32
  }
  func.func @transform_1(%arg0: i32) -> (i32, i32, i32) {
    %c0_i32 = arith.constant 0 : i32
    %c0_i32_0 = arith.constant 0 : i32
    %c0_i32_1 = arith.constant 0 : i32
    return %arg0, %c0_i32, %c0_i32_0 : i32, i32, i32
  }
  func.func @transform_2(%arg0: i32) -> (i32, i32) {
    %c0_i32 = arith.constant 0 : i32
    %c0_i32_0 = arith.constant 0 : i32
    %c0_i32_1 = arith.constant 0 : i32
    return %c0_i32, %c0_i32_0 : i32, i32
  }
  func.func @transform_3(%arg0: i32) -> (i32, i32) {
    %c0_i32 = arith.constant 0 : i32
    %c0_i32_0 = arith.constant 0 : i32
    %c0_i32_1 = arith.constant 0 : i32
    return %c0_i32, %c0_i32_0 : i32, i32
  }
  func.func @transform_4(%arg0: i32) -> (i32, i32, i32) {
    %c0_i32 = arith.constant 0 : i32
    %c0_i32_0 = arith.constant 0 : i32
    %c0_i32_1 = arith.constant 0 : i32
    %c0_i32_2 = arith.constant 0 : i32
    return %c0_i32, %c0_i32_0, %c0_i32_1 : i32, i32, i32
  }
  func.func @transform_5(%arg0: i32) -> (i32, i32, i32) {
    %c0_i32 = arith.constant 0 : i32
    %c0_i32_0 = arith.constant 0 : i32
    %c0_i32_1 = arith.constant 0 : i32
    %c0_i32_2 = arith.constant 0 : i32
    return %c0_i32, %c0_i32_0, %c0_i32_1 : i32, i32, i32
  }
  func.func @transform_6(%arg0: i32) -> (i32, i32, i32) {
    %c0_i32 = arith.constant 0 : i32
    %c0_i32_0 = arith.constant 0 : i32
    %c0_i32_1 = arith.constant 0 : i32
    %c0_i32_2 = arith.constant 0 : i32
    return %c0_i32, %c0_i32_0, %c0_i32_1 : i32, i32, i32
  }
  func.func @transform_7(%arg0: i32) -> (i32, i32, i32) {
    %c0_i32 = arith.constant 0 : i32
    %c0_i32_0 = arith.constant 0 : i32
    %c0_i32_1 = arith.constant 0 : i32
    %c0_i32_2 = arith.constant 0 : i32
    return %c0_i32, %c0_i32_0, %c0_i32_1 : i32, i32, i32
  }
  func.func @transform_8(%arg0: i32) -> (i32, i32, i32) {
    %c0_i32 = arith.constant 0 : i32
    %c0_i32_0 = arith.constant 0 : i32
    %c0_i32_1 = arith.constant 0 : i32
    %c0_i32_2 = arith.constant 0 : i32
    return %c0_i32, %c0_i32_0, %c0_i32_1 : i32, i32, i32
  }
  func.func @transform_9(%arg0: i32) -> (i32, i32, i32) {
    %c0_i32 = arith.constant 0 : i32
    %c0_i32_0 = arith.constant 0 : i32
    %c0_i32_1 = arith.constant 0 : i32
    %c0_i32_2 = arith.constant 0 : i32
    return %c0_i32, %c0_i32_0, %c0_i32_1 : i32, i32, i32
  }
  func.func @transform_10(%arg0: i32) -> (i32, i32, i32) {
    %c0_i32 = arith.constant 0 : i32
    %c0_i32_0 = arith.constant 0 : i32
    %c0_i32_1 = arith.constant 0 : i32
    %c0_i32_2 = arith.constant 0 : i32
    return %c0_i32, %c0_i32_0, %c0_i32_1 : i32, i32, i32
  }
  func.func @transform_11(%arg0: i32) -> (i32, i32) {
    %c0_i32 = arith.constant 0 : i32
    %c0_i32_0 = arith.constant 0 : i32
    %c0_i32_1 = arith.constant 0 : i32
    return %c0_i32, %c0_i32_0 : i32, i32
  }
  func.func @transform_12(%arg0: i32) -> (i32, i32, i32) {
    %c0_i32 = arith.constant 0 : i32
    %c0_i32_0 = arith.constant 0 : i32
    %c0_i32_1 = arith.constant 0 : i32
    return %arg0, %c0_i32, %c0_i32_0 : i32, i32, i32
  }
}

module attributes {stable_mosaic.version = 11 : i64} {
  func.func @kernel(%arg0: i32, %arg1: memref<16x32xf32, #tpu.memory_space<vmem>>, %arg2: memref<1x32xf32, #tpu.memory_space<vmem>>, %arg3: memref<1x32xf32, #tpu.memory_space<vmem>>, %arg4: memref<32x64xbf16, #tpu.memory_space<vmem>>, %arg5: memref<1x64xf32, #tpu.memory_space<vmem>>, %arg6: memref<64x32xbf16, #tpu.memory_space<vmem>>, %arg7: memref<1x32xf32, #tpu.memory_space<vmem>>, %arg8: memref<16x32xf32, #tpu.memory_space<vmem>>) attributes {dimension_semantics = [#tpu.dimension_semantics<parallel>], iteration_bounds = array<i64: 1>, scalar_prefetch = 0 : i64, scratch_operands = 0 : i64, tpu.core_type = #tpu.core_type<tc>, window_params = [{transform_indices = @transform_0, window_bounds = array<i64: 16, 32>}, {pipeline_mode = #tpu.pipeline_mode<synchronous>, transform_indices = @transform_1, window_bounds = array<i64: 1, 32>}, {pipeline_mode = #tpu.pipeline_mode<synchronous>, transform_indices = @transform_2, window_bounds = array<i64: 1, 32>}, {pipeline_mode = #tpu.pipeline_mode<synchronous>, transform_indices = @transform_3, window_bounds = array<i64: 32, 64>}, {pipeline_mode = #tpu.pipeline_mode<synchronous>, transform_indices = @transform_4, window_bounds = array<i64: 1, 64>}, {pipeline_mode = #tpu.pipeline_mode<synchronous>, transform_indices = @transform_5, window_bounds = array<i64: 64, 32>}, {pipeline_mode = #tpu.pipeline_mode<synchronous>, transform_indices = @transform_6, window_bounds = array<i64: 1, 32>}, {transform_indices = @transform_7, window_bounds = array<i64: 16, 32>}]} {
    %c0 = arith.constant 0 : index
    %c0_0 = arith.constant 0 : index
    %0 = vector.load %arg1[%c0, %c0_0] : memref<16x32xf32, #tpu.memory_space<vmem>>, vector<16x32xf32>
    %c0_1 = arith.constant 0 : index
    %c0_2 = arith.constant 0 : index
    %1 = vector.load %arg2[%c0_1, %c0_2] : memref<1x32xf32, #tpu.memory_space<vmem>>, vector<1x32xf32>
    %c0_3 = arith.constant 0 : index
    %c0_4 = arith.constant 0 : index
    %2 = vector.load %arg3[%c0_3, %c0_4] : memref<1x32xf32, #tpu.memory_space<vmem>>, vector<1x32xf32>
    %cst = arith.constant dense<0.000000e+00> : vector<16xf32>
    %3 = vector.multi_reduction <add>, %0, %cst [1] : vector<16x32xf32> to vector<16xf32>
    %4 = vector.shape_cast %3 : vector<16xf32> to vector<16x1xf32>
    %cst_5 = arith.constant 3.200000e+01 : f32
    %5 = vector.broadcast %cst_5 : f32 to vector<16x1xf32>
    %6 = arith.divf %4, %5 : vector<16x1xf32>
    %7 = vector.broadcast %6 : vector<16x1xf32> to vector<16x32xf32>
    %8 = arith.subf %0, %7 : vector<16x32xf32>
    %9 = arith.mulf %8, %8 : vector<16x32xf32>
    %cst_6 = arith.constant dense<0.000000e+00> : vector<16xf32>
    %10 = vector.multi_reduction <add>, %9, %cst_6 [1] : vector<16x32xf32> to vector<16xf32>
    %11 = vector.shape_cast %10 : vector<16xf32> to vector<16x1xf32>
    %cst_7 = arith.constant 3.200000e+01 : f32
    %12 = vector.broadcast %cst_7 : f32 to vector<16x1xf32>
    %13 = arith.divf %11, %12 : vector<16x1xf32>
    %14 = vector.broadcast %6 : vector<16x1xf32> to vector<16x32xf32>
    %15 = arith.subf %0, %14 : vector<16x32xf32>
    %cst_8 = arith.constant 9.99999974E-6 : f32
    %16 = vector.broadcast %cst_8 : f32 to vector<16x1xf32>
    %17 = arith.addf %13, %16 : vector<16x1xf32>
    %18 = math.rsqrt %17 : vector<16x1xf32>
    %19 = vector.broadcast %18 : vector<16x1xf32> to vector<16x32xf32>
    %20 = arith.mulf %15, %19 : vector<16x32xf32>
    %21 = vector.broadcast %1 : vector<1x32xf32> to vector<16x32xf32>
    %22 = arith.mulf %20, %21 : vector<16x32xf32>
    %23 = vector.broadcast %2 : vector<1x32xf32> to vector<16x32xf32>
    %24 = arith.addf %22, %23 : vector<16x32xf32>
    %25 = arith.truncf %24 : vector<16x32xf32> to vector<16x32xbf16>
    %c0_9 = arith.constant 0 : index
    %c0_10 = arith.constant 0 : index
    %26 = vector.load %arg4[%c0_9, %c0_10] : memref<32x64xbf16, #tpu.memory_space<vmem>>, vector<32x64xbf16>
    %cst_11 = arith.constant dense<0.000000e+00> : vector<16x64xf32>
    %27 = tpu.matmul %25, %26, %cst_11 {dimension_numbers = #tpu.dot_dimension_numbers<[1], [0], [0], [1], [0, 0, 1, 1], [], []>} : vector<16x32xbf16>, vector<32x64xbf16>, vector<16x64xf32> -> vector<16x64xf32>
    %c0_12 = arith.constant 0 : index
    %c0_13 = arith.constant 0 : index
    %28 = vector.load %arg5[%c0_12, %c0_13] : memref<1x64xf32, #tpu.memory_space<vmem>>, vector<1x64xf32>
    %29 = vector.broadcast %28 : vector<1x64xf32> to vector<16x64xf32>
    %30 = arith.addf %27, %29 : vector<16x64xf32>
    %cst_14 = arith.constant 0.000000e+00 : f32
    %31 = vector.broadcast %cst_14 : f32 to vector<16x64xf32>
    %32 = arith.maximumf %30, %31 : vector<16x64xf32>
    %33 = arith.truncf %32 : vector<16x64xf32> to vector<16x64xbf16>
    %c0_15 = arith.constant 0 : index
    %c0_16 = arith.constant 0 : index
    %34 = vector.load %arg6[%c0_15, %c0_16] : memref<64x32xbf16, #tpu.memory_space<vmem>>, vector<64x32xbf16>
    %cst_17 = arith.constant dense<0.000000e+00> : vector<16x32xf32>
    %35 = tpu.matmul %33, %34, %cst_17 {dimension_numbers = #tpu.dot_dimension_numbers<[1], [0], [0], [1], [0, 0, 1, 1], [], []>} : vector<16x64xbf16>, vector<64x32xbf16>, vector<16x32xf32> -> vector<16x32xf32>
    %36 = arith.addf %0, %35 : vector<16x32xf32>
    %c0_18 = arith.constant 0 : index
    %c0_19 = arith.constant 0 : index
    %37 = vector.load %arg7[%c0_18, %c0_19] : memref<1x32xf32, #tpu.memory_space<vmem>>, vector<1x32xf32>
    %38 = vector.broadcast %37 : vector<1x32xf32> to vector<16x32xf32>
    %39 = arith.addf %36, %38 : vector<16x32xf32>
    %c0_20 = arith.constant 0 : index
    %c0_21 = arith.constant 0 : index
    %40 = vector.load %arg8[%c0_20, %c0_21] : memref<16x32xf32, #tpu.memory_space<vmem>>, vector<16x32xf32>
    tpu.vector_store %arg8[%c0_20, %c0_21], %39 {strides = array<i32>} : memref<16x32xf32, #tpu.memory_space<vmem>>, vector<16x32xf32>,
    return
  }
  func.func @transform_0(%arg0: i32) -> (i32, i32) {
    %c0_i32 = arith.constant 0 : i32
    %c0_i32_0 = arith.constant 0 : i32
    return %arg0, %c0_i32 : i32, i32
  }
  func.func @transform_1(%arg0: i32) -> (i32, i32) {
    %c0_i32 = arith.constant 0 : i32
    %c0_i32_0 = arith.constant 0 : i32
    %c0_i32_1 = arith.constant 0 : i32
    return %c0_i32, %c0_i32_0 : i32, i32
  }
  func.func @transform_2(%arg0: i32) -> (i32, i32) {
    %c0_i32 = arith.constant 0 : i32
    %c0_i32_0 = arith.constant 0 : i32
    %c0_i32_1 = arith.constant 0 : i32
    return %c0_i32, %c0_i32_0 : i32, i32
  }
  func.func @transform_3(%arg0: i32) -> (i32, i32) {
    %c0_i32 = arith.constant 0 : i32
    %c0_i32_0 = arith.constant 0 : i32
    %c0_i32_1 = arith.constant 0 : i32
    return %c0_i32, %c0_i32_0 : i32, i32
  }
  func.func @transform_4(%arg0: i32) -> (i32, i32) {
    %c0_i32 = arith.constant 0 : i32
    %c0_i32_0 = arith.constant 0 : i32
    %c0_i32_1 = arith.constant 0 : i32
    return %c0_i32, %c0_i32_0 : i32, i32
  }
  func.func @transform_5(%arg0: i32) -> (i32, i32) {
    %c0_i32 = arith.constant 0 : i32
    %c0_i32_0 = arith.constant 0 : i32
    %c0_i32_1 = arith.constant 0 : i32
    return %c0_i32, %c0_i32_0 : i32, i32
  }
  func.func @transform_6(%arg0: i32) -> (i32, i32) {
    %c0_i32 = arith.constant 0 : i32
    %c0_i32_0 = arith.constant 0 : i32
    %c0_i32_1 = arith.constant 0 : i32
    return %c0_i32, %c0_i32_0 : i32, i32
  }
  func.func @transform_7(%arg0: i32) -> (i32, i32) {
    %c0_i32 = arith.constant 0 : i32
    %c0_i32_0 = arith.constant 0 : i32
    return %arg0, %c0_i32 : i32, i32
  }
}

module attributes {stable_mosaic.version = 11 : i64} {
  func.func @kernel(%arg0: i32, %arg1: memref<16x32xf32, #tpu.memory_space<vmem>>, %arg2: memref<1x32xf32, #tpu.memory_space<vmem>>, %arg3: memref<1x32xf32, #tpu.memory_space<vmem>>, %arg4: memref<32x64xbf16, #tpu.memory_space<vmem>>, %arg5: memref<1x64xf32, #tpu.memory_space<vmem>>, %arg6: memref<64x32xbf16, #tpu.memory_space<vmem>>, %arg7: memref<1x32xf32, #tpu.memory_space<vmem>>, %arg8: memref<1x32xf32, #tpu.memory_space<vmem>>, %arg9: memref<1x32xf32, #tpu.memory_space<vmem>>, %arg10: memref<16x32xf32, #tpu.memory_space<vmem>>) attributes {dimension_semantics = [#tpu.dimension_semantics<parallel>], iteration_bounds = array<i64: 1>, scalar_prefetch = 0 : i64, scratch_operands = 0 : i64, tpu.core_type = #tpu.core_type<tc>, window_params = [{transform_indices = @transform_0, window_bounds = array<i64: 16, 32>}, {pipeline_mode = #tpu.pipeline_mode<synchronous>, transform_indices = @transform_1, window_bounds = array<i64: 1, 32>}, {pipeline_mode = #tpu.pipeline_mode<synchronous>, transform_indices = @transform_2, window_bounds = array<i64: 1, 32>}, {pipeline_mode = #tpu.pipeline_mode<synchronous>, transform_indices = @transform_3, window_bounds = array<i64: 32, 64>}, {pipeline_mode = #tpu.pipeline_mode<synchronous>, transform_indices = @transform_4, window_bounds = array<i64: 1, 64>}, {pipeline_mode = #tpu.pipeline_mode<synchronous>, transform_indices = @transform_5, window_bounds = array<i64: 64, 32>}, {pipeline_mode = #tpu.pipeline_mode<synchronous>, transform_indices = @transform_6, window_bounds = array<i64: 1, 32>}, {pipeline_mode = #tpu.pipeline_mode<synchronous>, transform_indices = @transform_7, window_bounds = array<i64: 1, 32>}, {pipeline_mode = #tpu.pipeline_mode<synchronous>, transform_indices = @transform_8, window_bounds = array<i64: 1, 32>}, {transform_indices = @transform_9, window_bounds = array<i64: 16, 32>}]} {
    %c0 = arith.constant 0 : index
    %c0_0 = arith.constant 0 : index
    %0 = vector.load %arg1[%c0, %c0_0] : memref<16x32xf32, #tpu.memory_space<vmem>>, vector<16x32xf32>
    %c0_1 = arith.constant 0 : index
    %c0_2 = arith.constant 0 : index
    %1 = vector.load %arg2[%c0_1, %c0_2] : memref<1x32xf32, #tpu.memory_space<vmem>>, vector<1x32xf32>
    %c0_3 = arith.constant 0 : index
    %c0_4 = arith.constant 0 : index
    %2 = vector.load %arg3[%c0_3, %c0_4] : memref<1x32xf32, #tpu.memory_space<vmem>>, vector<1x32xf32>
    %cst = arith.constant dense<0.000000e+00> : vector<16xf32>
    %3 = vector.multi_reduction <add>, %0, %cst [1] : vector<16x32xf32> to vector<16xf32>
    %4 = vector.shape_cast %3 : vector<16xf32> to vector<16x1xf32>
    %cst_5 = arith.constant 3.200000e+01 : f32
    %5 = vector.broadcast %cst_5 : f32 to vector<16x1xf32>
    %6 = arith.divf %4, %5 : vector<16x1xf32>
    %7 = vector.broadcast %6 : vector<16x1xf32> to vector<16x32xf32>
    %8 = arith.subf %0, %7 : vector<16x32xf32>
    %9 = arith.mulf %8, %8 : vector<16x32xf32>
    %cst_6 = arith.constant dense<0.000000e+00> : vector<16xf32>
    %10 = vector.multi_reduction <add>, %9, %cst_6 [1] : vector<16x32xf32> to vector<16xf32>
    %11 = vector.shape_cast %10 : vector<16xf32> to vector<16x1xf32>
    %cst_7 = arith.constant 3.200000e+01 : f32
    %12 = vector.broadcast %cst_7 : f32 to vector<16x1xf32>
    %13 = arith.divf %11, %12 : vector<16x1xf32>
    %14 = vector.broadcast %6 : vector<16x1xf32> to vector<16x32xf32>
    %15 = arith.subf %0, %14 : vector<16x32xf32>
    %cst_8 = arith.constant 9.99999974E-6 : f32
    %16 = vector.broadcast %cst_8 : f32 to vector<16x1xf32>
    %17 = arith.addf %13, %16 : vector<16x1xf32>
    %18 = math.rsqrt %17 : vector<16x1xf32>
    %19 = vector.broadcast %18 : vector<16x1xf32> to vector<16x32xf32>
    %20 = arith.mulf %15, %19 : vector<16x32xf32>
    %21 = vector.broadcast %1 : vector<1x32xf32> to vector<16x32xf32>
    %22 = arith.mulf %20, %21 : vector<16x32xf32>
    %23 = vector.broadcast %2 : vector<1x32xf32> to vector<16x32xf32>
    %24 = arith.addf %22, %23 : vector<16x32xf32>
    %25 = arith.truncf %24 : vector<16x32xf32> to vector<16x32xbf16>
    %c0_9 = arith.constant 0 : index
    %c0_10 = arith.constant 0 : index
    %26 = vector.load %arg4[%c0_9, %c0_10] : memref<32x64xbf16, #tpu.memory_space<vmem>>, vector<32x64xbf16>
    %cst_11 = arith.constant dense<0.000000e+00> : vector<16x64xf32>
    %27 = tpu.matmul %25, %26, %cst_11 {dimension_numbers = #tpu.dot_dimension_numbers<[1], [0], [0], [1], [0, 0, 1, 1], [], []>} : vector<16x32xbf16>, vector<32x64xbf16>, vector<16x64xf32> -> vector<16x64xf32>
    %c0_12 = arith.constant 0 : index
    %c0_13 = arith.constant 0 : index
    %28 = vector.load %arg5[%c0_12, %c0_13] : memref<1x64xf32, #tpu.memory_space<vmem>>, vector<1x64xf32>
    %29 = vector.broadcast %28 : vector<1x64xf32> to vector<16x64xf32>
    %30 = arith.addf %27, %29 : vector<16x64xf32>
    %cst_14 = arith.constant 0.000000e+00 : f32
    %31 = vector.broadcast %cst_14 : f32 to vector<16x64xf32>
    %32 = arith.maximumf %30, %31 : vector<16x64xf32>
    %33 = arith.truncf %32 : vector<16x64xf32> to vector<16x64xbf16>
    %c0_15 = arith.constant 0 : index
    %c0_16 = arith.constant 0 : index
    %34 = vector.load %arg6[%c0_15, %c0_16] : memref<64x32xbf16, #tpu.memory_space<vmem>>, vector<64x32xbf16>
    %cst_17 = arith.constant dense<0.000000e+00> : vector<16x32xf32>
    %35 = tpu.matmul %33, %34, %cst_17 {dimension_numbers = #tpu.dot_dimension_numbers<[1], [0], [0], [1], [0, 0, 1, 1], [], []>} : vector<16x64xbf16>, vector<64x32xbf16>, vector<16x32xf32> -> vector<16x32xf32>
    %36 = arith.addf %0, %35 : vector<16x32xf32>
    %c0_18 = arith.constant 0 : index
    %c0_19 = arith.constant 0 : index
    %37 = vector.load %arg7[%c0_18, %c0_19] : memref<1x32xf32, #tpu.memory_space<vmem>>, vector<1x32xf32>
    %38 = vector.broadcast %37 : vector<1x32xf32> to vector<16x32xf32>
    %39 = arith.addf %36, %38 : vector<16x32xf32>
    %c0_20 = arith.constant 0 : index
    %c0_21 = arith.constant 0 : index
    %40 = vector.load %arg8[%c0_20, %c0_21] : memref<1x32xf32, #tpu.memory_space<vmem>>, vector<1x32xf32>
    %c0_22 = arith.constant 0 : index
    %c0_23 = arith.constant 0 : index
    %41 = vector.load %arg9[%c0_22, %c0_23] : memref<1x32xf32, #tpu.memory_space<vmem>>, vector<1x32xf32>
    %cst_24 = arith.constant dense<0.000000e+00> : vector<16xf32>
    %42 = vector.multi_reduction <add>, %39, %cst_24 [1] : vector<16x32xf32> to vector<16xf32>
    %43 = vector.shape_cast %42 : vector<16xf32> to vector<16x1xf32>
    %cst_25 = arith.constant 3.200000e+01 : f32
    %44 = vector.broadcast %cst_25 : f32 to vector<16x1xf32>
    %45 = arith.divf %43, %44 : vector<16x1xf32>
    %46 = vector.broadcast %45 : vector<16x1xf32> to vector<16x32xf32>
    %47 = arith.subf %39, %46 : vector<16x32xf32>
    %48 = arith.mulf %47, %47 : vector<16x32xf32>
    %cst_26 = arith.constant dense<0.000000e+00> : vector<16xf32>
    %49 = vector.multi_reduction <add>, %48, %cst_26 [1] : vector<16x32xf32> to vector<16xf32>
    %50 = vector.shape_cast %49 : vector<16xf32> to vector<16x1xf32>
    %cst_27 = arith.constant 3.200000e+01 : f32
    %51 = vector.broadcast %cst_27 : f32 to vector<16x1xf32>
    %52 = arith.divf %50, %51 : vector<16x1xf32>
    %53 = vector.broadcast %45 : vector<16x1xf32> to vector<16x32xf32>
    %54 = arith.subf %39, %53 : vector<16x32xf32>
    %cst_28 = arith.constant 9.99999974E-6 : f32
    %55 = vector.broadcast %cst_28 : f32 to vector<16x1xf32>
    %56 = arith.addf %52, %55 : vector<16x1xf32>
    %57 = math.rsqrt %56 : vector<16x1xf32>
    %58 = vector.broadcast %57 : vector<16x1xf32> to vector<16x32xf32>
    %59 = arith.mulf %54, %58 : vector<16x32xf32>
    %60 = vector.broadcast %40 : vector<1x32xf32> to vector<16x32xf32>
    %61 = arith.mulf %59, %60 : vector<16x32xf32>
    %62 = vector.broadcast %41 : vector<1x32xf32> to vector<16x32xf32>
    %63 = arith.addf %61, %62 : vector<16x32xf32>
    %c0_29 = arith.constant 0 : index
    %c0_30 = arith.constant 0 : index
    %64 = vector.load %arg10[%c0_29, %c0_30] : memref<16x32xf32, #tpu.memory_space<vmem>>, vector<16x32xf32>
    tpu.vector_store %arg10[%c0_29, %c0_30], %63 {strides = array<i32>} : memref<16x32xf32, #tpu.memory_space<vmem>>, vector<16x32xf32>,
    return
  }
  func.func @transform_0(%arg0: i32) -> (i32, i32) {
    %c0_i32 = arith.constant 0 : i32
    %c0_i32_0 = arith.constant 0 : i32
    return %arg0, %c0_i32 : i32, i32
  }
  func.func @transform_1(%arg0: i32) -> (i32, i32) {
    %c0_i32 = arith.constant 0 : i32
    %c0_i32_0 = arith.constant 0 : i32
    %c0_i32_1 = arith.constant 0 : i32
    return %c0_i32, %c0_i32_0 : i32, i32
  }
  func.func @transform_2(%arg0: i32) -> (i32, i32) {
    %c0_i32 = arith.constant 0 : i32
    %c0_i32_0 = arith.constant 0 : i32
    %c0_i32_1 = arith.constant 0 : i32
    return %c0_i32, %c0_i32_0 : i32, i32
  }
  func.func @transform_3(%arg0: i32) -> (i32, i32) {
    %c0_i32 = arith.constant 0 : i32
    %c0_i32_0 = arith.constant 0 : i32
    %c0_i32_1 = arith.constant 0 : i32
    return %c0_i32, %c0_i32_0 : i32, i32
  }
  func.func @transform_4(%arg0: i32) -> (i32, i32) {
    %c0_i32 = arith.constant 0 : i32
    %c0_i32_0 = arith.constant 0 : i32
    %c0_i32_1 = arith.constant 0 : i32
    return %c0_i32, %c0_i32_0 : i32, i32
  }
  func.func @transform_5(%arg0: i32) -> (i32, i32) {
    %c0_i32 = arith.constant 0 : i32
    %c0_i32_0 = arith.constant 0 : i32
    %c0_i32_1 = arith.constant 0 : i32
    return %c0_i32, %c0_i32_0 : i32, i32
  }
  func.func @transform_6(%arg0: i32) -> (i32, i32) {
    %c0_i32 = arith.constant 0 : i32
    %c0_i32_0 = arith.constant 0 : i32
    %c0_i32_1 = arith.constant 0 : i32
    return %c0_i32, %c0_i32_0 : i32, i32
  }
  func.func @transform_7(%arg0: i32) -> (i32, i32) {
    %c0_i32 = arith.constant 0 : i32
    %c0_i32_0 = arith.constant 0 : i32
    %c0_i32_1 = arith.constant 0 : i32
    return %c0_i32, %c0_i32_0 : i32, i32
  }
  func.func @transform_8(%arg0: i32) -> (i32, i32) {
    %c0_i32 = arith.constant 0 : i32
    %c0_i32_0 = arith.constant 0 : i32
    %c0_i32_1 = arith.constant 0 : i32
    return %c0_i32, %c0_i32_0 : i32, i32
  }
  func.func @transform_9(%arg0: i32) -> (i32, i32) {
    %c0_i32 = arith.constant 0 : i32
    %c0_i32_0 = arith.constant 0 : i32
    return %arg0, %c0_i32 : i32, i32
  }
}

module attributes {stable_mosaic.version = 11 : i64} {
  func.func @_head_kernel(%arg0: i32, %arg1: memref<16x32xf32, #tpu.memory_space<vmem>>, %arg2: memref<1x32xf32, #tpu.memory_space<vmem>>, %arg3: memref<1x32xf32, #tpu.memory_space<vmem>>, %arg4: memref<32x32xbf16, #tpu.memory_space<vmem>>, %arg5: memref<1x32xf32, #tpu.memory_space<vmem>>, %arg6: memref<64x32xbf16, #tpu.memory_space<vmem>>, %arg7: memref<1x64xf32, #tpu.memory_space<vmem>>, %arg8: memref<16x64xf32, #tpu.memory_space<vmem>>) attributes {dimension_semantics = [#tpu.dimension_semantics<parallel>], iteration_bounds = array<i64: 1>, scalar_prefetch = 0 : i64, scratch_operands = 0 : i64, tpu.core_type = #tpu.core_type<tc>, window_params = [{transform_indices = @transform_0, window_bounds = array<i64: 16, 32>}, {pipeline_mode = #tpu.pipeline_mode<synchronous>, transform_indices = @transform_1, window_bounds = array<i64: 1, 32>}, {pipeline_mode = #tpu.pipeline_mode<synchronous>, transform_indices = @transform_2, window_bounds = array<i64: 1, 32>}, {pipeline_mode = #tpu.pipeline_mode<synchronous>, transform_indices = @transform_3, window_bounds = array<i64: 32, 32>}, {pipeline_mode = #tpu.pipeline_mode<synchronous>, transform_indices = @transform_4, window_bounds = array<i64: 1, 32>}, {pipeline_mode = #tpu.pipeline_mode<synchronous>, transform_indices = @transform_5, window_bounds = array<i64: 64, 32>}, {pipeline_mode = #tpu.pipeline_mode<synchronous>, transform_indices = @transform_6, window_bounds = array<i64: 1, 64>}, {transform_indices = @transform_7, window_bounds = array<i64: 16, 64>}]} {
    %c0 = arith.constant 0 : index
    %c0_0 = arith.constant 0 : index
    %0 = vector.load %arg1[%c0, %c0_0] : memref<16x32xf32, #tpu.memory_space<vmem>>, vector<16x32xf32>
    %c0_1 = arith.constant 0 : index
    %c0_2 = arith.constant 0 : index
    %1 = vector.load %arg2[%c0_1, %c0_2] : memref<1x32xf32, #tpu.memory_space<vmem>>, vector<1x32xf32>
    %c0_3 = arith.constant 0 : index
    %c0_4 = arith.constant 0 : index
    %2 = vector.load %arg3[%c0_3, %c0_4] : memref<1x32xf32, #tpu.memory_space<vmem>>, vector<1x32xf32>
    %cst = arith.constant dense<0.000000e+00> : vector<16xf32>
    %3 = vector.multi_reduction <add>, %0, %cst [1] : vector<16x32xf32> to vector<16xf32>
    %4 = vector.shape_cast %3 : vector<16xf32> to vector<16x1xf32>
    %cst_5 = arith.constant 3.200000e+01 : f32
    %5 = vector.broadcast %cst_5 : f32 to vector<16x1xf32>
    %6 = arith.divf %4, %5 : vector<16x1xf32>
    %7 = vector.broadcast %6 : vector<16x1xf32> to vector<16x32xf32>
    %8 = arith.subf %0, %7 : vector<16x32xf32>
    %9 = arith.mulf %8, %8 : vector<16x32xf32>
    %cst_6 = arith.constant dense<0.000000e+00> : vector<16xf32>
    %10 = vector.multi_reduction <add>, %9, %cst_6 [1] : vector<16x32xf32> to vector<16xf32>
    %11 = vector.shape_cast %10 : vector<16xf32> to vector<16x1xf32>
    %cst_7 = arith.constant 3.200000e+01 : f32
    %12 = vector.broadcast %cst_7 : f32 to vector<16x1xf32>
    %13 = arith.divf %11, %12 : vector<16x1xf32>
    %14 = vector.broadcast %6 : vector<16x1xf32> to vector<16x32xf32>
    %15 = arith.subf %0, %14 : vector<16x32xf32>
    %cst_8 = arith.constant 9.99999974E-6 : f32
    %16 = vector.broadcast %cst_8 : f32 to vector<16x1xf32>
    %17 = arith.addf %13, %16 : vector<16x1xf32>
    %18 = math.rsqrt %17 : vector<16x1xf32>
    %19 = vector.broadcast %18 : vector<16x1xf32> to vector<16x32xf32>
    %20 = arith.mulf %15, %19 : vector<16x32xf32>
    %21 = vector.broadcast %1 : vector<1x32xf32> to vector<16x32xf32>
    %22 = arith.mulf %20, %21 : vector<16x32xf32>
    %23 = vector.broadcast %2 : vector<1x32xf32> to vector<16x32xf32>
    %24 = arith.addf %22, %23 : vector<16x32xf32>
    %25 = arith.truncf %24 : vector<16x32xf32> to vector<16x32xbf16>
    %c0_9 = arith.constant 0 : index
    %c0_10 = arith.constant 0 : index
    %26 = vector.load %arg4[%c0_9, %c0_10] : memref<32x32xbf16, #tpu.memory_space<vmem>>, vector<32x32xbf16>
    %cst_11 = arith.constant dense<0.000000e+00> : vector<16x32xf32>
    %27 = tpu.matmul %25, %26, %cst_11 {dimension_numbers = #tpu.dot_dimension_numbers<[1], [0], [0], [1], [0, 0, 1, 1], [], []>} : vector<16x32xbf16>, vector<32x32xbf16>, vector<16x32xf32> -> vector<16x32xf32>
    %c0_12 = arith.constant 0 : index
    %c0_13 = arith.constant 0 : index
    %28 = vector.load %arg5[%c0_12, %c0_13] : memref<1x32xf32, #tpu.memory_space<vmem>>, vector<1x32xf32>
    %29 = vector.broadcast %28 : vector<1x32xf32> to vector<16x32xf32>
    %30 = arith.addf %27, %29 : vector<16x32xf32>
    %31 = arith.truncf %30 : vector<16x32xf32> to vector<16x32xbf16>
    %c0_14 = arith.constant 0 : index
    %c0_15 = arith.constant 0 : index
    %32 = vector.load %arg6[%c0_14, %c0_15] : memref<64x32xbf16, #tpu.memory_space<vmem>>, vector<64x32xbf16>
    %cst_16 = arith.constant dense<0.000000e+00> : vector<16x64xf32>
    %33 = tpu.matmul %31, %32, %cst_16 {dimension_numbers = #tpu.dot_dimension_numbers<[1], [1], [0], [0], [0, 0, 1, 0], [], []>} : vector<16x32xbf16>, vector<64x32xbf16>, vector<16x64xf32> -> vector<16x64xf32>
    %c0_17 = arith.constant 0 : index
    %c0_18 = arith.constant 0 : index
    %34 = vector.load %arg7[%c0_17, %c0_18] : memref<1x64xf32, #tpu.memory_space<vmem>>, vector<1x64xf32>
    %35 = vector.broadcast %34 : vector<1x64xf32> to vector<16x64xf32>
    %36 = arith.addf %33, %35 : vector<16x64xf32>
    %cst_19 = arith.constant dense<0xFF800000> : vector<16xf32>
    %37 = vector.multi_reduction <maximumf>, %36, %cst_19 [1] : vector<16x64xf32> to vector<16xf32>
    %38 = vector.shape_cast %37 : vector<16xf32> to vector<16x1xf32>
    %39 = vector.broadcast %38 : vector<16x1xf32> to vector<16x64xf32>
    %40 = arith.subf %36, %39 : vector<16x64xf32>
    %41 = math.exp %40 : vector<16x64xf32>
    %cst_20 = arith.constant dense<0.000000e+00> : vector<16xf32>
    %42 = vector.multi_reduction <add>, %41, %cst_20 [1] : vector<16x64xf32> to vector<16xf32>
    %43 = vector.shape_cast %42 : vector<16xf32> to vector<16x1xf32>
    %44 = math.log %43 : vector<16x1xf32>
    %45 = vector.broadcast %44 : vector<16x1xf32> to vector<16x64xf32>
    %46 = arith.subf %40, %45 : vector<16x64xf32>
    %c0_21 = arith.constant 0 : index
    %c0_22 = arith.constant 0 : index
    %47 = vector.load %arg8[%c0_21, %c0_22] : memref<16x64xf32, #tpu.memory_space<vmem>>, vector<16x64xf32>
    tpu.vector_store %arg8[%c0_21, %c0_22], %46 {strides = array<i32>} : memref<16x64xf32, #tpu.memory_space<vmem>>, vector<16x64xf32>,
    return
  }
  func.func @transform_0(%arg0: i32) -> (i32, i32) {
    %c0_i32 = arith.constant 0 : i32
    %c0_i32_0 = arith.constant 0 : i32
    return %arg0, %c0_i32 : i32, i32
  }
  func.func @transform_1(%arg0: i32) -> (i32, i32) {
    %c0_i32 = arith.constant 0 : i32
    %c0_i32_0 = arith.constant 0 : i32
    %c0_i32_1 = arith.constant 0 : i32
    return %c0_i32, %c0_i32_0 : i32, i32
  }
  func.func @transform_2(%arg0: i32) -> (i32, i32) {
    %c0_i32 = arith.constant 0 : i32
    %c0_i32_0 = arith.constant 0 : i32
    %c0_i32_1 = arith.constant 0 : i32
    return %c0_i32, %c0_i32_0 : i32, i32
  }
  func.func @transform_3(%arg0: i32) -> (i32, i32) {
    %c0_i32 = arith.constant 0 : i32
    %c0_i32_0 = arith.constant 0 : i32
    %c0_i32_1 = arith.constant 0 : i32
    return %c0_i32, %c0_i32_0 : i32, i32
  }
  func.func @transform_4(%arg0: i32) -> (i32, i32) {
    %c0_i32 = arith.constant 0 : i32
    %c0_i32_0 = arith.constant 0 : i32
    %c0_i32_1 = arith.constant 0 : i32
    return %c0_i32, %c0_i32_0 : i32, i32
  }
  func.func @transform_5(%arg0: i32) -> (i32, i32) {
    %c0_i32 = arith.constant 0 : i32
    %c0_i32_0 = arith.constant 0 : i32
    %c0_i32_1 = arith.constant 0 : i32
    return %c0_i32, %c0_i32_0 : i32, i32
  }
  func.func @transform_6(%arg0: i32) -> (i32, i32) {
    %c0_i32 = arith.constant 0 : i32
    %c0_i32_0 = arith.constant 0 : i32
    %c0_i32_1 = arith.constant 0 : i32
    return %c0_i32, %c0_i32_0 : i32, i32
  }
  func.func @transform_7(%arg0: i32) -> (i32, i32) {
    %c0_i32 = arith.constant 0 : i32
    %c0_i32_0 = arith.constant 0 : i32
    return %arg0, %c0_i32 : i32, i32
  }
}

module attributes {stable_mosaic.version = 11 : i64} {
  func.func @kernel(%arg0: i32, %arg1: memref<1x8x32xf32, #tpu.memory_space<vmem>>, %arg2: memref<1x8x32xf32, #tpu.memory_space<vmem>>, %arg3: memref<1x1x8xf32, #tpu.memory_space<vmem>>, %arg4: memref<1x32xf32, #tpu.memory_space<vmem>>, %arg5: memref<1x32xf32, #tpu.memory_space<vmem>>, %arg6: memref<4x32x8xbf16, #tpu.memory_space<vmem>>, %arg7: memref<4x1x8xf32, #tpu.memory_space<vmem>>, %arg8: memref<4x32x8xbf16, #tpu.memory_space<vmem>>, %arg9: memref<4x1x8xf32, #tpu.memory_space<vmem>>, %arg10: memref<4x32x8xbf16, #tpu.memory_space<vmem>>, %arg11: memref<4x1x8xf32, #tpu.memory_space<vmem>>, %arg12: memref<4x8x32xbf16, #tpu.memory_space<vmem>>, %arg13: memref<1x32xf32, #tpu.memory_space<vmem>>, %arg14: memref<1x8x32xf32, #tpu.memory_space<vmem>>) attributes {dimension_semantics = [#tpu.dimension_semantics<parallel>], iteration_bounds = array<i64: 2>, scalar_prefetch = 0 : i64, scratch_operands = 0 : i64, tpu.core_type = #tpu.core_type<tc>, window_params = [{transform_indices = @transform_0, window_bounds = array<i64: 1, 8, 32>}, {transform_indices = @transform_1, window_bounds = array<i64: 1, 8, 32>}, {transform_indices = @transform_2, window_bounds = array<i64: 1, 1, 8>}, {pipeline_mode = #tpu.pipeline_mode<synchronous>, transform_indices = @transform_3, window_bounds = array<i64: 1, 32>}, {pipeline_mode = #tpu.pipeline_mode<synchronous>, transform_indices = @transform_4, window_bounds = array<i64: 1, 32>}, {pipeline_mode = #tpu.pipeline_mode<synchronous>, transform_indices = @transform_5, window_bounds = array<i64: 4, 32, 8>}, {pipeline_mode = #tpu.pipeline_mode<synchronous>, transform_indices = @transform_6, window_bounds = array<i64: 4, 1, 8>}, {pipeline_mode = #tpu.pipeline_mode<synchronous>, transform_indices = @transform_7, window_bounds = array<i64: 4, 32, 8>}, {pipeline_mode = #tpu.pipeline_mode<synchronous>, transform_indices = @transform_8, window_bounds = array<i64: 4, 1, 8>}, {pipeline_mode = #tpu.pipeline_mode<synchronous>, transform_indices = @transform_9, window_bounds = array<i64: 4, 32, 8>}, {pipeline_mode = #tpu.pipeline_mode<synchronous>, transform_indices = @transform_10, window_bounds = array<i64: 4, 1, 8>}, {pipeline_mode = #tpu.pipeline_mode<synchronous>, transform_indices = @transform_11, window_bounds = array<i64: 4, 8, 32>}, {pipeline_mode = #tpu.pipeline_mode<synchronous>, transform_indices = @transform_12, window_bounds = array<i64: 1, 32>}, {transform_indices = @transform_13, window_bounds = array<i64: 1, 8, 32>}]} {
    %c0 = arith.constant 0 : index
    %c0_0 = arith.constant 0 : index
    %c0_1 = arith.constant 0 : index
    %0 = vector.load %arg1[%c0, %c0_0, %c0_1] : memref<1x8x32xf32, #tpu.memory_space<vmem>>, vector<1x8x32xf32>
    %1 = vector.shape_cast %0 : vector<1x8x32xf32> to vector<8x32xf32>
    %c0_2 = arith.constant 0 : index
    %c0_3 = arith.constant 0 : index
    %2 = vector.load %arg4[%c0_2, %c0_3] : memref<1x32xf32, #tpu.memory_space<vmem>>, vector<1x32xf32>
    %c0_4 = arith.constant 0 : index
    %c0_5 = arith.constant 0 : index
    %3 = vector.load %arg5[%c0_4, %c0_5] : memref<1x32xf32, #tpu.memory_space<vmem>>, vector<1x32xf32>
    %cst = arith.constant dense<0.000000e+00> : vector<8xf32>
    %4 = vector.multi_reduction <add>, %1, %cst [1] : vector<8x32xf32> to vector<8xf32>
    %5 = vector.shape_cast %4 : vector<8xf32> to vector<8x1xf32>
    %cst_6 = arith.constant 3.200000e+01 : f32
    %6 = vector.broadcast %cst_6 : f32 to vector<8x1xf32>
    %7 = arith.divf %5, %6 : vector<8x1xf32>
    %8 = vector.broadcast %7 : vector<8x1xf32> to vector<8x32xf32>
    %9 = arith.subf %1, %8 : vector<8x32xf32>
    %10 = arith.mulf %9, %9 : vector<8x32xf32>
    %cst_7 = arith.constant dense<0.000000e+00> : vector<8xf32>
    %11 = vector.multi_reduction <add>, %10, %cst_7 [1] : vector<8x32xf32> to vector<8xf32>
    %12 = vector.shape_cast %11 : vector<8xf32> to vector<8x1xf32>
    %cst_8 = arith.constant 3.200000e+01 : f32
    %13 = vector.broadcast %cst_8 : f32 to vector<8x1xf32>
    %14 = arith.divf %12, %13 : vector<8x1xf32>
    %15 = vector.broadcast %7 : vector<8x1xf32> to vector<8x32xf32>
    %16 = arith.subf %1, %15 : vector<8x32xf32>
    %cst_9 = arith.constant 9.99999974E-6 : f32
    %17 = vector.broadcast %cst_9 : f32 to vector<8x1xf32>
    %18 = arith.addf %14, %17 : vector<8x1xf32>
    %19 = math.rsqrt %18 : vector<8x1xf32>
    %20 = vector.broadcast %19 : vector<8x1xf32> to vector<8x32xf32>
    %21 = arith.mulf %16, %20 : vector<8x32xf32>
    %22 = vector.broadcast %2 : vector<1x32xf32> to vector<8x32xf32>
    %23 = arith.mulf %21, %22 : vector<8x32xf32>
    %24 = vector.broadcast %3 : vector<1x32xf32> to vector<8x32xf32>
    %25 = arith.addf %23, %24 : vector<8x32xf32>
    %26 = arith.truncf %25 : vector<8x32xf32> to vector<8x32xbf16>
    %c0_10 = arith.constant 0 : index
    %c0_11 = arith.constant 0 : index
    %c0_12 = arith.constant 0 : index
    %27 = vector.load %arg2[%c0_10, %c0_11, %c0_12] : memref<1x8x32xf32, #tpu.memory_space<vmem>>, vector<1x8x32xf32>
    %28 = vector.shape_cast %27 : vector<1x8x32xf32> to vector<8x32xf32>
    %29 = arith.truncf %28 : vector<8x32xf32> to vector<8x32xbf16>
    %c0_13 = arith.constant 0 : index
    %c0_14 = arith.constant 0 : index
    %c0_15 = arith.constant 0 : index
    %30 = vector.load %arg3[%c0_13, %c0_14, %c0_15] : memref<1x1x8xf32, #tpu.memory_space<vmem>>, vector<1x1x8xf32>
    %31 = vector.shape_cast %30 : vector<1x1x8xf32> to vector<1x8xf32>
    %cst_16 = arith.constant 5.000000e-01 : f32
    %32 = vector.broadcast %cst_16 : f32 to vector<1x8xf32>
    %33 = arith.cmpf ogt, %31, %32 : vector<1x8xf32>
    %cst_17 = arith.constant 0.000000e+00 : f32
    %34 = vector.broadcast %cst_17 : f32 to vector<8x32xf32>
    %c0_18 = arith.constant 0 : index
    %c0_19 = arith.constant 0 : index
    %c0_20 = arith.constant 0 : index
    %35 = vector.load %arg6[%c0_18, %c0_19, %c0_20] : memref<4x32x8xbf16, #tpu.memory_space<vmem>>, vector<1x32x8xbf16>
    %36 = vector.shape_cast %35 : vector<1x32x8xbf16> to vector<32x8xbf16>
    %cst_21 = arith.constant dense<0.000000e+00> : vector<8x8xf32>
    %37 = tpu.matmul %26, %36, %cst_21 {dimension_numbers = #tpu.dot_dimension_numbers<[1], [0], [0], [1], [0, 0, 1, 1], [], []>} : vector<8x32xbf16>, vector<32x8xbf16>, vector<8x8xf32> -> vector<8x8xf32>
    %c0_22 = arith.constant 0 : index
    %c0_23 = arith.constant 0 : index
    %c0_24 = arith.constant 0 : index
    %38 = vector.load %arg7[%c0_22, %c0_23, %c0_24] : memref<4x1x8xf32, #tpu.memory_space<vmem>>, vector<1x1x8xf32>
    %39 = vector.shape_cast %38 : vector<1x1x8xf32> to vector<1x8xf32>
    %40 = vector.broadcast %39 : vector<1x8xf32> to vector<8x8xf32>
    %41 = arith.addf %37, %40 : vector<8x8xf32>
    %c0_25 = arith.constant 0 : index
    %c0_26 = arith.constant 0 : index
    %c0_27 = arith.constant 0 : index
    %42 = vector.load %arg8[%c0_25, %c0_26, %c0_27] : memref<4x32x8xbf16, #tpu.memory_space<vmem>>, vector<1x32x8xbf16>
    %43 = vector.shape_cast %42 : vector<1x32x8xbf16> to vector<32x8xbf16>
    %cst_28 = arith.constant dense<0.000000e+00> : vector<8x8xf32>
    %44 = tpu.matmul %29, %43, %cst_28 {dimension_numbers = #tpu.dot_dimension_numbers<[1], [0], [0], [1], [0, 0, 1, 1], [], []>} : vector<8x32xbf16>, vector<32x8xbf16>, vector<8x8xf32> -> vector<8x8xf32>
    %c0_29 = arith.constant 0 : index
    %c0_30 = arith.constant 0 : index
    %c0_31 = arith.constant 0 : index
    %45 = vector.load %arg9[%c0_29, %c0_30, %c0_31] : memref<4x1x8xf32, #tpu.memory_space<vmem>>, vector<1x1x8xf32>
    %46 = vector.shape_cast %45 : vector<1x1x8xf32> to vector<1x8xf32>
    %47 = vector.broadcast %46 : vector<1x8xf32> to vector<8x8xf32>
    %48 = arith.addf %44, %47 : vector<8x8xf32>
    %c0_32 = arith.constant 0 : index
    %c0_33 = arith.constant 0 : index
    %c0_34 = arith.constant 0 : index
    %49 = vector.load %arg10[%c0_32, %c0_33, %c0_34] : memref<4x32x8xbf16, #tpu.memory_space<vmem>>, vector<1x32x8xbf16>
    %50 = vector.shape_cast %49 : vector<1x32x8xbf16> to vector<32x8xbf16>
    %cst_35 = arith.constant dense<0.000000e+00> : vector<8x8xf32>
    %51 = tpu.matmul %29, %50, %cst_35 {dimension_numbers = #tpu.dot_dimension_numbers<[1], [0], [0], [1], [0, 0, 1, 1], [], []>} : vector<8x32xbf16>, vector<32x8xbf16>, vector<8x8xf32> -> vector<8x8xf32>
    %c0_36 = arith.constant 0 : index
    %c0_37 = arith.constant 0 : index
    %c0_38 = arith.constant 0 : index
    %52 = vector.load %arg11[%c0_36, %c0_37, %c0_38] : memref<4x1x8xf32, #tpu.memory_space<vmem>>, vector<1x1x8xf32>
    %53 = vector.shape_cast %52 : vector<1x1x8xf32> to vector<1x8xf32>
    %54 = vector.broadcast %53 : vector<1x8xf32> to vector<8x8xf32>
    %55 = arith.addf %51, %54 : vector<8x8xf32>
    %56 = arith.truncf %41 : vector<8x8xf32> to vector<8x8xbf16>
    %57 = arith.truncf %48 : vector<8x8xf32> to vector<8x8xbf16>
    %cst_39 = arith.constant dense<0.000000e+00> : vector<8x8xf32>
    %58 = tpu.matmul %56, %57, %cst_39 {dimension_numbers = #tpu.dot_dimension_numbers<[1], [1], [0], [0], [0, 0, 1, 0], [], []>} : vector<8x8xbf16>, vector<8x8xbf16>, vector<8x8xf32> -> vector<8x8xf32>
    %cst_40 = arith.constant 0.176776692 : f32
    %59 = vector.broadcast %cst_40 : f32 to vector<8x8xf32>
    %60 = arith.mulf %58, %59 : vector<8x8xf32>
    %cst_41 = arith.constant -1.000000e+05 : f32
    %61 = vector.shape_cast %33 : vector<1x8xi1> to vector<1x8xi1>
    %62 = vector.broadcast %61 : vector<1x8xi1> to vector<8x8xi1>
    %63 = vector.broadcast %cst_41 : f32 to vector<8x8xf32>
    %64 = arith.select %62, %63, %60 : vector<8x8xi1>, vector<8x8xf32>
    %cst_42 = arith.constant dense<0xFF800000> : vector<8xf32>
    %65 = vector.multi_reduction <maximumf>, %64, %cst_42 [1] : vector<8x8xf32> to vector<8xf32>
    %66 = vector.shape_cast %65 : vector<8xf32> to vector<8x1xf32>
    %67 = vector.broadcast %66 : vector<8x1xf32> to vector<8x8xf32>
    %68 = arith.subf %64, %67 : vector<8x8xf32>
    %69 = math.exp %68 : vector<8x8xf32>
    %cst_43 = arith.constant dense<0.000000e+00> : vector<8xf32>
    %70 = vector.multi_reduction <add>, %69, %cst_43 [1] : vector<8x8xf32> to vector<8xf32>
    %71 = vector.shape_cast %70 : vector<8xf32> to vector<8x1xf32>
    %72 = tpu.reciprocal %71 {approx = true} : vector<8x1xf32> -> vector<8x1xf32>
    %73 = vector.broadcast %72 : vector<8x1xf32> to vector<8x8xf32>
    %74 = arith.mulf %69, %73 : vector<8x8xf32>
    %75 = arith.truncf %74 : vector<8x8xf32> to vector<8x8xbf16>
    %76 = arith.truncf %55 : vector<8x8xf32> to vector<8x8xbf16>
    %cst_44 = arith.constant dense<0.000000e+00> : vector<8x8xf32>
    %77 = tpu.matmul %75, %76, %cst_44 {dimension_numbers = #tpu.dot_dimension_numbers<[1], [0], [0], [1], [0, 0, 1, 1], [], []>} : vector<8x8xbf16>, vector<8x8xbf16>, vector<8x8xf32> -> vector<8x8xf32>
    %78 = arith.truncf %77 : vector<8x8xf32> to vector<8x8xbf16>
    %c0_45 = arith.constant 0 : index
    %c0_46 = arith.constant 0 : index
    %c0_47 = arith.constant 0 : index
    %79 = vector.load %arg12[%c0_45, %c0_46, %c0_47] : memref<4x8x32xbf16, #tpu.memory_space<vmem>>, vector<1x8x32xbf16>
    %80 = vector.shape_cast %79 : vector<1x8x32xbf16> to vector<8x32xbf16>
    %cst_48 = arith.constant dense<0.000000e+00> : vector<8x32xf32>
    %81 = tpu.matmul %78, %80, %cst_48 {dimension_numbers = #tpu.dot_dimension_numbers<[1], [0], [0], [1], [0, 0, 1, 1], [], []>} : vector<8x8xbf16>, vector<8x32xbf16>, vector<8x32xf32> -> vector<8x32xf32>
    %82 = arith.addf %34, %81 : vector<8x32xf32>
    %c1 = arith.constant 1 : index
    %c0_49 = arith.constant 0 : index
    %c0_50 = arith.constant 0 : index
    %83 = vector.load %arg6[%c1, %c0_49, %c0_50] : memref<4x32x8xbf16, #tpu.memory_space<vmem>>, vector<1x32x8xbf16>
    %84 = vector.shape_cast %83 : vector<1x32x8xbf16> to vector<32x8xbf16>
    %cst_51 = arith.constant dense<0.000000e+00> : vector<8x8xf32>
    %85 = tpu.matmul %26, %84, %cst_51 {dimension_numbers = #tpu.dot_dimension_numbers<[1], [0], [0], [1], [0, 0, 1, 1], [], []>} : vector<8x32xbf16>, vector<32x8xbf16>, vector<8x8xf32> -> vector<8x8xf32>
    %c1_52 = arith.constant 1 : index
    %c0_53 = arith.constant 0 : index
    %c0_54 = arith.constant 0 : index
    %86 = vector.load %arg7[%c1_52, %c0_53, %c0_54] : memref<4x1x8xf32, #tpu.memory_space<vmem>>, vector<1x1x8xf32>
    %87 = vector.shape_cast %86 : vector<1x1x8xf32> to vector<1x8xf32>
    %88 = vector.broadcast %87 : vector<1x8xf32> to vector<8x8xf32>
    %89 = arith.addf %85, %88 : vector<8x8xf32>
    %c1_55 = arith.constant 1 : index
    %c0_56 = arith.constant 0 : index
    %c0_57 = arith.constant 0 : index
    %90 = vector.load %arg8[%c1_55, %c0_56, %c0_57] : memref<4x32x8xbf16, #tpu.memory_space<vmem>>, vector<1x32x8xbf16>
    %91 = vector.shape_cast %90 : vector<1x32x8xbf16> to vector<32x8xbf16>
    %cst_58 = arith.constant dense<0.000000e+00> : vector<8x8xf32>
    %92 = tpu.matmul %29, %91, %cst_58 {dimension_numbers = #tpu.dot_dimension_numbers<[1], [0], [0], [1], [0, 0, 1, 1], [], []>} : vector<8x32xbf16>, vector<32x8xbf16>, vector<8x8xf32> -> vector<8x8xf32>
    %c1_59 = arith.constant 1 : index
    %c0_60 = arith.constant 0 : index
    %c0_61 = arith.constant 0 : index
    %93 = vector.load %arg9[%c1_59, %c0_60, %c0_61] : memref<4x1x8xf32, #tpu.memory_space<vmem>>, vector<1x1x8xf32>
    %94 = vector.shape_cast %93 : vector<1x1x8xf32> to vector<1x8xf32>
    %95 = vector.broadcast %94 : vector<1x8xf32> to vector<8x8xf32>
    %96 = arith.addf %92, %95 : vector<8x8xf32>
    %c1_62 = arith.constant 1 : index
    %c0_63 = arith.constant 0 : index
    %c0_64 = arith.constant 0 : index
    %97 = vector.load %arg10[%c1_62, %c0_63, %c0_64] : memref<4x32x8xbf16, #tpu.memory_space<vmem>>, vector<1x32x8xbf16>
    %98 = vector.shape_cast %97 : vector<1x32x8xbf16> to vector<32x8xbf16>
    %cst_65 = arith.constant dense<0.000000e+00> : vector<8x8xf32>
    %99 = tpu.matmul %29, %98, %cst_65 {dimension_numbers = #tpu.dot_dimension_numbers<[1], [0], [0], [1], [0, 0, 1, 1], [], []>} : vector<8x32xbf16>, vector<32x8xbf16>, vector<8x8xf32> -> vector<8x8xf32>
    %c1_66 = arith.constant 1 : index
    %c0_67 = arith.constant 0 : index
    %c0_68 = arith.constant 0 : index
    %100 = vector.load %arg11[%c1_66, %c0_67, %c0_68] : memref<4x1x8xf32, #tpu.memory_space<vmem>>, vector<1x1x8xf32>
    %101 = vector.shape_cast %100 : vector<1x1x8xf32> to vector<1x8xf32>
    %102 = vector.broadcast %101 : vector<1x8xf32> to vector<8x8xf32>
    %103 = arith.addf %99, %102 : vector<8x8xf32>
    %104 = arith.truncf %89 : vector<8x8xf32> to vector<8x8xbf16>
    %105 = arith.truncf %96 : vector<8x8xf32> to vector<8x8xbf16>
    %cst_69 = arith.constant dense<0.000000e+00> : vector<8x8xf32>
    %106 = tpu.matmul %104, %105, %cst_69 {dimension_numbers = #tpu.dot_dimension_numbers<[1], [1], [0], [0], [0, 0, 1, 0], [], []>} : vector<8x8xbf16>, vector<8x8xbf16>, vector<8x8xf32> -> vector<8x8xf32>
    %cst_70 = arith.constant 0.176776692 : f32
    %107 = vector.broadcast %cst_70 : f32 to vector<8x8xf32>
    %108 = arith.mulf %106, %107 : vector<8x8xf32>
    %cst_71 = arith.constant -1.000000e+05 : f32
    %109 = vector.shape_cast %33 : vector<1x8xi1> to vector<1x8xi1>
    %110 = vector.broadcast %109 : vector<1x8xi1> to vector<8x8xi1>
    %111 = vector.broadcast %cst_71 : f32 to vector<8x8xf32>
    %112 = arith.select %110, %111, %108 : vector<8x8xi1>, vector<8x8xf32>
    %cst_72 = arith.constant dense<0xFF800000> : vector<8xf32>
    %113 = vector.multi_reduction <maximumf>, %112, %cst_72 [1] : vector<8x8xf32> to vector<8xf32>
    %114 = vector.shape_cast %113 : vector<8xf32> to vector<8x1xf32>
    %115 = vector.broadcast %114 : vector<8x1xf32> to vector<8x8xf32>
    %116 = arith.subf %112, %115 : vector<8x8xf32>
    %117 = math.exp %116 : vector<8x8xf32>
    %cst_73 = arith.constant dense<0.000000e+00> : vector<8xf32>
    %118 = vector.multi_reduction <add>, %117, %cst_73 [1] : vector<8x8xf32> to vector<8xf32>
    %119 = vector.shape_cast %118 : vector<8xf32> to vector<8x1xf32>
    %120 = tpu.reciprocal %119 {approx = true} : vector<8x1xf32> -> vector<8x1xf32>
    %121 = vector.broadcast %120 : vector<8x1xf32> to vector<8x8xf32>
    %122 = arith.mulf %117, %121 : vector<8x8xf32>
    %123 = arith.truncf %122 : vector<8x8xf32> to vector<8x8xbf16>
    %124 = arith.truncf %103 : vector<8x8xf32> to vector<8x8xbf16>
    %cst_74 = arith.constant dense<0.000000e+00> : vector<8x8xf32>
    %125 = tpu.matmul %123, %124, %cst_74 {dimension_numbers = #tpu.dot_dimension_numbers<[1], [0], [0], [1], [0, 0, 1, 1], [], []>} : vector<8x8xbf16>, vector<8x8xbf16>, vector<8x8xf32> -> vector<8x8xf32>
    %126 = arith.truncf %125 : vector<8x8xf32> to vector<8x8xbf16>
    %c1_75 = arith.constant 1 : index
    %c0_76 = arith.constant 0 : index
    %c0_77 = arith.constant 0 : index
    %127 = vector.load %arg12[%c1_75, %c0_76, %c0_77] : memref<4x8x32xbf16, #tpu.memory_space<vmem>>, vector<1x8x32xbf16>
    %128 = vector.shape_cast %127 : vector<1x8x32xbf16> to vector<8x32xbf16>
    %cst_78 = arith.constant dense<0.000000e+00> : vector<8x32xf32>
    %129 = tpu.matmul %126, %128, %cst_78 {dimension_numbers = #tpu.dot_dimension_numbers<[1], [0], [0], [1], [0, 0, 1, 1], [], []>} : vector<8x8xbf16>, vector<8x32xbf16>, vector<8x32xf32> -> vector<8x32xf32>
    %130 = arith.addf %82, %129 : vector<8x32xf32>
    %c2 = arith.constant 2 : index
    %c0_79 = arith.constant 0 : index
    %c0_80 = arith.constant 0 : index
    %131 = vector.load %arg6[%c2, %c0_79, %c0_80] : memref<4x32x8xbf16, #tpu.memory_space<vmem>>, vector<1x32x8xbf16>
    %132 = vector.shape_cast %131 : vector<1x32x8xbf16> to vector<32x8xbf16>
    %cst_81 = arith.constant dense<0.000000e+00> : vector<8x8xf32>
    %133 = tpu.matmul %26, %132, %cst_81 {dimension_numbers = #tpu.dot_dimension_numbers<[1], [0], [0], [1], [0, 0, 1, 1], [], []>} : vector<8x32xbf16>, vector<32x8xbf16>, vector<8x8xf32> -> vector<8x8xf32>
    %c2_82 = arith.constant 2 : index
    %c0_83 = arith.constant 0 : index
    %c0_84 = arith.constant 0 : index
    %134 = vector.load %arg7[%c2_82, %c0_83, %c0_84] : memref<4x1x8xf32, #tpu.memory_space<vmem>>, vector<1x1x8xf32>
    %135 = vector.shape_cast %134 : vector<1x1x8xf32> to vector<1x8xf32>
    %136 = vector.broadcast %135 : vector<1x8xf32> to vector<8x8xf32>
    %137 = arith.addf %133, %136 : vector<8x8xf32>
    %c2_85 = arith.constant 2 : index
    %c0_86 = arith.constant 0 : index
    %c0_87 = arith.constant 0 : index
    %138 = vector.load %arg8[%c2_85, %c0_86, %c0_87] : memref<4x32x8xbf16, #tpu.memory_space<vmem>>, vector<1x32x8xbf16>
    %139 = vector.shape_cast %138 : vector<1x32x8xbf16> to vector<32x8xbf16>
    %cst_88 = arith.constant dense<0.000000e+00> : vector<8x8xf32>
    %140 = tpu.matmul %29, %139, %cst_88 {dimension_numbers = #tpu.dot_dimension_numbers<[1], [0], [0], [1], [0, 0, 1, 1], [], []>} : vector<8x32xbf16>, vector<32x8xbf16>, vector<8x8xf32> -> vector<8x8xf32>
    %c2_89 = arith.constant 2 : index
    %c0_90 = arith.constant 0 : index
    %c0_91 = arith.constant 0 : index
    %141 = vector.load %arg9[%c2_89, %c0_90, %c0_91] : memref<4x1x8xf32, #tpu.memory_space<vmem>>, vector<1x1x8xf32>
    %142 = vector.shape_cast %141 : vector<1x1x8xf32> to vector<1x8xf32>
    %143 = vector.broadcast %142 : vector<1x8xf32> to vector<8x8xf32>
    %144 = arith.addf %140, %143 : vector<8x8xf32>
    %c2_92 = arith.constant 2 : index
    %c0_93 = arith.constant 0 : index
    %c0_94 = arith.constant 0 : index
    %145 = vector.load %arg10[%c2_92, %c0_93, %c0_94] : memref<4x32x8xbf16, #tpu.memory_space<vmem>>, vector<1x32x8xbf16>
    %146 = vector.shape_cast %145 : vector<1x32x8xbf16> to vector<32x8xbf16>
    %cst_95 = arith.constant dense<0.000000e+00> : vector<8x8xf32>
    %147 = tpu.matmul %29, %146, %cst_95 {dimension_numbers = #tpu.dot_dimension_numbers<[1], [0], [0], [1], [0, 0, 1, 1], [], []>} : vector<8x32xbf16>, vector<32x8xbf16>, vector<8x8xf32> -> vector<8x8xf32>
    %c2_96 = arith.constant 2 : index
    %c0_97 = arith.constant 0 : index
    %c0_98 = arith.constant 0 : index
    %148 = vector.load %arg11[%c2_96, %c0_97, %c0_98] : memref<4x1x8xf32, #tpu.memory_space<vmem>>, vector<1x1x8xf32>
    %149 = vector.shape_cast %148 : vector<1x1x8xf32> to vector<1x8xf32>
    %150 = vector.broadcast %149 : vector<1x8xf32> to vector<8x8xf32>
    %151 = arith.addf %147, %150 : vector<8x8xf32>
    %152 = arith.truncf %137 : vector<8x8xf32> to vector<8x8xbf16>
    %153 = arith.truncf %144 : vector<8x8xf32> to vector<8x8xbf16>
    %cst_99 = arith.constant dense<0.000000e+00> : vector<8x8xf32>
    %154 = tpu.matmul %152, %153, %cst_99 {dimension_numbers = #tpu.dot_dimension_numbers<[1], [1], [0], [0], [0, 0, 1, 0], [], []>} : vector<8x8xbf16>, vector<8x8xbf16>, vector<8x8xf32> -> vector<8x8xf32>
    %cst_100 = arith.constant 0.176776692 : f32
    %155 = vector.broadcast %cst_100 : f32 to vector<8x8xf32>
    %156 = arith.mulf %154, %155 : vector<8x8xf32>
    %cst_101 = arith.constant -1.000000e+05 : f32
    %157 = vector.shape_cast %33 : vector<1x8xi1> to vector<1x8xi1>
    %158 = vector.broadcast %157 : vector<1x8xi1> to vector<8x8xi1>
    %159 = vector.broadcast %cst_101 : f32 to vector<8x8xf32>
    %160 = arith.select %158, %159, %156 : vector<8x8xi1>, vector<8x8xf32>
    %cst_102 = arith.constant dense<0xFF800000> : vector<8xf32>
    %161 = vector.multi_reduction <maximumf>, %160, %cst_102 [1] : vector<8x8xf32> to vector<8xf32>
    %162 = vector.shape_cast %161 : vector<8xf32> to vector<8x1xf32>
    %163 = vector.broadcast %162 : vector<8x1xf32> to vector<8x8xf32>
    %164 = arith.subf %160, %163 : vector<8x8xf32>
    %165 = math.exp %164 : vector<8x8xf32>
    %cst_103 = arith.constant dense<0.000000e+00> : vector<8xf32>
    %166 = vector.multi_reduction <add>, %165, %cst_103 [1] : vector<8x8xf32> to vector<8xf32>
    %167 = vector.shape_cast %166 : vector<8xf32> to vector<8x1xf32>
    %168 = tpu.reciprocal %167 {approx = true} : vector<8x1xf32> -> vector<8x1xf32>
    %169 = vector.broadcast %168 : vector<8x1xf32> to vector<8x8xf32>
    %170 = arith.mulf %165, %169 : vector<8x8xf32>
    %171 = arith.truncf %170 : vector<8x8xf32> to vector<8x8xbf16>
    %172 = arith.truncf %151 : vector<8x8xf32> to vector<8x8xbf16>
    %cst_104 = arith.constant dense<0.000000e+00> : vector<8x8xf32>
    %173 = tpu.matmul %171, %172, %cst_104 {dimension_numbers = #tpu.dot_dimension_numbers<[1], [0], [0], [1], [0, 0, 1, 1], [], []>} : vector<8x8xbf16>, vector<8x8xbf16>, vector<8x8xf32> -> vector<8x8xf32>
    %174 = arith.truncf %173 : vector<8x8xf32> to vector<8x8xbf16>
    %c2_105 = arith.constant 2 : index
    %c0_106 = arith.constant 0 : index
    %c0_107 = arith.constant 0 : index
    %175 = vector.load %arg12[%c2_105, %c0_106, %c0_107] : memref<4x8x32xbf16, #tpu.memory_space<vmem>>, vector<1x8x32xbf16>
    %176 = vector.shape_cast %175 : vector<1x8x32xbf16> to vector<8x32xbf16>
    %cst_108 = arith.constant dense<0.000000e+00> : vector<8x32xf32>
    %177 = tpu.matmul %174, %176, %cst_108 {dimension_numbers = #tpu.dot_dimension_numbers<[1], [0], [0], [1], [0, 0, 1, 1], [], []>} : vector<8x8xbf16>, vector<8x32xbf16>, vector<8x32xf32> -> vector<8x32xf32>
    %178 = arith.addf %130, %177 : vector<8x32xf32>
    %c3 = arith.constant 3 : index
    %c0_109 = arith.constant 0 : index
    %c0_110 = arith.constant 0 : index
    %179 = vector.load %arg6[%c3, %c0_109, %c0_110] : memref<4x32x8xbf16, #tpu.memory_space<vmem>>, vector<1x32x8xbf16>
    %180 = vector.shape_cast %179 : vector<1x32x8xbf16> to vector<32x8xbf16>
    %cst_111 = arith.constant dense<0.000000e+00> : vector<8x8xf32>
    %181 = tpu.matmul %26, %180, %cst_111 {dimension_numbers = #tpu.dot_dimension_numbers<[1], [0], [0], [1], [0, 0, 1, 1], [], []>} : vector<8x32xbf16>, vector<32x8xbf16>, vector<8x8xf32> -> vector<8x8xf32>
    %c3_112 = arith.constant 3 : index
    %c0_113 = arith.constant 0 : index
    %c0_114 = arith.constant 0 : index
    %182 = vector.load %arg7[%c3_112, %c0_113, %c0_114] : memref<4x1x8xf32, #tpu.memory_space<vmem>>, vector<1x1x8xf32>
    %183 = vector.shape_cast %182 : vector<1x1x8xf32> to vector<1x8xf32>
    %184 = vector.broadcast %183 : vector<1x8xf32> to vector<8x8xf32>
    %185 = arith.addf %181, %184 : vector<8x8xf32>
    %c3_115 = arith.constant 3 : index
    %c0_116 = arith.constant 0 : index
    %c0_117 = arith.constant 0 : index
    %186 = vector.load %arg8[%c3_115, %c0_116, %c0_117] : memref<4x32x8xbf16, #tpu.memory_space<vmem>>, vector<1x32x8xbf16>
    %187 = vector.shape_cast %186 : vector<1x32x8xbf16> to vector<32x8xbf16>
    %cst_118 = arith.constant dense<0.000000e+00> : vector<8x8xf32>
    %188 = tpu.matmul %29, %187, %cst_118 {dimension_numbers = #tpu.dot_dimension_numbers<[1], [0], [0], [1], [0, 0, 1, 1], [], []>} : vector<8x32xbf16>, vector<32x8xbf16>, vector<8x8xf32> -> vector<8x8xf32>
    %c3_119 = arith.constant 3 : index
    %c0_120 = arith.constant 0 : index
    %c0_121 = arith.constant 0 : index
    %189 = vector.load %arg9[%c3_119, %c0_120, %c0_121] : memref<4x1x8xf32, #tpu.memory_space<vmem>>, vector<1x1x8xf32>
    %190 = vector.shape_cast %189 : vector<1x1x8xf32> to vector<1x8xf32>
    %191 = vector.broadcast %190 : vector<1x8xf32> to vector<8x8xf32>
    %192 = arith.addf %188, %191 : vector<8x8xf32>
    %c3_122 = arith.constant 3 : index
    %c0_123 = arith.constant 0 : index
    %c0_124 = arith.constant 0 : index
    %193 = vector.load %arg10[%c3_122, %c0_123, %c0_124] : memref<4x32x8xbf16, #tpu.memory_space<vmem>>, vector<1x32x8xbf16>
    %194 = vector.shape_cast %193 : vector<1x32x8xbf16> to vector<32x8xbf16>
    %cst_125 = arith.constant dense<0.000000e+00> : vector<8x8xf32>
    %195 = tpu.matmul %29, %194, %cst_125 {dimension_numbers = #tpu.dot_dimension_numbers<[1], [0], [0], [1], [0, 0, 1, 1], [], []>} : vector<8x32xbf16>, vector<32x8xbf16>, vector<8x8xf32> -> vector<8x8xf32>
    %c3_126 = arith.constant 3 : index
    %c0_127 = arith.constant 0 : index
    %c0_128 = arith.constant 0 : index
    %196 = vector.load %arg11[%c3_126, %c0_127, %c0_128] : memref<4x1x8xf32, #tpu.memory_space<vmem>>, vector<1x1x8xf32>
    %197 = vector.shape_cast %196 : vector<1x1x8xf32> to vector<1x8xf32>
    %198 = vector.broadcast %197 : vector<1x8xf32> to vector<8x8xf32>
    %199 = arith.addf %195, %198 : vector<8x8xf32>
    %200 = arith.truncf %185 : vector<8x8xf32> to vector<8x8xbf16>
    %201 = arith.truncf %192 : vector<8x8xf32> to vector<8x8xbf16>
    %cst_129 = arith.constant dense<0.000000e+00> : vector<8x8xf32>
    %202 = tpu.matmul %200, %201, %cst_129 {dimension_numbers = #tpu.dot_dimension_numbers<[1], [1], [0], [0], [0, 0, 1, 0], [], []>} : vector<8x8xbf16>, vector<8x8xbf16>, vector<8x8xf32> -> vector<8x8xf32>
    %cst_130 = arith.constant 0.176776692 : f32
    %203 = vector.broadcast %cst_130 : f32 to vector<8x8xf32>
    %204 = arith.mulf %202, %203 : vector<8x8xf32>
    %cst_131 = arith.constant -1.000000e+05 : f32
    %205 = vector.shape_cast %33 : vector<1x8xi1> to vector<1x8xi1>
    %206 = vector.broadcast %205 : vector<1x8xi1> to vector<8x8xi1>
    %207 = vector.broadcast %cst_131 : f32 to vector<8x8xf32>
    %208 = arith.select %206, %207, %204 : vector<8x8xi1>, vector<8x8xf32>
    %cst_132 = arith.constant dense<0xFF800000> : vector<8xf32>
    %209 = vector.multi_reduction <maximumf>, %208, %cst_132 [1] : vector<8x8xf32> to vector<8xf32>
    %210 = vector.shape_cast %209 : vector<8xf32> to vector<8x1xf32>
    %211 = vector.broadcast %210 : vector<8x1xf32> to vector<8x8xf32>
    %212 = arith.subf %208, %211 : vector<8x8xf32>
    %213 = math.exp %212 : vector<8x8xf32>
    %cst_133 = arith.constant dense<0.000000e+00> : vector<8xf32>
    %214 = vector.multi_reduction <add>, %213, %cst_133 [1] : vector<8x8xf32> to vector<8xf32>
    %215 = vector.shape_cast %214 : vector<8xf32> to vector<8x1xf32>
    %216 = tpu.reciprocal %215 {approx = true} : vector<8x1xf32> -> vector<8x1xf32>
    %217 = vector.broadcast %216 : vector<8x1xf32> to vector<8x8xf32>
    %218 = arith.mulf %213, %217 : vector<8x8xf32>
    %219 = arith.truncf %218 : vector<8x8xf32> to vector<8x8xbf16>
    %220 = arith.truncf %199 : vector<8x8xf32> to vector<8x8xbf16>
    %cst_134 = arith.constant dense<0.000000e+00> : vector<8x8xf32>
    %221 = tpu.matmul %219, %220, %cst_134 {dimension_numbers = #tpu.dot_dimension_numbers<[1], [0], [0], [1], [0, 0, 1, 1], [], []>} : vector<8x8xbf16>, vector<8x8xbf16>, vector<8x8xf32> -> vector<8x8xf32>
    %222 = arith.truncf %221 : vector<8x8xf32> to vector<8x8xbf16>
    %c3_135 = arith.constant 3 : index
    %c0_136 = arith.constant 0 : index
    %c0_137 = arith.constant 0 : index
    %223 = vector.load %arg12[%c3_135, %c0_136, %c0_137] : memref<4x8x32xbf16, #tpu.memory_space<vmem>>, vector<1x8x32xbf16>
    %224 = vector.shape_cast %223 : vector<1x8x32xbf16> to vector<8x32xbf16>
    %cst_138 = arith.constant dense<0.000000e+00> : vector<8x32xf32>
    %225 = tpu.matmul %222, %224, %cst_138 {dimension_numbers = #tpu.dot_dimension_numbers<[1], [0], [0], [1], [0, 0, 1, 1], [], []>} : vector<8x8xbf16>, vector<8x32xbf16>, vector<8x32xf32> -> vector<8x32xf32>
    %226 = arith.addf %178, %225 : vector<8x32xf32>
    %227 = arith.addf %1, %226 : vector<8x32xf32>
    %c0_139 = arith.constant 0 : index
    %c0_140 = arith.constant 0 : index
    %228 = vector.load %arg13[%c0_139, %c0_140] : memref<1x32xf32, #tpu.memory_space<vmem>>, vector<1x32xf32>
    %229 = vector.broadcast %228 : vector<1x32xf32> to vector<8x32xf32>
    %230 = arith.addf %227, %229 : vector<8x32xf32>
    %c0_141 = arith.constant 0 : index
    %c0_142 = arith.constant 0 : index
    %c0_143 = arith.constant 0 : index
    %231 = vector.load %arg14[%c0_141, %c0_142, %c0_143] : memref<1x8x32xf32, #tpu.memory_space<vmem>>, vector<1x8x32xf32>
    %232 = vector.shape_cast %231 : vector<1x8x32xf32> to vector<8x32xf32>
    %233 = vector.shape_cast %230 : vector<8x32xf32> to vector<1x8x32xf32>
    tpu.vector_store %arg14[%c0_141, %c0_142, %c0_143], %233 {strides = array<i32>} : memref<1x8x32xf32, #tpu.memory_space<vmem>>, vector<1x8x32xf32>,
    return
  }
  func.func @transform_0(%arg0: i32) -> (i32, i32, i32) {
    %c0_i32 = arith.constant 0 : i32
    %c0_i32_0 = arith.constant 0 : i32
    %c0_i32_1 = arith.constant 0 : i32
    return %arg0, %c0_i32, %c0_i32_0 : i32, i32, i32
  }
  func.func @transform_1(%arg0: i32) -> (i32, i32, i32) {
    %c0_i32 = arith.constant 0 : i32
    %c0_i32_0 = arith.constant 0 : i32
    %c0_i32_1 = arith.constant 0 : i32
    return %arg0, %c0_i32, %c0_i32_0 : i32, i32, i32
  }
  func.func @transform_2(%arg0: i32) -> (i32, i32, i32) {
    %c0_i32 = arith.constant 0 : i32
    %c0_i32_0 = arith.constant 0 : i32
    %c0_i32_1 = arith.constant 0 : i32
    return %arg0, %c0_i32, %c0_i32_0 : i32, i32, i32
  }
  func.func @transform_3(%arg0: i32) -> (i32, i32) {
    %c0_i32 = arith.constant 0 : i32
    %c0_i32_0 = arith.constant 0 : i32
    %c0_i32_1 = arith.constant 0 : i32
    return %c0_i32, %c0_i32_0 : i32, i32
  }
  func.func @transform_4(%arg0: i32) -> (i32, i32) {
    %c0_i32 = arith.constant 0 : i32
    %c0_i32_0 = arith.constant 0 : i32
    %c0_i32_1 = arith.constant 0 : i32
    return %c0_i32, %c0_i32_0 : i32, i32
  }
  func.func @transform_5(%arg0: i32) -> (i32, i32, i32) {
    %c0_i32 = arith.constant 0 : i32
    %c0_i32_0 = arith.constant 0 : i32
    %c0_i32_1 = arith.constant 0 : i32
    %c0_i32_2 = arith.constant 0 : i32
    return %c0_i32, %c0_i32_0, %c0_i32_1 : i32, i32, i32
  }
  func.func @transform_6(%arg0: i32) -> (i32, i32, i32) {
    %c0_i32 = arith.constant 0 : i32
    %c0_i32_0 = arith.constant 0 : i32
    %c0_i32_1 = arith.constant 0 : i32
    %c0_i32_2 = arith.constant 0 : i32
    return %c0_i32, %c0_i32_0, %c0_i32_1 : i32, i32, i32
  }
  func.func @transform_7(%arg0: i32) -> (i32, i32, i32) {
    %c0_i32 = arith.constant 0 : i32
    %c0_i32_0 = arith.constant 0 : i32
    %c0_i32_1 = arith.constant 0 : i32
    %c0_i32_2 = arith.constant 0 : i32
    return %c0_i32, %c0_i32_0, %c0_i32_1 : i32, i32, i32
  }
  func.func @transform_8(%arg0: i32) -> (i32, i32, i32) {
    %c0_i32 = arith.constant 0 : i32
    %c0_i32_0 = arith.constant 0 : i32
    %c0_i32_1 = arith.constant 0 : i32
    %c0_i32_2 = arith.constant 0 : i32
    return %c0_i32, %c0_i32_0, %c0_i32_1 : i32, i32, i32
  }
  func.func @transform_9(%arg0: i32) -> (i32, i32, i32) {
    %c0_i32 = arith.constant 0 : i32
    %c0_i32_0 = arith.constant 0 : i32
    %c0_i32_1 = arith.constant 0 : i32
    %c0_i32_2 = arith.constant 0 : i32
    return %c0_i32, %c0_i32_0, %c0_i32_1 : i32, i32, i32
  }
  func.func @transform_10(%arg0: i32) -> (i32, i32, i32) {
    %c0_i32 = arith.constant 0 : i32
    %c0_i32_0 = arith.constant 0 : i32
    %c0_i32_1 = arith.constant 0 : i32
    %c0_i32_2 = arith.constant 0 : i32
    return %c0_i32, %c0_i32_0, %c0_i32_1 : i32, i32, i32
  }
  func.func @transform_11(%arg0: i32) -> (i32, i32, i32) {
    %c0_i32 = arith.constant 0 : i32
    %c0_i32_0 = arith.constant 0 : i32
    %c0_i32_1 = arith.constant 0 : i32
    %c0_i32_2 = arith.constant 0 : i32
    return %c0_i32, %c0_i32_0, %c0_i32_1 : i32, i32, i32
  }
  func.func @transform_12(%arg0: i32) -> (i32, i32) {
    %c0_i32 = arith.constant 0 : i32
    %c0_i32_0 = arith.constant 0 : i32
    %c0_i32_1 = arith.constant 0 : i32
    return %c0_i32, %c0_i32_0 : i32, i32
  }
  func.func @transform_13(%arg0: i32) -> (i32, i32, i32) {
    %c0_i32 = arith.constant 0 : i32
    %c0_i32_0 = arith.constant 0 : i32
    %c0_i32_1 = arith.constant 0 : i32
    return %arg0, %c0_i32, %c0_i32_0 : i32, i32, i32
  }
}

</mosaic_0001>

<bundles_post_ra>
// kernel: transformer_forward.12
= control target key start
LH: loop header
LB: loop body
LE: loop exit
PB: predicated region body
PF: predicated region fallthrough
CT: control target
= control target key end

     0   :  { %vm31_vm0 = vcmask 261120   ;;  %v292_v15 = vmov 0.0   ;;  %vm293_vm1 = vmmov 0   ;;  %vm178_vm2 = vcmask 523264   ;;  %s393_s0 = inlined_call_operand.vmem [shape: f32[16,32], index: 0, kind: input, shape index: {}]   ;;  %s394_s3 = inlined_call_operand.vmem [shape: bf16[32,64], index: 3, kind: input, shape index: {}]   ;;  %s395_s5 = inlined_call_operand.vmem [shape: bf16[64,32], index: 5, kind: input, shape index: {}]   ;;  %s396_s1 = inlined_call_operand.vmem [shape: f32[1,32], index: 1, kind: input, shape index: {}]   ;;  %s397_s2 = inlined_call_operand.vmem [shape: f32[1,32], index: 2, kind: input, shape index: {}]   ;;  %s398_s4 = inlined_call_operand.vmem [shape: f32[1,64], index: 4, kind: input, shape index: {}]   ;;  %s399_s6 = inlined_call_operand.vmem [shape: f32[1,32], index: 6, kind: input, shape index: {}]   ;;  %s400_s7 = inlined_call_operand.vmem [shape: f32[16,32], index: 7, kind: output, shape index: {}]  }
   0x1   :  { %v337_v0 = vld [vmem:[%s393_s0] sm:$0xff]  ;;  %v342_v1 = vld [vmem:[%s393_s0 + $0x8] sm:$0xff]  ;;  %260 = vmatprep.subr.bf16.mxu0 %v292_v15  ;;  %268 = vmatprep.subr.bf16.mxu1 %v292_v15  ;;  %v286_v36 = vld [vmem:[%s395_s5 + $0x10] sm:$0xff]  }
   0x2   :  { %v32_v2 = vsel %vm31_vm0, %v337_v0, 0.0  ;;  %v35_v3 = vsel %vm31_vm0, %v342_v1, 0.0  ;;  %v282_v14 = vld [vmem:[%s394_s3] sm:$0xff]   ;;  %v283_v16 = vld [vmem:[%s394_s3 + $0x8] sm:$0xff]   ;;  %264 = vmatprep.mubr.msk.bf16.mxu0 %vm293_vm1, %v292_v15  ;;  %276 = vmatprep.mubr.msk.bf16.mxu1 %vm293_vm1, %v292_v15  ;;  %v287_v37 = vld [vmem:[%s395_s5 + $0x18] sm:$0xff]  }
   0x3   :  { %33 = vadd.xlane.f32.xlu0 %v32_v2  ;;  %261 = vmatpush3.bf16.msra.mxu0 %v282_v14  ;;  %v284_v17 = vld [vmem:[%s395_s5] sm:$0xff]   ;;  %v285_v18 = vld [vmem:[%s395_s5 + $0x8] sm:$0xff]  }
   0x4   :  { %262 = vmatprep.subr.bf16.mxu0 %v292_v15  ;;  %269 = vmatpush3.bf16.msra.mxu1 %v284_v17  ;;  %v240_v27 = vld [vmem:[%s396_s1] ss:$0 sm:$0xff] }
   0x5   :  { %270 = vmatprep.subr.bf16.mxu1 %v292_v15  ;;  %v241_v31 = vld [vmem:[%s397_s2] ss:$0 sm:$0xff] }
   0x6   :  { %v242_v38 = vld [vmem:[%s398_s4] ss:$0 sm:$0xff] }
   0x7   :  { %36 = vadd.xlane.f32.xlu0 %v35_v3  ;;  %263 = vmatpush3.bf16.msra.mxu0 %v283_v16  ;;  %v251_v49 = vld [vmem:[%s399_s6] ss:$0 sm:$0xff] }
   0x8   :  { %271 = vmatpush3.bf16.msra.mxu1 %v285_v18 }
   0x9   :  { %272 = vmatprep.subr.bf16.mxu1 %v292_v15 }
   0xc   :  { %273 = vmatpush3.bf16.msra.mxu1 %v286_v36 }
   0xd   :  { %274 = vmatprep.subr.bf16.mxu1 %v292_v15 }
  0x10   :  { %275 = vmatpush3.bf16.msra.mxu1 %v287_v37 }
  0x90   :  { %v34_v4 = vpop.xlane.xlu0 %33 }
  0x91   :  { %v39_v5 = vmul.f32 0.03125, %v34_v4 }
  0x93   :  { %v41_v6 = vsub.f32 %v337_v0, %v39_v5 }
  0x94   :  { %v37_v7 = vpop.xlane.xlu0 %36 }
  0x95   :  { %v40_v8 = vmul.f32 0.03125, %v37_v7  ;;  %v43_v9 = vmul.f32 %v41_v6, %v41_v6 }
  0x97   :  { %v42_v10 = vsub.f32 %v342_v1, %v40_v8  ;;  %v45_v11 = vsel %vm31_vm0, %v43_v9, 0.0 }
  0x98   :  { %46 = vadd.xlane.f32.xlu1 %v45_v11 }
  0x99   :  { %v44_v12 = vmul.f32 %v42_v10, %v42_v10 }
  0x9b   :  { %v48_v13 = vsel %vm31_vm0, %v44_v12, 0.0 }
  0x9c   :  { %49 = vadd.xlane.f32.xlu1 %v48_v13 }
 0x125   :  { %v47_v19 = vpop.xlane.xlu1 %46 }
 0x126   :  { %v51_v20 = vmul.f32 0.03125, %v47_v19 }
 0x128   :  { %v53_v21 = vadd.f32 1e-05, %v51_v20 }
 0x129   :  { %v50_v22 = vpop.xlane.xlu1 %49 }
 0x12a   :  { %288 = vrsqrt.f32 %v53_v21  ;;  %v52_v23 = vmul.f32 0.03125, %v50_v22 }
 0x12c   :  { %v54_v24 = vadd.f32 1e-05, %v52_v23 }
 0x12e   :  { %290 = vrsqrt.f32 %v54_v24 }
 0x134   :  { %v289_v25 = vpop.eup %288 }
 0x135   :  { %v57_v26 = vmul.f32 %v289_v25, %v41_v6 }
 0x137   :  { %v65_v30 = vmul.f32 %v240_v27, %v57_v26 }
 0x138   :  { %v291_v28 = vpop.eup %290 }
 0x139   :  { %v58_v29 = vmul.f32 %v291_v28, %v42_v10  ;;  %v73_v33 = vadd.f32 %v241_v31, %v65_v30 }
 0x13b   :  { %v66_v32 = vmul.f32 %v240_v27, %v58_v29 }
 0x13d   :  { %v74_v34 = vadd.f32 %v241_v31, %v66_v32 }
 0x13f   :  { %v75_v35 = vpack.c.bf16 %v74_v34, %v73_v33 }
 0x141   :  { %265 = vmatmul.mubr.msk.bf16.vlgmr.msra.gmra.mrb[0].mxu0 %vm31_vm0, %v75_v35 }
 0x214   :  { %v136_v39 = vpop.f32.mrb[0].mxu0 }
 0x215   :  { %v137_v40 = vadd.f32 %v242_v38, %v136_v39  ;;  %v266_v41 = vpop.f32.mrb[1].mxu0 }
 0x216   :  { %v139_v42 = vpop.f32.mrb[2].mxu0 }
 0x217   :  { %v140_v43 = vadd.f32 %v242_v38, %v139_v42  ;;  %v267_v44 = vpop.f32.mrb[3].mxu0  ;;  %v143_v45 = vmax.f32 %v137_v40, 0.0 }
 0x219   :  { %v144_v46 = vmax.f32 %v140_v43, 0.0 }
 0x21b   :  { %v145_v47 = vpack.c.bf16 %v144_v46, %v143_v45 }
 0x21d   :  { %277 = vmatmul.mubr.msk.bf16.vlgmr.msra.gmra.mrb[0].mxu1 %vm178_vm2, %v145_v47 }
 0x2f0   :  { %v216_v48 = vpop.f32.mrb[0].mxu1 }
 0x2f1   :  { %v223_v50 = vadd.f32 %v216_v48, %v337_v0  ;;  %v278_v51 = vpop.f32.mrb[1].mxu1 }
 0x2f2   :  { %v219_v52 = vpop.f32.mrb[2].mxu1 }
 0x2f3   :  { %v232_v53 = vadd.f32 %v251_v49, %v223_v50  ;;  %v224_v54 = vadd.f32 %v219_v52, %v342_v1  ;;  %v279_v55 = vpop.f32.mrb[3].mxu1 }
 0x2f5   :  { %234 = vst.msk [vmem:[%s400_s7] sm:$0xff] %vm31_vm0, %v232_v53  ;;  %v233_v56 = vadd.f32 %v251_v49, %v224_v54 }
 0x2f7   :  { %235 = vst.msk [vmem:[%s400_s7 + $0x8] sm:$0xff] %vm31_vm0, %v233_v56 }

// kernel: transformer_forward.14
= control target key start
LH: loop header
LB: loop body
LE: loop exit
PB: predicated region body
PF: predicated region fallthrough
CT: control target
= control target key end

     0   :  { %vm37_vm0 = vcmask 261120   ;;  %v348_v15 = vmov 0.0   ;;  %vm349_vm1 = vmmov 0   ;;  %vm184_vm2 = vcmask 523264   ;;  %s469_s0 = inlined_call_operand.vmem [shape: f32[16,32], index: 0, kind: input, shape index: {}]   ;;  %s470_s3 = inlined_call_operand.vmem [shape: bf16[32,64], index: 3, kind: input, shape index: {}]   ;;  %s471_s5 = inlined_call_operand.vmem [shape: bf16[64,32], index: 5, kind: input, shape index: {}]   ;;  %s472_s1 = inlined_call_operand.vmem [shape: f32[1,32], index: 1, kind: input, shape index: {}]   ;;  %s473_s2 = inlined_call_operand.vmem [shape: f32[1,32], index: 2, kind: input, shape index: {}]   ;;  %s474_s4 = inlined_call_operand.vmem [shape: f32[1,64], index: 4, kind: input, shape index: {}]   ;;  %s475_s6 = inlined_call_operand.vmem [shape: f32[1,32], index: 6, kind: input, shape index: {}]   ;;  %s476_s7 = inlined_call_operand.vmem [shape: f32[1,32], index: 7, kind: input, shape index: {}]   ;;  %s477_s8 = inlined_call_operand.vmem [shape: f32[1,32], index: 8, kind: input, shape index: {}]   ;;  %s478_s9 = inlined_call_operand.vmem [shape: f32[16,32], index: 9, kind: output, shape index: {}]  }
   0x1   :  { %v403_v0 = vld [vmem:[%s469_s0] sm:$0xff]  ;;  %v408_v1 = vld [vmem:[%s469_s0 + $0x8] sm:$0xff]  ;;  %312 = vmatprep.subr.bf16.mxu0 %v348_v15  ;;  %320 = vmatprep.subr.bf16.mxu1 %v348_v15  ;;  %v338_v36 = vld [vmem:[%s471_s5 + $0x10] sm:$0xff]  }
   0x2   :  { %v38_v2 = vsel %vm37_vm0, %v403_v0, 0.0  ;;  %v41_v3 = vsel %vm37_vm0, %v408_v1, 0.0  ;;  %v334_v14 = vld [vmem:[%s470_s3] sm:$0xff]   ;;  %v335_v16 = vld [vmem:[%s470_s3 + $0x8] sm:$0xff]   ;;  %316 = vmatprep.mubr.msk.bf16.mxu0 %vm349_vm1, %v348_v15  ;;  %328 = vmatprep.mubr.msk.bf16.mxu1 %vm349_vm1, %v348_v15  ;;  %v339_v37 = vld [vmem:[%s471_s5 + $0x18] sm:$0xff]  }
   0x3   :  { %39 = vadd.xlane.f32.xlu0 %v38_v2  ;;  %313 = vmatpush3.bf16.msra.mxu0 %v334_v14  ;;  %v336_v17 = vld [vmem:[%s471_s5] sm:$0xff]   ;;  %v337_v18 = vld [vmem:[%s471_s5 + $0x8] sm:$0xff]  }
   0x4   :  { %314 = vmatprep.subr.bf16.mxu0 %v348_v15  ;;  %321 = vmatpush3.bf16.msra.mxu1 %v336_v17  ;;  %v290_v27 = vld [vmem:[%s472_s1] ss:$0 sm:$0xff] }
   0x5   :  { %322 = vmatprep.subr.bf16.mxu1 %v348_v15  ;;  %v291_v31 = vld [vmem:[%s473_s2] ss:$0 sm:$0xff] }
   0x6   :  { %v292_v38 = vld [vmem:[%s474_s4] ss:$0 sm:$0xff] }
   0x7   :  { %42 = vadd.xlane.f32.xlu0 %v41_v3  ;;  %315 = vmatpush3.bf16.msra.mxu0 %v335_v16  ;;  %v301_v49 = vld [vmem:[%s475_s6] ss:$0 sm:$0xff] }
   0x8   :  { %323 = vmatpush3.bf16.msra.mxu1 %v337_v18 }
   0x9   :  { %324 = vmatprep.subr.bf16.mxu1 %v348_v15 }
   0xc   :  { %325 = vmatpush3.bf16.msra.mxu1 %v338_v36 }
   0xd   :  { %326 = vmatprep.subr.bf16.mxu1 %v348_v15  ;;  %v303_v15 = vld [vmem:[%s477_s8] ss:$0 sm:$0xff] }
  0x10   :  { %327 = vmatpush3.bf16.msra.mxu1 %v339_v37 }
  0x90   :  { %v40_v4 = vpop.xlane.xlu0 %39 }
  0x91   :  { %v45_v5 = vmul.f32 0.03125, %v40_v4 }
  0x93   :  { %v47_v6 = vsub.f32 %v403_v0, %v45_v5 }
  0x94   :  { %v43_v7 = vpop.xlane.xlu0 %42 }
  0x95   :  { %v46_v8 = vmul.f32 0.03125, %v43_v7  ;;  %v49_v9 = vmul.f32 %v47_v6, %v47_v6 }
  0x97   :  { %v48_v10 = vsub.f32 %v408_v1, %v46_v8  ;;  %v51_v11 = vsel %vm37_vm0, %v49_v9, 0.0 }
  0x98   :  { %52 = vadd.xlane.f32.xlu1 %v51_v11 }
  0x99   :  { %v50_v12 = vmul.f32 %v48_v10, %v48_v10 }
  0x9b   :  { %v54_v13 = vsel %vm37_vm0, %v50_v12, 0.0  ;;  %v302_v12 = vld [vmem:[%s476_s7] ss:$0 sm:$0xff] }
  0x9c   :  { %55 = vadd.xlane.f32.xlu1 %v54_v13 }
 0x125   :  { %v53_v19 = vpop.xlane.xlu1 %52 }
 0x126   :  { %v57_v20 = vmul.f32 0.03125, %v53_v19 }
 0x128   :  { %v59_v21 = vadd.f32 1e-05, %v57_v20 }
 0x129   :  { %v56_v22 = vpop.xlane.xlu1 %55 }
 0x12a   :  { %340 = vrsqrt.f32 %v59_v21  ;;  %v58_v23 = vmul.f32 0.03125, %v56_v22 }
 0x12c   :  { %v60_v24 = vadd.f32 1e-05, %v58_v23 }
 0x12e   :  { %342 = vrsqrt.f32 %v60_v24 }
 0x134   :  { %v341_v25 = vpop.eup %340 }
 0x135   :  { %v63_v26 = vmul.f32 %v341_v25, %v47_v6 }
 0x137   :  { %v71_v30 = vmul.f32 %v290_v27, %v63_v26 }
 0x138   :  { %v343_v28 = vpop.eup %342 }
 0x139   :  { %v64_v29 = vmul.f32 %v343_v28, %v48_v10  ;;  %v79_v33 = vadd.f32 %v291_v31, %v71_v30 }
 0x13b   :  { %v72_v32 = vmul.f32 %v290_v27, %v64_v29 }
 0x13d   :  { %v80_v34 = vadd.f32 %v291_v31, %v72_v32 }
 0x13f   :  { %v81_v35 = vpack.c.bf16 %v80_v34, %v79_v33 }
 0x141   :  { %317 = vmatmul.mubr.msk.bf16.vlgmr.msra.gmra.mrb[0].mxu0 %vm37_vm0, %v81_v35 }
 0x214   :  { %v142_v39 = vpop.f32.mrb[0].mxu0 }
 0x215   :  { %v143_v40 = vadd.f32 %v292_v38, %v142_v39  ;;  %v318_v41 = vpop.f32.mrb[1].mxu0 }
 0x216   :  { %v145_v42 = vpop.f32.mrb[2].mxu0 }
 0x217   :  { %v146_v43 = vadd.f32 %v292_v38, %v145_v42  ;;  %v319_v44 = vpop.f32.mrb[3].mxu0  ;;  %v149_v45 = vmax.f32 %v143_v40, 0.0 }
 0x219   :  { %v150_v46 = vmax.f32 %v146_v43, 0.0 }
 0x21b   :  { %v151_v47 = vpack.c.bf16 %v150_v46, %v149_v45 }
 0x21d   :  { %329 = vmatmul.mubr.msk.bf16.vlgmr.msra.gmra.mrb[0].mxu1 %vm184_vm2, %v151_v47 }
 0x2f0   :  { %v222_v48 = vpop.f32.mrb[0].mxu1 }
 0x2f1   :  { %v229_v50 = vadd.f32 %v222_v48, %v403_v0  ;;  %v330_v51 = vpop.f32.mrb[1].mxu1 }
 0x2f2   :  { %v225_v52 = vpop.f32.mrb[2].mxu1 }
 0x2f3   :  { %v230_v53 = vadd.f32 %v225_v52, %v408_v1  ;;  %v331_v54 = vpop.f32.mrb[3].mxu1  ;;  %v238_v55 = vadd.f32 %v301_v49, %v229_v50 }
 0x2f5   :  { %v242_v56 = vsel %vm37_vm0, %v238_v55, 0.0  ;;  %v239_v57 = vadd.f32 %v301_v49, %v230_v53 }
 0x2f6   :  { %243 = vadd.xlane.f32.xlu0 %v242_v56 }
 0x2f7   :  { %v245_v58 = vsel %vm37_vm0, %v239_v57, 0.0 }
 0x2f8   :  { %246 = vadd.xlane.f32.xlu1 %v245_v58 }
 0x383   :  { %v244_v59 = vpop.xlane.xlu0 %243 }
 0x384   :  { %v248_v60 = vmul.f32 0.03125, %v244_v59 }
 0x385   :  { %v247_v61 = vpop.xlane.xlu1 %246 }
 0x386   :  { %v250_v62 = vsub.f32 %v238_v55, %v248_v60  ;;  %v249_v63 = vmul.f32 0.03125, %v247_v61 }
 0x388   :  { %v251_v2 = vsub.f32 %v239_v57, %v249_v63  ;;  %v252_v0 = vmul.f32 %v250_v62, %v250_v62 }
 0x38a   :  { %v254_v3 = vsel %vm37_vm0, %v252_v0, 0.0  ;;  %v253_v4 = vmul.f32 %v251_v2, %v251_v2 }
 0x38b   :  { %255 = vadd.xlane.f32.xlu0 %v254_v3 }
 0x38c   :  { %v257_v1 = vsel %vm37_vm0, %v253_v4, 0.0 }
 0x38d   :  { %258 = vadd.xlane.f32.xlu1 %v257_v1 }
 0x418   :  { %v256_v5 = vpop.xlane.xlu0 %255 }
 0x419   :  { %v260_v6 = vmul.f32 0.03125, %v256_v5 }
 0x41a   :  { %v259_v7 = vpop.xlane.xlu1 %258 }
 0x41b   :  { %v262_v8 = vadd.f32 1e-05, %v260_v6  ;;  %v261_v9 = vmul.f32 0.03125, %v259_v7 }
 0x41d   :  { %344 = vrsqrt.f32 %v262_v8  ;;  %v263_v10 = vadd.f32 1e-05, %v261_v9 }
 0x41f   :  { %346 = vrsqrt.f32 %v263_v10 }
 0x427   :  { %v345_v11 = vpop.eup %344 }
 0x428   :  { %v266_v13 = vmul.f32 %v345_v11, %v250_v62 }
 0x429   :  { %v347_v14 = vpop.eup %346 }
 0x42a   :  { %v274_v16 = vmul.f32 %v302_v12, %v266_v13  ;;  %v267_v17 = vmul.f32 %v347_v14, %v251_v2 }
 0x42c   :  { %v282_v18 = vadd.f32 %v303_v15, %v274_v16  ;;  %v275_v19 = vmul.f32 %v302_v12, %v267_v17 }
 0x42e   :  { %284 = vst.msk [vmem:[%s478_s9] sm:$0xff] %vm37_vm0, %v282_v18  ;;  %v283_v20 = vadd.f32 %v303_v15, %v275_v19 }
 0x430   :  { %285 = vst.msk [vmem:[%s478_s9 + $0x8] sm:$0xff] %vm37_vm0, %v283_v20 }

// kernel: transformer_forward.15
= control target key start
LH: loop header
LB: loop body
LE: loop exit
PB: predicated region body
PF: predicated region fallthrough
CT: control target
= control target key end

     0   :  { %s2366_s17 = smov 0   ;;  %s2690_s0 = inlined_call_operand.vmem [shape: f32[2,8,32], index: 0, kind: input, shape index: {}]   ;;  %s2691_s1 = inlined_call_operand.vmem [shape: f32[1,32], index: 1, kind: input, shape index: {}]   ;;  %s2692_s2 = inlined_call_operand.vmem [shape: f32[1,32], index: 2, kind: input, shape index: {}]   ;;  %s2693_s3 = inlined_call_operand.vmem [shape: bf16[4,32,8], index: 3, kind: input, shape index: {}]   ;;  %s2694_s4 = inlined_call_operand.vmem [shape: f32[4,1,8], index: 4, kind: input, shape index: {}]   ;;  %s2695_s5 = inlined_call_operand.vmem [shape: bf16[4,32,8], index: 5, kind: input, shape index: {}]   ;;  %s2696_s6 = inlined_call_operand.vmem [shape: f32[4,1,8], index: 6, kind: input, shape index: {}]   ;;  %s2697_s7 = inlined_call_operand.vmem [shape: bf16[4,32,8], index: 7, kind: input, shape index: {}]   ;;  %s2698_s8 = inlined_call_operand.vmem [shape: f32[4,1,8], index: 8, kind: input, shape index: {}]   ;;  %s2699_s9 = inlined_call_operand.vmem [shape: bf16[4,8,32], index: 9, kind: input, shape index: {}]   ;;  %s2700_s10 = inlined_call_operand.vmem [shape: f32[1,32], index: 10, kind: input, shape index: {}]   ;;  %s2701_s11 = inlined_call_operand.vmem [shape: f32[2,8,32], index: 11, kind: output, shape index: {}]  }
   0x1 LB: > { %s1896_s18 = sadd.s32 4294967295, %s2302_s17   ;;  %p1900_p0 = scmp.ge.s32.totalorder %s2302_s17, 1  ;;  %s2302_s17 = sphi %s2366_s17, %s21_s17  }
   0x2   : > { %p336_p1 = scmp.lt.s32.totalorder %s2302_s17, 3 }
   0x4   : > { %p337_p2 = pnand %p1900_p0, %p336_p1 }
   0x5   : > { %p374_p3 = scmp.lt.s32.totalorder (!%p337_p2), %s1896_s18, 1  ;;  %vm386_vm0 = vcmask (!%p337_p2), 261120   ;;  %v2254_v7 = vld [vmem:[%s2693_s3] sm:$0xff] (!%p337_p2)   ;;  %v2304_v9 = vmov (!%p337_p2), 0.0   ;;  %v2256_v10 = vld [vmem:[%s2693_s3 + $0x8] sm:$0xff] (!%p337_p2)   ;;  %vm2305_vm1 = vmmov (!%p337_p2), 0   ;;  %v416_v51 = vlaneseq (!%p337_p2) }
   0x6   : > { %340 = sbr.rel (%p337_p2) target bundleno = 4229 (0x1085), region = 64  ;;  %v2255_v8 = vld [vmem:[%s2695_s5] sm:$0xff] (!%p337_p2)   ;;  %2076 = vmatprep.subr.bf16.mxu0 (!%p337_p2), %v2304_v9  ;;  %2084 = vmatprep.subr.bf16.mxu1 (!%p337_p2), %v2304_v9  ;;  %v2257_v11 = vld [vmem:[%s2695_s5 + $0x8] sm:$0xff] (!%p337_p2)   ;;  %vm615_vm2 = vcmask (!%p337_p2), 64512   ;;  %vm680_vm3 = vcmask (!%p337_p2), 1043456   ;;  %v2260_v43 = vld [vmem:[%s2693_s3 + $0x10] sm:$0xff] (!%p337_p2)  }
   0x7   : > { %2077 = vmatpush3.bf16.msra.mxu0 (!%p337_p2), %v2254_v7  ;;  %2085 = vmatpush3.bf16.msra.mxu1 (!%p337_p2), %v2255_v8  ;;  %v1903_v16 = vld [vmem:[%s2691_s1] ss:$0 sm:$0xff] (!%p337_p2)  ;;  %v2259_v23 = vld [vmem:[%s2697_s7 + $0x8] sm:$0xff] (!%p337_p2)   ;;  %v2261_v48 = vld [vmem:[%s2693_s3 + $0x18] sm:$0xff] (!%p337_p2)   ;;  %v2478_v52 = vshrl.u32 (!%p337_p2), %v416_v51, 7  ;;  %v2480_v53 = vand.u32 (!%p337_p2), 127, %v416_v51 }
   0x8   : > { %2078 = vmatprep.subr.bf16.mxu0 (!%p337_p2), %v2304_v9  ;;  %2086 = vmatprep.subr.bf16.mxu1 (!%p337_p2), %v2304_v9  ;;  %v1904_v18 = vld [vmem:[%s2692_s2] ss:$0 sm:$0xff] (!%p337_p2)  ;;  %v2262_v49 = vld [vmem:[%s2697_s7 + $0x10] sm:$0xff] (!%p337_p2)   ;;  %v2263_v50 = vld [vmem:[%s2697_s7 + $0x18] sm:$0xff] (!%p337_p2)  }
   0x9   : > { %2080 = vmatprep.mubr.msk.bf16.mxu0 (!%p337_p2), %vm2305_vm1, %v2304_v9  ;;  %2088 = vmatprep.mubr.msk.bf16.mxu1 (!%p337_p2), %vm2305_vm1, %v2304_v9  ;;  %v2258_v21 = vld [vmem:[%s2697_s7] sm:$0xff] (!%p337_p2)   ;;  %vm420_vm4 = vcmp.gt.s32.totalorder (!%p337_p2), %v2480_v53, %v2478_v52 }
   0xa   : > { %v1909_v24 = vld [vmem:[%s2696_s6] ss:$0 sm:$0xff] (!%p337_p2) }
   0xb   : > { %2079 = vmatpush3.bf16.msra.mxu0 (!%p337_p2), %v2256_v10  ;;  %2087 = vmatpush3.bf16.msra.mxu1 (!%p337_p2), %v2257_v11  ;;  %v1905_v35 = vld [vmem:[%s2694_s4] ss:$0 sm:$0xff] (!%p337_p2) }
   0xc   : > { %2092 = vmatprep.subr.bf16.mxu0 (!%p337_p2), %v2304_v9  ;;  %2100 = vmatprep.subr.bf16.mxu1 (!%p337_p2), %v2304_v9  ;;  %v1913_v37 = vld [vmem:[%s2698_s8] ss:$0 sm:$0xff] (!%p337_p2) }
   0xd   : > { %s2703_s18 = smov (!%p374_p3, %s1896_s18), 1 }
   0xe   : > { %s1901_s19 = sshll.u32 %s2703_s18, 3 }
   0xf   : > { %s377_s22 = scalar_lea.vmem %s2690_s0, %s1901_s19  ;;  %s381_s12 = scalar_lea.vmem %s2701_s11, %s1901_s19 }
  0x10   : > { %v2382_v0 = vld [vmem:[%s377_s22] sm:$0xff] }
  0x11   : > { %v387_v1 = vsel %vm386_vm0, %v2382_v0, 0.0 }
  0x12   : > { %388 = vadd.xlane.f32.xlu0 %v387_v1 }
  0x9f   : > { %v389_v2 = vpop.xlane.xlu0 %388 }
  0xa0   : > { %v391_v3 = vmul.f32 0.03125, %v389_v2  ;;  %v1942_v2 = vld [vmem:[%s2698_s8 + $0x1] ss:$0 sm:$0xff] }
  0xa2   : > { %v392_v4 = vsub.f32 %v2382_v0, %v391_v3 }
  0xa4   : > { %v393_v5 = vmul.f32 %v392_v4, %v392_v4 }
  0xa6   : > { %v394_v6 = vsel %vm386_vm0, %v393_v5, 0.0 }
  0xa7   : > { %395 = vadd.xlane.f32.xlu0 %v394_v6 }
 0x134   : > { %v396_v12 = vpop.xlane.xlu0 %395 }
 0x135   : > { %v397_v13 = vmul.f32 0.03125, %v396_v12 }
 0x137   : > { %v398_v14 = vadd.f32 1e-05, %v397_v13 }
 0x139   : > { %2278 = vrsqrt.f32 %v398_v14 }
 0x143   : > { %v2279_v15 = vpop.eup %2278 }
 0x144   : > { %v400_v17 = vmul.f32 %v2279_v15, %v392_v4 }
 0x146   : > { %v407_v19 = vmul.f32 %v1903_v16, %v400_v17 }
 0x148   : > { %v414_v20 = vadd.f32 %v1904_v18, %v407_v19  ;;  %v2264_v19 = vld [vmem:[%s2695_s5 + $0x10] sm:$0xff]  }
 0x14a   : > { %v2419_v22 = vpack.c.bf16 %v414_v20, %v414_v20 }
 0x14c   : > { %2081 = vmatmul.mubr.msk.bf16.vlgmr.msra.gmra.mrb[0].mxu0 %vm386_vm0, %v2419_v22  ;;  %2089 = vmatmul.mubr.msk.bf16.vlgmr.msra.gmra.mrb[0].mxu1 %vm386_vm0, %v2419_v22 }
 0x14d   : > { %2093 = vmatpush3.bf16.msra.mxu0 %v2258_v21  ;;  %2096 = vmatprep.mubr.msk.bf16.mxu0 %vm2305_vm1, %v2304_v9  ;;  %v2265_v21 = vld [vmem:[%s2695_s5 + $0x18] sm:$0xff]  }
 0x14e   : > { %2094 = vmatprep.subr.bf16.mxu0 %v2304_v9  ;;  %2102 = vmatprep.mubr.msk.bf16.mxu1 %vm2305_vm1, %v2304_v9 }
 0x151   : > { %2095 = vmatpush3.bf16.msra.mxu0 %v2259_v23 }
 0x152   : > { %2106 = vmatprep.subr.bf16.mxu0 %v2304_v9 }
 0x154   : > { %2097 = vmatmul.mubr.msk.bf16.vlgmr.msra.gmra.mrb[4].mxu0 %vm386_vm0, %v2419_v22 }
 0x155   : > { %2108 = vmatprep.mubr.msk.bf16.mxu0 %vm2305_vm1, %v2304_v9 }
 0x21f   : > { %v481_v25 = vpop.f32.mrb[0].mxu0  ;;  %v544_v26 = vpop.f32.mrb[0].mxu1 }
 0x220   : > { %v545_v27 = vadd.f32 %v1909_v24, %v544_v26  ;;  %v2082_v28 = vpop.f32.mrb[1].mxu0  ;;  %v2090_v29 = vpop.f32.mrb[1].mxu1  ;;  %v482_v38 = vadd.f32 %v1905_v35, %v481_v25 }
 0x221   : > { %v484_v30 = vpop.f32.mrb[2].mxu0  ;;  %v547_v31 = vpop.f32.mrb[2].mxu1 }
 0x222   : > { %v614_v32 = vpack.c.bf16 %v545_v27, %v545_v27  ;;  %v2083_v33 = vpop.f32.mrb[3].mxu0  ;;  %v2091_v34 = vpop.f32.mrb[3].mxu1  ;;  %v613_v44 = vpack.c.bf16 %v482_v38, %v482_v38  ;;  %v1933_v27 = vld [vmem:[%s2696_s6 + $0x1] ss:$0 sm:$0xff] }
 0x223   : > { %v1924_v34 = vld [vmem:[%s2694_s4 + $0x1] ss:$0 sm:$0xff] }
 0x224   : > { %v620_v36 = vsel %vm615_vm2, %v614_v32, 0 }
 0x225   : > { %2101 = vmatpush3.bf16.xpose.msra.mxu1 %v620_v36 }
 0x226   : > { %2112 = vmatprep.subr.bf16.mxu1 %v2304_v9 }
 0x227   : > { %v607_v39 = vpop.f32.mrb[4].mxu0 }
 0x228   : > { %v608_v40 = vadd.f32 %v1913_v37, %v607_v39  ;;  %v2098_v41 = vpop.f32.mrb[5].mxu0 }
 0x229   : > { %v610_v42 = vpop.f32.mrb[6].mxu0 }
 0x22a   : > { %v676_v45 = vpack.c.bf16 %v608_v40, %v608_v40  ;;  %v2099_v46 = vpop.f32.mrb[7].mxu0 }
 0x22c   : > { %v682_v47 = vsel %vm680_vm3, %v676_v45, 0  ;;  %2103 = vmatmul.mubr.msk.bf16.vlgmr.msra.gmra.mrb[4].mxu1 %vm615_vm2, %v613_v44 }
 0x22d   : > { %2107 = vmatpush3.bf16.msra.mxu0 %v682_v47  ;;  %2113 = vmatpush3.bf16.msra.mxu1 %v2260_v43 }
 0x22e   : > { %2114 = vmatprep.subr.bf16.mxu1 %v2304_v9  ;;  %2116 = vmatprep.mubr.msk.bf16.mxu1 %vm2305_vm1, %v2304_v9 }
 0x22f   : > { %2120 = vmatprep.subr.bf16.mxu0 %v2304_v9 }
 0x231   : > { %2115 = vmatpush3.bf16.msra.mxu1 %v2261_v48 }
 0x232   : > { %2128 = vmatprep.subr.bf16.mxu1 %v2304_v9 }
 0x234   : > { %2117 = vmatmul.mubr.msk.bf16.vlgmr.msra.gmra.mrb[8].mxu1 %vm386_vm0, %v2419_v22 }
 0x235   : > { %2129 = vmatpush3.bf16.msra.mxu1 %v2262_v49  ;;  %2132 = vmatprep.mubr.msk.bf16.mxu1 %vm2305_vm1, %v2304_v9 }
 0x236   : > { %2130 = vmatprep.subr.bf16.mxu1 %v2304_v9 }
 0x239   : > { %2131 = vmatpush3.bf16.msra.mxu1 %v2263_v50  ;;  %v1948_v50 = vld [vmem:[%s2699_s9 + $0x4] sm:$0xf] }
 0x23a   : > { %2142 = vmatprep.subr.bf16.mxu1 %v2304_v9  ;;  %v1037_v51 = vsel %vm680_vm3, %v1948_v50, 0 }
 0x23c   : > { %2133 = vmatmul.mubr.msk.bf16.vlgmr.msra.gmra.mrb[12].mxu1 %vm386_vm0, %v2419_v22 }
 0x23d   : > { %2144 = vmatprep.mubr.msk.bf16.mxu1 %vm2305_vm1, %v2304_v9 }
 0x2ff   : > { %v656_v54 = vpop.f32.mrb[4].mxu1 }
 0x300   : > { %v662_v55 = vmul.f32 0.17677669, %v656_v54  ;;  %v2104_v56 = vpop.f32.mrb[5].mxu1 }
 0x301   : > { %v659_v57 = vpop.f32.mrb[6].mxu1  ;;  %v725_v56 = vld [vmem:[%s2699_s9] sm:$0xf] }
 0x302   : > { %v2105_v58 = vpop.f32.mrb[7].mxu1  ;;  %v663_v59 = vsel %vm420_vm4, -100000.0, %v662_v55 }
 0x303   : > { %v664_v60 = vsel %vm615_vm2, %v663_v59, -inf }
 0x304   : > { %665 = vmax.xlane.f32.xlu1 %v664_v60  ;;  %v2266_v60 = vld [vmem:[%s2695_s5 + $0x20] sm:$0xff]  }
 0x307   : > { %v785_v61 = vpop.f32.mrb[8].mxu1 }
 0x308   : > { %v2118_v62 = vpop.f32.mrb[9].mxu1  ;;  %v786_v36 = vadd.f32 %v1924_v34, %v785_v61 }
 0x309   : > { %v788_v63 = vpop.f32.mrb[10].mxu1  ;;  %v2267_v62 = vld [vmem:[%s2695_s5 + $0x28] sm:$0xff]  }
 0x30a   : > { %v2119_v1 = vpop.f32.mrb[11].mxu1  ;;  %v921_v37 = vpack.c.bf16 %v786_v36, %v786_v36 }
 0x30b   : > { %v2268_v1 = vld [vmem:[%s2693_s3 + $0x20] sm:$0xff]  }
 0x30f   : > { %v915_v3 = vpop.f32.mrb[12].mxu1 }
 0x310   : > { %v916_v4 = vadd.f32 %v1942_v2, %v915_v3  ;;  %v2134_v5 = vpop.f32.mrb[13].mxu1 }
 0x311   : > { %v918_v6 = vpop.f32.mrb[14].mxu1 }
 0x312   : > { %v983_v7 = vpack.c.bf16 %v916_v4, %v916_v4  ;;  %v2135_v8 = vpop.f32.mrb[15].mxu1  ;;  %v2269_v6 = vld [vmem:[%s2693_s3 + $0x28] sm:$0xff]  }
 0x313   : > { %v2270_v8 = vld [vmem:[%s2697_s7 + $0x20] sm:$0xff]  }
 0x314   : > { %v988_v10 = vsel %vm680_vm3, %v983_v7, 0 }
 0x315   : > { %2143 = vmatpush3.bf16.msra.mxu1 %v988_v10 }
 0x316   : > { %2154 = vmatprep.subr.bf16.mxu1 %v2304_v9 }
 0x391   : > { %v666_v11 = vpop.xlane.xlu1 %665 }
 0x392   : > { %v667_v12 = vsub.f32 %v663_v59, %v666_v11  ;;  %v1083_v59 = vsel %vm680_vm3, %v725_v56, 0 }
 0x394   : > { %v668_v13 = vmul.f32 1.442695, %v667_v12 }
 0x396   : > { %2280 = vpow2.f32 %v668_v13  ;;  %v2271_v13 = vld [vmem:[%s2697_s7 + $0x28] sm:$0xff]  }
 0x3a0   : > { %v2281_v14 = vpop.eup %2280 }
 0x3a1   : > { %v670_v15 = vsel %vm615_vm2, %v2281_v14, 0.0 }
 0x3a2   : > { %671 = vadd.xlane.f32.xlu1 %v670_v15 }
 0x42f   : > { %v672_v16 = vpop.xlane.xlu1 %671 }
 0x430   : > { %2282 = vrcp.f32 %v672_v16 }
 0x43a   : > { %v2283_v17 = vpop.eup %2282 }
 0x43b   : > { %v674_v18 = vmul.f32 %v2283_v17, %v2281_v14  ;;  %v1965_v14 = vld [vmem:[%s2696_s6 + $0x2] ss:$0 sm:$0xff] }
 0x43d   : > { %v675_v20 = vpack.c.bf16 %v674_v18, %v674_v18 }
 0x43f   : > { %2109 = vmatmul.mubr.msk.bf16.vlgmr.msra.gmra.mrb[8].mxu0 %vm615_vm2, %v675_v20 }
 0x440   : > { %2121 = vmatpush3.bf16.msra.mxu0 %v2264_v19  ;;  %2124 = vmatprep.mubr.msk.bf16.mxu0 %vm2305_vm1, %v2304_v9 }
 0x441   : > { %2122 = vmatprep.subr.bf16.mxu0 %v2304_v9 }
 0x444   : > { %2123 = vmatpush3.bf16.msra.mxu0 %v2265_v21 }
 0x445   : > { %2136 = vmatprep.subr.bf16.mxu0 %v2304_v9 }
 0x447   : > { %2125 = vmatmul.mubr.msk.bf16.vlgmr.msra.gmra.mrb[12].mxu0 %vm386_vm0, %v2419_v22 }
 0x448   : > { %2138 = vmatprep.mubr.msk.bf16.mxu0 %vm2305_vm1, %v2304_v9 }
 0x512   : > { %v718_v23 = vpop.f32.mrb[8].mxu0 }
 0x513   : > { %v2110_v24 = vpop.f32.mrb[9].mxu0  ;;  %v724_v61 = vpack.c.bf16 %v718_v23, %v718_v23 }
 0x514   : > { %v721_v25 = vpop.f32.mrb[10].mxu0 }
 0x515   : > { %v2111_v26 = vpop.f32.mrb[11].mxu0 }
 0x51a   : > { %v850_v28 = vpop.f32.mrb[12].mxu0 }
 0x51b   : > { %v851_v29 = vadd.f32 %v1933_v27, %v850_v28  ;;  %v2126_v30 = vpop.f32.mrb[13].mxu0  ;;  %v1956_v28 = vld [vmem:[%s2694_s4 + $0x2] ss:$0 sm:$0xff] }
 0x51c   : > { %v853_v31 = vpop.f32.mrb[14].mxu0 }
 0x51d   : > { %v922_v32 = vpack.c.bf16 %v851_v29, %v851_v29  ;;  %v2127_v33 = vpop.f32.mrb[15].mxu0 }
 0x51f   : > { %v927_v35 = vsel %vm615_vm2, %v922_v32, 0 }
 0x520   : > { %2137 = vmatpush3.bf16.xpose.msra.mxu0 %v927_v35  ;;  %v1974_v35 = vld [vmem:[%s2698_s8 + $0x2] ss:$0 sm:$0xff] }
 0x521   : > { %2148 = vmatprep.subr.bf16.mxu0 %v2304_v9 }
 0x527   : > { %2139 = vmatmul.mubr.msk.bf16.vlgmr.msra.gmra.mrb[16].mxu0 %vm615_vm2, %v921_v37 }
 0x528   : > { %2150 = vmatprep.mubr.msk.bf16.mxu0 %vm2305_vm1, %v2304_v9  ;;  %2149 = vmatpush3.bf16.msra.mxu0 %v1037_v51 }
 0x529   : > { %2160 = vmatprep.subr.bf16.mxu0 %v2304_v9 }
 0x5fa   : > { %v963_v38 = vpop.f32.mrb[16].mxu0 }
 0x5fb   : > { %v969_v39 = vmul.f32 0.17677669, %v963_v38  ;;  %v2140_v40 = vpop.f32.mrb[17].mxu0 }
 0x5fc   : > { %v966_v41 = vpop.f32.mrb[18].mxu0 }
 0x5fd   : > { %v2141_v42 = vpop.f32.mrb[19].mxu0  ;;  %v970_v43 = vsel %vm420_vm4, -100000.0, %v969_v39 }
 0x5fe   : > { %v971_v44 = vsel %vm615_vm2, %v970_v43, -inf }
 0x5ff   : > { %972 = vmax.xlane.f32.xlu0 %v971_v44 }
 0x68c   : > { %v973_v45 = vpop.xlane.xlu0 %972 }
 0x68d   : > { %v974_v46 = vsub.f32 %v970_v43, %v973_v45 }
 0x68f   : > { %v975_v47 = vmul.f32 1.442695, %v974_v46 }
 0x691   : > { %2284 = vpow2.f32 %v975_v47 }
 0x69b   : > { %v2285_v48 = vpop.eup %2284 }
 0x69c   : > { %v977_v49 = vsel %vm615_vm2, %v2285_v48, 0.0 }
 0x69d   : > { %978 = vadd.xlane.f32.xlu1 %v977_v49 }
 0x72a   : > { %v979_v54 = vpop.xlane.xlu1 %978 }
 0x72b   : > { %2286 = vrcp.f32 %v979_v54 }
 0x735   : > { %v2287_v55 = vpop.eup %2286 }
 0x736   : > { %v981_v57 = vmul.f32 %v2287_v55, %v2285_v48 }
 0x738   : > { %v982_v58 = vpack.c.bf16 %v981_v57, %v981_v57  ;;  %v1980_v57 = vld [vmem:[%s2699_s9 + $0x8] sm:$0xf] }
 0x73a   : > { %2145 = vmatmul.mubr.msk.bf16.vlgmr.msra.gmra.mrb[16].mxu1 %vm615_vm2, %v982_v58  ;;  %v1436_v58 = vsel %vm680_vm3, %v1980_v57, 0 }
 0x73b   : > { %2155 = vmatpush3.bf16.msra.mxu1 %v1083_v59  ;;  %2156 = vmatprep.mubr.msk.bf16.mxu1 %vm2305_vm1, %v2304_v9 }
 0x73c   : > { %2168 = vmatprep.subr.bf16.mxu1 %v2304_v9 }
 0x742   : > { %2157 = vmatmul.mubr.msk.bf16.vlgmr.msra.gmra.mrb[20].mxu1 %vm615_vm2, %v724_v61 }
 0x743   : > { %2169 = vmatpush3.bf16.msra.mxu1 %v2266_v60  ;;  %2172 = vmatprep.mubr.msk.bf16.mxu1 %vm2305_vm1, %v2304_v9 }
 0x744   : > { %2170 = vmatprep.subr.bf16.mxu1 %v2304_v9 }
 0x747   : > { %2171 = vmatpush3.bf16.msra.mxu1 %v2267_v62  ;;  %v2272_v62 = vld [vmem:[%s2693_s3 + $0x30] sm:$0xff]  }
 0x748   : > { %2184 = vmatprep.subr.bf16.mxu1 %v2304_v9 }
 0x74a   : > { %2173 = vmatmul.mubr.msk.bf16.vlgmr.msra.gmra.mrb[24].mxu1 %vm386_vm0, %v2419_v22 }
 0x74b   : > { %2186 = vmatprep.mubr.msk.bf16.mxu1 %vm2305_vm1, %v2304_v9 }
 0x80d   : > { %v1024_v63 = vpop.f32.mrb[16].mxu1 }
 0x80e   : > { %v1030_v2 = vpack.c.bf16 %v1024_v63, %v1024_v63  ;;  %v2146_v3 = vpop.f32.mrb[17].mxu1 }
 0x80f   : > { %v1027_v4 = vpop.f32.mrb[18].mxu1  ;;  %v2275_v3 = vld [vmem:[%s2697_s7 + $0x38] sm:$0xff]  }
 0x810   : > { %v2147_v5 = vpop.f32.mrb[19].mxu1  ;;  %2151 = vmatmul.mubr.msk.bf16.vlgmr.msra.gmra.mrb[20].mxu0 %vm615_vm2, %v1030_v2  ;;  %v2274_v2 = vld [vmem:[%s2697_s7 + $0x30] sm:$0xff]  }
 0x811   : > { %2161 = vmatpush3.bf16.msra.mxu0 %v2268_v1  ;;  %2164 = vmatprep.mubr.msk.bf16.mxu0 %vm2305_vm1, %v2304_v9  ;;  %v2273_v1 = vld [vmem:[%s2693_s3 + $0x38] sm:$0xff]   ;;  %v2276_v5 = vld [vmem:[%s2695_s5 + $0x30] sm:$0xff]  }
 0x812   : > { %2162 = vmatprep.subr.bf16.mxu0 %v2304_v9 }
 0x815   : > { %v1119_v7 = vpop.f32.mrb[20].mxu1  ;;  %2163 = vmatpush3.bf16.msra.mxu0 %v2269_v6 }
 0x816   : > { %v2158_v10 = vpop.f32.mrb[21].mxu1  ;;  %2176 = vmatprep.subr.bf16.mxu0 %v2304_v9 }
 0x817   : > { %v1122_v11 = vpop.f32.mrb[22].mxu1 }
 0x818   : > { %v2159_v12 = vpop.f32.mrb[23].mxu1  ;;  %2165 = vmatmul.mubr.msk.bf16.vlgmr.msra.gmra.mrb[24].mxu0 %vm386_vm0, %v2419_v22  ;;  %v2277_v11 = vld [vmem:[%s2695_s5 + $0x38] sm:$0xff]  }
 0x819   : > { %2177 = vmatpush3.bf16.msra.mxu0 %v2270_v8  ;;  %2180 = vmatprep.mubr.msk.bf16.mxu0 %vm2305_vm1, %v2304_v9 }
 0x81a   : > { %2178 = vmatprep.subr.bf16.mxu0 %v2304_v9 }
 0x81d   : > { %v1249_v15 = vpop.f32.mrb[24].mxu1  ;;  %2179 = vmatpush3.bf16.msra.mxu0 %v2271_v13 }
 0x81e   : > { %v1250_v16 = vadd.f32 %v1965_v14, %v1249_v15  ;;  %v2174_v17 = vpop.f32.mrb[25].mxu1  ;;  %2190 = vmatprep.subr.bf16.mxu0 %v2304_v9 }
 0x81f   : > { %v1252_v18 = vpop.f32.mrb[26].mxu1 }
 0x820   : > { %v1321_v19 = vpack.c.bf16 %v1250_v16, %v1250_v16  ;;  %v2175_v20 = vpop.f32.mrb[27].mxu1  ;;  %2181 = vmatmul.mubr.msk.bf16.vlgmr.msra.gmra.mrb[28].mxu0 %vm386_vm0, %v2419_v22  ;;  %v2005_v16 = vld [vmem:[%s2698_s8 + $0x3] ss:$0 sm:$0xff] }
 0x821   : > { %2192 = vmatprep.mubr.msk.bf16.mxu0 %vm2305_vm1, %v2304_v9 }
 0x822   : > { %v1326_v21 = vsel %vm615_vm2, %v1321_v19, 0 }
 0x823   : > { %2185 = vmatpush3.bf16.xpose.msra.mxu1 %v1326_v21 }
 0x824   : > { %2196 = vmatprep.subr.bf16.mxu1 %v2304_v9 }
 0x8e3   : > { %v1073_v23 = vpop.f32.mrb[20].mxu0 }
 0x8e4   : > { %v2585_v24 = vadd.f32 %v1119_v7, %v1073_v23  ;;  %v2152_v25 = vpop.f32.mrb[21].mxu0 }
 0x8e5   : > { %v1076_v26 = vpop.f32.mrb[22].mxu0 }
 0x8e6   : > { %v2153_v27 = vpop.f32.mrb[23].mxu0 }
 0x8eb   : > { %v1184_v29 = vpop.f32.mrb[24].mxu0 }
 0x8ec   : > { %v1185_v30 = vadd.f32 %v1956_v28, %v1184_v29  ;;  %v2166_v31 = vpop.f32.mrb[25].mxu0 }
 0x8ed   : > { %v1187_v32 = vpop.f32.mrb[26].mxu0 }
 0x8ee   : > { %v1320_v33 = vpack.c.bf16 %v1185_v30, %v1185_v30  ;;  %v2167_v34 = vpop.f32.mrb[27].mxu0  ;;  %v1996_v30 = vld [vmem:[%s2696_s6 + $0x3] ss:$0 sm:$0xff] }
 0x8f0   : > { %2187 = vmatmul.mubr.msk.bf16.vlgmr.msra.gmra.mrb[28].mxu1 %vm615_vm2, %v1320_v33 }
 0x8f1   : > { %2198 = vmatprep.mubr.msk.bf16.mxu1 %vm2305_vm1, %v2304_v9  ;;  %2197 = vmatpush3.bf16.msra.mxu1 %v1436_v58 }
 0x8f2   : > { %2210 = vmatprep.subr.bf16.mxu1 %v2304_v9 }
 0x8f3   : > { %v1314_v36 = vpop.f32.mrb[28].mxu0 }
 0x8f4   : > { %v1315_v37 = vadd.f32 %v1974_v35, %v1314_v36  ;;  %v2182_v38 = vpop.f32.mrb[29].mxu0 }
 0x8f5   : > { %v1317_v39 = vpop.f32.mrb[30].mxu0 }
 0x8f6   : > { %v1382_v40 = vpack.c.bf16 %v1315_v37, %v1315_v37  ;;  %v2183_v41 = vpop.f32.mrb[31].mxu0  ;;  %v1987_v37 = vld [vmem:[%s2694_s4 + $0x3] ss:$0 sm:$0xff] }
 0x8f8   : > { %v1387_v42 = vsel %vm680_vm3, %v1382_v40, 0 }
 0x8f9   : > { %2191 = vmatpush3.bf16.msra.mxu0 %v1387_v42 }
 0x8fa   : > { %2202 = vmatprep.subr.bf16.mxu0 %v2304_v9 }
 0x9c3   : > { %v1362_v43 = vpop.f32.mrb[28].mxu1 }
 0x9c4   : > { %v1368_v44 = vmul.f32 0.17677669, %v1362_v43  ;;  %v2188_v45 = vpop.f32.mrb[29].mxu1 }
 0x9c5   : > { %v1365_v46 = vpop.f32.mrb[30].mxu1 }
 0x9c6   : > { %v2189_v47 = vpop.f32.mrb[31].mxu1  ;;  %v1369_v48 = vsel %vm420_vm4, -100000.0, %v1368_v44 }
 0x9c7   : > { %v1370_v49 = vsel %vm615_vm2, %v1369_v48, -inf }
 0x9c8   : > { %1371 = vmax.xlane.f32.xlu0 %v1370_v49 }
 0xa55   : > { %v1372_v50 = vpop.xlane.xlu0 %1371 }
 0xa56   : > { %v1373_v51 = vsub.f32 %v1369_v48, %v1372_v50 }
 0xa58   : > { %v1374_v54 = vmul.f32 1.442695, %v1373_v51 }
 0xa5a   : > { %2288 = vpow2.f32 %v1374_v54 }
 0xa64   : > { %v2289_v55 = vpop.eup %2288 }
 0xa65   : > { %v1376_v56 = vsel %vm615_vm2, %v2289_v55, 0.0 }
 0xa66   : > { %1377 = vadd.xlane.f32.xlu1 %v1376_v56 }
 0xaf3   : > { %v1378_v59 = vpop.xlane.xlu1 %1377 }
 0xaf4   : > { %2290 = vrcp.f32 %v1378_v59 }
 0xafe   : > { %v2291_v60 = vpop.eup %2290 }
 0xaff   : > { %v1380_v61 = vmul.f32 %v2291_v60, %v2289_v55 }
 0xb01   : > { %v1381_v63 = vpack.c.bf16 %v1380_v61, %v1380_v61 }
 0xb03   : > { %2193 = vmatmul.mubr.msk.bf16.vlgmr.msra.gmra.mrb[32].mxu0 %vm615_vm2, %v1381_v63 }
 0xb04   : > { %2203 = vmatpush3.bf16.msra.mxu0 %v2272_v62  ;;  %2206 = vmatprep.mubr.msk.bf16.mxu0 %vm2305_vm1, %v2304_v9 }
 0xb05   : > { %2204 = vmatprep.subr.bf16.mxu0 %v2304_v9 }
 0xb08   : > { %2205 = vmatpush3.bf16.msra.mxu0 %v2273_v1 }
 0xb09   : > { %2218 = vmatprep.subr.bf16.mxu0 %v2304_v9 }
 0xb0b   : > { %2207 = vmatmul.mubr.msk.bf16.vlgmr.msra.gmra.mrb[36].mxu0 %vm386_vm0, %v2419_v22 }
 0xb0c   : > { %2219 = vmatpush3.bf16.msra.mxu0 %v2274_v2  ;;  %2222 = vmatprep.mubr.msk.bf16.mxu0 %vm2305_vm1, %v2304_v9  ;;  %v2013_v2 = vld [vmem:[%s2700_s10] ss:$0 sm:$0xff] }
 0xb0d   : > { %2220 = vmatprep.subr.bf16.mxu0 %v2304_v9 }
 0xb10   : > { %2221 = vmatpush3.bf16.msra.mxu0 %v2275_v3 }
 0xb11   : > { %2232 = vmatprep.subr.bf16.mxu0 %v2304_v9 }
 0xb13   : > { %2223 = vmatmul.mubr.msk.bf16.vlgmr.msra.gmra.mrb[40].mxu0 %vm386_vm0, %v2419_v22 }
 0xb14   : > { %2234 = vmatprep.mubr.msk.bf16.mxu0 %vm2305_vm1, %v2304_v9 }
 0xbd6   : > { %v1423_v4 = vpop.f32.mrb[32].mxu0 }
 0xbd7   : > { %v1429_v6 = vpack.c.bf16 %v1423_v4, %v1423_v4  ;;  %v2194_v7 = vpop.f32.mrb[33].mxu0 }
 0xbd8   : > { %v1426_v8 = vpop.f32.mrb[34].mxu0 }
 0xbd9   : > { %v2195_v10 = vpop.f32.mrb[35].mxu0  ;;  %2199 = vmatmul.mubr.msk.bf16.vlgmr.msra.gmra.mrb[32].mxu1 %vm615_vm2, %v1429_v6 }
 0xbda   : > { %2211 = vmatpush3.bf16.msra.mxu1 %v2276_v5  ;;  %2214 = vmatprep.mubr.msk.bf16.mxu1 %vm2305_vm1, %v2304_v9 }
 0xbdb   : > { %2212 = vmatprep.subr.bf16.mxu1 %v2304_v9 }
 0xbde   : > { %v1538_v12 = vpop.f32.mrb[36].mxu0  ;;  %2213 = vmatpush3.bf16.msra.mxu1 %v2277_v11 }
 0xbdf   : > { %v2208_v13 = vpop.f32.mrb[37].mxu0  ;;  %2226 = vmatprep.subr.bf16.mxu1 %v2304_v9 }
 0xbe0   : > { %v1541_v14 = vpop.f32.mrb[38].mxu0 }
 0xbe1   : > { %v2209_v15 = vpop.f32.mrb[39].mxu0  ;;  %2215 = vmatmul.mubr.msk.bf16.vlgmr.msra.gmra.mrb[36].mxu1 %vm386_vm0, %v2419_v22 }
 0xbe2   : > { %2228 = vmatprep.mubr.msk.bf16.mxu1 %vm2305_vm1, %v2304_v9 }
 0xbe6   : > { %v1668_v17 = vpop.f32.mrb[40].mxu0 }
 0xbe7   : > { %v1669_v18 = vadd.f32 %v2005_v16, %v1668_v17  ;;  %v2224_v19 = vpop.f32.mrb[41].mxu0 }
 0xbe8   : > { %v1671_v20 = vpop.f32.mrb[42].mxu0 }
 0xbe9   : > { %v1736_v21 = vpack.c.bf16 %v1669_v18, %v1669_v18  ;;  %v2225_v23 = vpop.f32.mrb[43].mxu0 }
 0xbeb   : > { %v1741_v25 = vsel %vm680_vm3, %v1736_v21, 0 }
 0xbec   : > { %2233 = vmatpush3.bf16.msra.mxu0 %v1741_v25 }
 0xcac   : > { %v1472_v26 = vpop.f32.mrb[32].mxu1 }
 0xcad   : > { %v1478_v27 = vadd.f32 %v1472_v26, %v2585_v24  ;;  %v2200_v22 = vpop.f32.mrb[33].mxu1  ;;  %v1539_v24 = vadd.f32 %v1987_v37, %v1538_v12 }
 0xcae   : > { %v1475_v28 = vpop.f32.mrb[34].mxu1 }
 0xcaf   : > { %v2201_v29 = vpop.f32.mrb[35].mxu1  ;;  %v1674_v39 = vpack.c.bf16 %v1539_v24, %v1539_v24 }
 0xcb4   : > { %v1603_v31 = vpop.f32.mrb[36].mxu1 }
 0xcb5   : > { %v1604_v32 = vadd.f32 %v1996_v30, %v1603_v31  ;;  %v2216_v33 = vpop.f32.mrb[37].mxu1 }
 0xcb6   : > { %v1606_v34 = vpop.f32.mrb[38].mxu1 }
 0xcb7   : > { %v1675_v35 = vpack.c.bf16 %v1604_v32, %v1604_v32  ;;  %v2217_v36 = vpop.f32.mrb[39].mxu1 }
 0xcb9   : > { %v1680_v38 = vsel %vm615_vm2, %v1675_v35, 0 }
 0xcba   : > { %2227 = vmatpush3.bf16.xpose.msra.mxu1 %v1680_v38 }
 0xcbb   : > { %2238 = vmatprep.subr.bf16.mxu1 %v2304_v9 }
 0xcc1   : > { %2229 = vmatmul.mubr.msk.bf16.vlgmr.msra.gmra.mrb[40].mxu1 %vm615_vm2, %v1674_v39 }
 0xcc2   : > { %2240 = vmatprep.mubr.msk.bf16.mxu1 %vm2305_vm1, %v2304_v9  ;;  %v2011_v9 = vld [vmem:[%s2699_s9 + $0xc] sm:$0xf] }
 0xcc3   : > { %v1790_v54 = vsel %vm680_vm3, %v2011_v9, 0 }
 0xcc4   : > { %2239 = vmatpush3.bf16.msra.mxu1 %v1790_v54 }
 0xd94   : > { %v1716_v40 = vpop.f32.mrb[40].mxu1 }
 0xd95   : > { %v1722_v41 = vmul.f32 0.17677669, %v1716_v40  ;;  %v2230_v42 = vpop.f32.mrb[41].mxu1 }
 0xd96   : > { %v1719_v43 = vpop.f32.mrb[42].mxu1 }
 0xd97   : > { %v2231_v44 = vpop.f32.mrb[43].mxu1  ;;  %v1723_v45 = vsel %vm420_vm4, -100000.0, %v1722_v41 }
 0xd98   : > { %v1724_v46 = vsel %vm615_vm2, %v1723_v45, -inf }
 0xd99   : > { %1725 = vmax.xlane.f32.xlu0 %v1724_v46 }
 0xe26   : > { %v1726_v47 = vpop.xlane.xlu0 %1725 }
 0xe27   : > { %v1727_v48 = vsub.f32 %v1723_v45, %v1726_v47 }
 0xe29   : > { %v1728_v49 = vmul.f32 1.442695, %v1727_v48 }
 0xe2b   : > { %2292 = vpow2.f32 %v1728_v49 }
 0xe35   : > { %v2293_v50 = vpop.eup %2292 }
 0xe36   : > { %v1730_v51 = vsel %vm615_vm2, %v2293_v50, 0.0 }
 0xe37   : > { %1731 = vadd.xlane.f32.xlu1 %v1730_v51 }
 0xec4   : > { %v1732_v52 = vpop.xlane.xlu1 %1731 }
 0xec5   : > { %2294 = vrcp.f32 %v1732_v52 }
 0xecf   : > { %v2295_v53 = vpop.eup %2294 }
 0xed0   : > { %v1734_v55 = vmul.f32 %v2295_v53, %v2293_v50 }
 0xed2   : > { %v1735_v56 = vpack.c.bf16 %v1734_v55, %v1734_v55 }
 0xed4   : > { %2235 = vmatmul.mubr.msk.bf16.vlgmr.msra.gmra.mrb[44].mxu0 %vm615_vm2, %v1735_v56 }
 0xfa7   : > { %v1777_v57 = vpop.f32.mrb[44].mxu0 }
 0xfa8   : > { %v1783_v58 = vpack.c.bf16 %v1777_v57, %v1777_v57  ;;  %v2236_v59 = vpop.f32.mrb[45].mxu0 }
 0xfa9   : > { %v1780_v60 = vpop.f32.mrb[46].mxu0 }
 0xfaa   : > { %v2237_v61 = vpop.f32.mrb[47].mxu0  ;;  %2241 = vmatmul.mubr.msk.bf16.vlgmr.msra.gmra.mrb[44].mxu1 %vm615_vm2, %v1783_v58 }
0x107d   : > { %v1826_v62 = vpop.f32.mrb[44].mxu1 }
0x107e   : > { %v1832_v63 = vadd.f32 %v1826_v62, %v1478_v27  ;;  %v2242_v1 = vpop.f32.mrb[45].mxu1 }
0x107f   : > { %v1829_v3 = vpop.f32.mrb[46].mxu1 }
0x1080   : > { %v1833_v4 = vadd.f32 %v1832_v63, %v2382_v0  ;;  %v2243_v5 = vpop.f32.mrb[47].mxu1 }
0x1082   : > { %v1841_v6 = vadd.f32 %v2013_v2, %v1833_v4 }
0x1084   : > { %1842 = vst.msk [vmem:[%s381_s12] sm:$0xff] %vm386_vm0, %v1841_v6 }
0x1085 PF: > { %s21_s17 = sadd.s32 1, %s2302_s17  }
0x1086   : > { %p18_p4 = scmp.ge.s32.totalorder %s21_s17, 4  }
0x1088   :  { %20 = sbr.rel (!%p18_p4) target bundleno = 1 (0x1), region = 115 }

// kernel: transformer_forward.11
= control target key start
LH: loop header
LB: loop body
LE: loop exit
PB: predicated region body
PF: predicated region fallthrough
CT: control target
= control target key end

     0   :  { %s2426_s21 = smov 0   ;;  %s2747_s0 = inlined_call_operand.vmem [shape: f32[2,8,32], index: 0, kind: input, shape index: {}]   ;;  %s2748_s1 = inlined_call_operand.vmem [shape: f32[2,1,8], index: 1, kind: input, shape index: {}]   ;;  %s2749_s2 = inlined_call_operand.vmem [shape: f32[1,32], index: 2, kind: input, shape index: {}]   ;;  %s2750_s3 = inlined_call_operand.vmem [shape: f32[1,32], index: 3, kind: input, shape index: {}]   ;;  %s2751_s4 = inlined_call_operand.vmem [shape: bf16[4,32,8], index: 4, kind: input, shape index: {}]   ;;  %s2752_s5 = inlined_call_operand.vmem [shape: f32[4,1,8], index: 5, kind: input, shape index: {}]   ;;  %s2753_s6 = inlined_call_operand.vmem [shape: bf16[4,32,8], index: 6, kind: input, shape index: {}]   ;;  %s2754_s7 = inlined_call_operand.vmem [shape: f32[4,1,8], index: 7, kind: input, shape index: {}]   ;;  %s2755_s8 = inlined_call_operand.vmem [shape: bf16[4,32,8], index: 8, kind: input, shape index: {}]   ;;  %s2756_s9 = inlined_call_operand.vmem [shape: f32[4,1,8], index: 9, kind: input, shape index: {}]   ;;  %s2757_s10 = inlined_call_operand.vmem [shape: bf16[4,8,32], index: 10, kind: input, shape index: {}]   ;;  %s2758_s11 = inlined_call_operand.vmem [shape: f32[1,32], index: 11, kind: input, shape index: {}]   ;;  %s2759_s12 = inlined_call_operand.vmem [shape: f32[2,8,32], index: 12, kind: output, shape index: {}]  }
   0x1 LB: > { %s1949_s22 = sadd.s32 4294967295, %s2356_s21   ;;  %p1953_p0 = scmp.ge.s32.totalorder %s2356_s21, 1  ;;  %s2356_s21 = sphi %s2426_s21, %s22_s21  }
   0x2   : > { %p369_p1 = scmp.lt.s32.totalorder %s2356_s21, 3 }
   0x4   : > { %p370_p2 = pnand %p1953_p0, %p369_p1 }
   0x5   : > { %p412_p3 = scmp.lt.s32.totalorder (!%p370_p2), %s1949_s22, 1  ;;  %vm427_vm0 = vcmask (!%p370_p2), 261120   ;;  %v2308_v7 = vld [vmem:[%s2751_s4] sm:$0xff] (!%p370_p2)   ;;  %v2358_v9 = vmov (!%p370_p2), 0.0   ;;  %v2310_v10 = vld [vmem:[%s2751_s4 + $0x8] sm:$0xff] (!%p370_p2)   ;;  %vm2359_vm1 = vmmov (!%p370_p2), 0   ;;  %v702_v51 = vlaneseq (!%p370_p2) }
   0x6   : > { %373 = sbr.rel (%p370_p2) target bundleno = 4229 (0x1085), region = 68  ;;  %v2309_v8 = vld [vmem:[%s2753_s6] sm:$0xff] (!%p370_p2)   ;;  %2129 = vmatprep.subr.bf16.mxu0 (!%p370_p2), %v2358_v9  ;;  %2137 = vmatprep.subr.bf16.mxu1 (!%p370_p2), %v2358_v9  ;;  %v2311_v11 = vld [vmem:[%s2753_s6 + $0x8] sm:$0xff] (!%p370_p2)   ;;  %vm653_vm2 = vcmask (!%p370_p2), 64512   ;;  %vm724_vm3 = vcmask (!%p370_p2), 1043456   ;;  %v2314_v43 = vld [vmem:[%s2751_s4 + $0x10] sm:$0xff] (!%p370_p2)  }
   0x7   : > { %2130 = vmatpush3.bf16.msra.mxu0 (!%p370_p2), %v2308_v7  ;;  %2138 = vmatpush3.bf16.msra.mxu1 (!%p370_p2), %v2309_v8  ;;  %v1956_v16 = vld [vmem:[%s2749_s2] ss:$0 sm:$0xff] (!%p370_p2)  ;;  %v2313_v23 = vld [vmem:[%s2755_s8 + $0x8] sm:$0xff] (!%p370_p2)   ;;  %v2315_v48 = vld [vmem:[%s2751_s4 + $0x18] sm:$0xff] (!%p370_p2)   ;;  %v703_v53 = vshrl.u32 (!%p370_p2), %v702_v51, 7  ;;  %v2360_v55 = vmov (!%p370_p2), 0  }
   0x8   : > { %2131 = vmatprep.subr.bf16.mxu0 (!%p370_p2), %v2358_v9  ;;  %2139 = vmatprep.subr.bf16.mxu1 (!%p370_p2), %v2358_v9  ;;  %v1957_v18 = vld [vmem:[%s2750_s3] ss:$0 sm:$0xff] (!%p370_p2)  ;;  %v2316_v49 = vld [vmem:[%s2755_s8 + $0x10] sm:$0xff] (!%p370_p2)   ;;  %v2317_v50 = vld [vmem:[%s2755_s8 + $0x18] sm:$0xff] (!%p370_p2)  }
   0x9   : > { %2133 = vmatprep.mubr.msk.bf16.mxu0 (!%p370_p2), %vm2359_vm1, %v2358_v9  ;;  %2141 = vmatprep.mubr.msk.bf16.mxu1 (!%p370_p2), %vm2359_vm1, %v2358_v9  ;;  %v2312_v21 = vld [vmem:[%s2755_s8] sm:$0xff] (!%p370_p2)   ;;  %v704_v54 = vsub.s32 (!%p370_p2), 0, %v703_v53 }
   0xa   : > { %v1962_v24 = vld [vmem:[%s2754_s7] ss:$0 sm:$0xff] (!%p370_p2) }
   0xb   : > { %2132 = vmatpush3.bf16.msra.mxu0 (!%p370_p2), %v2310_v10  ;;  %2140 = vmatpush3.bf16.msra.mxu1 (!%p370_p2), %v2311_v11  ;;  %v1958_v35 = vld [vmem:[%s2752_s5] ss:$0 sm:$0xff] (!%p370_p2) }
   0xc   : > { %2145 = vmatprep.subr.bf16.mxu0 (!%p370_p2), %v2358_v9  ;;  %2153 = vmatprep.subr.bf16.mxu1 (!%p370_p2), %v2358_v9  ;;  %v1966_v37 = vld [vmem:[%s2756_s9] ss:$0 sm:$0xff] (!%p370_p2) }
   0xd   : > { %s2761_s22 = smov (!%p412_p3, %s1949_s22), 1 }
   0xe   : > { %s1954_s23 = sshll.u32 %s2761_s22, 3  ;;  %s418_s29 = scalar_lea.vmem %s2748_s1, %s2761_s22 }
   0xf   : > { %s415_s26 = scalar_lea.vmem %s2747_s0, %s1954_s23  ;;  %v457_v52 = vld [vmem:[%s418_s29] sm:$0x1]  ;;  %s422_s28 = scalar_lea.vmem %s2759_s12, %s1954_s23 }
  0x10   : > { %v2442_v0 = vld [vmem:[%s415_s26] sm:$0xff]  ;;  %vm458_vm4 = vcmp.gt.f32.partialorder %v457_v52, 0.5 }
  0x11   : > { %v428_v1 = vsel %vm427_vm0, %v2442_v0, 0.0  ;;  %v701_v56 = vsel %vm458_vm4, 1, %v2360_v55 }
  0x12   : > { %429 = vadd.xlane.f32.xlu0 %v428_v1  ;;  %v2542_v57 = vrot.slane %v701_v56, %v704_v54  ;;  %v2001_v54 = vld [vmem:[%s2757_s10 + $0x4] sm:$0xf] }
  0x13   : > { %v1081_v55 = vsel %vm724_vm3, %v2001_v54, 0 }
  0x14   : > { %vm706_vm5 = vcmp.eq.s32.totalorder %v2542_v57, 1 }
  0x9f   : > { %v430_v2 = vpop.xlane.xlu0 %429 }
  0xa0   : > { %v432_v3 = vmul.f32 0.03125, %v430_v2 }
  0xa2   : > { %v433_v4 = vsub.f32 %v2442_v0, %v432_v3 }
  0xa4   : > { %v434_v5 = vmul.f32 %v433_v4, %v433_v4 }
  0xa6   : > { %v435_v6 = vsel %vm427_vm0, %v434_v5, 0.0 }
  0xa7   : > { %436 = vadd.xlane.f32.xlu0 %v435_v6  ;;  %v1995_v6 = vld [vmem:[%s2756_s9 + $0x1] ss:$0 sm:$0xff] }
 0x134   : > { %v437_v12 = vpop.xlane.xlu0 %436 }
 0x135   : > { %v438_v13 = vmul.f32 0.03125, %v437_v12 }
 0x137   : > { %v439_v14 = vadd.f32 1e-05, %v438_v13 }
 0x139   : > { %2332 = vrsqrt.f32 %v439_v14 }
 0x143   : > { %v2333_v15 = vpop.eup %2332 }
 0x144   : > { %v441_v17 = vmul.f32 %v2333_v15, %v433_v4 }
 0x146   : > { %v448_v19 = vmul.f32 %v1956_v16, %v441_v17 }
 0x148   : > { %v455_v20 = vadd.f32 %v1957_v18, %v448_v19 }
 0x14a   : > { %v2479_v22 = vpack.c.bf16 %v455_v20, %v455_v20 }
 0x14c   : > { %2134 = vmatmul.mubr.msk.bf16.vlgmr.msra.gmra.mrb[0].mxu0 %vm427_vm0, %v2479_v22  ;;  %2142 = vmatmul.mubr.msk.bf16.vlgmr.msra.gmra.mrb[0].mxu1 %vm427_vm0, %v2479_v22 }
 0x14d   : > { %2146 = vmatpush3.bf16.msra.mxu0 %v2312_v21  ;;  %2149 = vmatprep.mubr.msk.bf16.mxu0 %vm2359_vm1, %v2358_v9 }
 0x14e   : > { %2147 = vmatprep.subr.bf16.mxu0 %v2358_v9  ;;  %2155 = vmatprep.mubr.msk.bf16.mxu1 %vm2359_vm1, %v2358_v9 }
 0x151   : > { %2148 = vmatpush3.bf16.msra.mxu0 %v2313_v23 }
 0x152   : > { %2159 = vmatprep.subr.bf16.mxu0 %v2358_v9 }
 0x154   : > { %2150 = vmatmul.mubr.msk.bf16.vlgmr.msra.gmra.mrb[4].mxu0 %vm427_vm0, %v2479_v22 }
 0x155   : > { %2161 = vmatprep.mubr.msk.bf16.mxu0 %vm2359_vm1, %v2358_v9 }
 0x21f   : > { %v519_v25 = vpop.f32.mrb[0].mxu0  ;;  %v582_v26 = vpop.f32.mrb[0].mxu1 }
 0x220   : > { %v583_v27 = vadd.f32 %v1962_v24, %v582_v26  ;;  %v2135_v28 = vpop.f32.mrb[1].mxu0  ;;  %v2143_v29 = vpop.f32.mrb[1].mxu1  ;;  %v520_v38 = vadd.f32 %v1958_v35, %v519_v25  ;;  %v2318_v24 = vld [vmem:[%s2753_s6 + $0x10] sm:$0xff]   ;;  %v2319_v26 = vld [vmem:[%s2753_s6 + $0x18] sm:$0xff]  }
 0x221   : > { %v522_v30 = vpop.f32.mrb[2].mxu0  ;;  %v585_v31 = vpop.f32.mrb[2].mxu1 }
 0x222   : > { %v652_v32 = vpack.c.bf16 %v583_v27, %v583_v27  ;;  %v2136_v33 = vpop.f32.mrb[3].mxu0  ;;  %v2144_v34 = vpop.f32.mrb[3].mxu1  ;;  %v651_v44 = vpack.c.bf16 %v520_v38, %v520_v38  ;;  %v1986_v31 = vld [vmem:[%s2754_s7 + $0x1] ss:$0 sm:$0xff] }
 0x223   : > { %v1977_v38 = vld [vmem:[%s2752_s5 + $0x1] ss:$0 sm:$0xff] }
 0x224   : > { %v658_v36 = vsel %vm653_vm2, %v652_v32, 0 }
 0x225   : > { %2154 = vmatpush3.bf16.xpose.msra.mxu1 %v658_v36 }
 0x226   : > { %2165 = vmatprep.subr.bf16.mxu1 %v2358_v9 }
 0x227   : > { %v645_v39 = vpop.f32.mrb[4].mxu0 }
 0x228   : > { %v646_v40 = vadd.f32 %v1966_v37, %v645_v39  ;;  %v2151_v41 = vpop.f32.mrb[5].mxu0 }
 0x229   : > { %v648_v42 = vpop.f32.mrb[6].mxu0 }
 0x22a   : > { %v720_v45 = vpack.c.bf16 %v646_v40, %v646_v40  ;;  %v2152_v46 = vpop.f32.mrb[7].mxu0 }
 0x22c   : > { %v726_v47 = vsel %vm724_vm3, %v720_v45, 0  ;;  %2156 = vmatmul.mubr.msk.bf16.vlgmr.msra.gmra.mrb[4].mxu1 %vm653_vm2, %v651_v44 }
 0x22d   : > { %2160 = vmatpush3.bf16.msra.mxu0 %v726_v47  ;;  %2166 = vmatpush3.bf16.msra.mxu1 %v2314_v43 }
 0x22e   : > { %2167 = vmatprep.subr.bf16.mxu1 %v2358_v9  ;;  %2169 = vmatprep.mubr.msk.bf16.mxu1 %vm2359_vm1, %v2358_v9 }
 0x22f   : > { %2173 = vmatprep.subr.bf16.mxu0 %v2358_v9 }
 0x231   : > { %2168 = vmatpush3.bf16.msra.mxu1 %v2315_v48 }
 0x232   : > { %2181 = vmatprep.subr.bf16.mxu1 %v2358_v9 }
 0x234   : > { %2170 = vmatmul.mubr.msk.bf16.vlgmr.msra.gmra.mrb[8].mxu1 %vm427_vm0, %v2479_v22 }
 0x235   : > { %2182 = vmatpush3.bf16.msra.mxu1 %v2316_v49  ;;  %2185 = vmatprep.mubr.msk.bf16.mxu1 %vm2359_vm1, %v2358_v9 }
 0x236   : > { %2183 = vmatprep.subr.bf16.mxu1 %v2358_v9 }
 0x239   : > { %2184 = vmatpush3.bf16.msra.mxu1 %v2317_v50 }
 0x23a   : > { %2195 = vmatprep.subr.bf16.mxu1 %v2358_v9 }
 0x23c   : > { %2186 = vmatmul.mubr.msk.bf16.vlgmr.msra.gmra.mrb[12].mxu1 %vm427_vm0, %v2479_v22 }
 0x23d   : > { %2197 = vmatprep.mubr.msk.bf16.mxu1 %vm2359_vm1, %v2358_v9 }
 0x2ff   : > { %v694_v58 = vpop.f32.mrb[4].mxu1 }
 0x300   : > { %v700_v59 = vmul.f32 0.17677669, %v694_v58  ;;  %v2157_v60 = vpop.f32.mrb[5].mxu1 }
 0x301   : > { %v697_v61 = vpop.f32.mrb[6].mxu1 }
 0x302   : > { %v2158_v62 = vpop.f32.mrb[7].mxu1  ;;  %v707_v63 = vsel %vm706_vm5, -100000.0, %v700_v59  ;;  %v769_v59 = vld [vmem:[%s2757_s10] sm:$0xf] }
 0x303   : > { %v708_v1 = vsel %vm653_vm2, %v707_v63, -inf  ;;  %v1127_v62 = vsel %vm724_vm3, %v769_v59, 0  ;;  %v2033_v59 = vld [vmem:[%s2757_s10 + $0x8] sm:$0xf] }
 0x304   : > { %709 = vmax.xlane.f32.xlu1 %v708_v1 }
 0x307   : > { %v829_v2 = vpop.f32.mrb[8].mxu1 }
 0x308   : > { %v2171_v3 = vpop.f32.mrb[9].mxu1  ;;  %v830_v40 = vadd.f32 %v1977_v38, %v829_v2  ;;  %v2321_v2 = vld [vmem:[%s2753_s6 + $0x28] sm:$0xff]   ;;  %v2027_v38 = vld [vmem:[%s2756_s9 + $0x2] ss:$0 sm:$0xff] }
 0x309   : > { %v832_v4 = vpop.f32.mrb[10].mxu1 }
 0x30a   : > { %v2172_v5 = vpop.f32.mrb[11].mxu1  ;;  %v965_v41 = vpack.c.bf16 %v830_v40, %v830_v40  ;;  %v2322_v4 = vld [vmem:[%s2751_s4 + $0x20] sm:$0xff]  }
 0x30f   : > { %v959_v7 = vpop.f32.mrb[12].mxu1 }
 0x310   : > { %v960_v8 = vadd.f32 %v1995_v6, %v959_v7  ;;  %v2187_v10 = vpop.f32.mrb[13].mxu1 }
 0x311   : > { %v962_v11 = vpop.f32.mrb[14].mxu1  ;;  %v2323_v10 = vld [vmem:[%s2751_s4 + $0x28] sm:$0xff]  }
 0x312   : > { %v1027_v12 = vpack.c.bf16 %v960_v8, %v960_v8  ;;  %v2188_v13 = vpop.f32.mrb[15].mxu1 }
 0x314   : > { %v1032_v14 = vsel %vm724_vm3, %v1027_v12, 0  ;;  %v2324_v12 = vld [vmem:[%s2755_s8 + $0x20] sm:$0xff]  }
 0x315   : > { %2196 = vmatpush3.bf16.msra.mxu1 %v1032_v14 }
 0x316   : > { %2207 = vmatprep.subr.bf16.mxu1 %v2358_v9 }
 0x391   : > { %v710_v15 = vpop.xlane.xlu1 %709 }
 0x392   : > { %v711_v16 = vsub.f32 %v707_v63, %v710_v15  ;;  %v2320_v63 = vld [vmem:[%s2753_s6 + $0x20] sm:$0xff]  }
 0x394   : > { %v712_v17 = vmul.f32 1.442695, %v711_v16  ;;  %v2325_v16 = vld [vmem:[%s2755_s8 + $0x28] sm:$0xff]  }
 0x396   : > { %2334 = vpow2.f32 %v712_v17  ;;  %v2018_v17 = vld [vmem:[%s2754_s7 + $0x2] ss:$0 sm:$0xff] }
 0x3a0   : > { %v2335_v18 = vpop.eup %2334 }
 0x3a1   : > { %v714_v19 = vsel %vm653_vm2, %v2335_v18, 0.0 }
 0x3a2   : > { %715 = vadd.xlane.f32.xlu1 %v714_v19 }
 0x42f   : > { %v716_v20 = vpop.xlane.xlu1 %715 }
 0x430   : > { %2336 = vrcp.f32 %v716_v20 }
 0x43a   : > { %v2337_v21 = vpop.eup %2336 }
 0x43b   : > { %v718_v23 = vmul.f32 %v2337_v21, %v2335_v18 }
 0x43d   : > { %v719_v25 = vpack.c.bf16 %v718_v23, %v718_v23 }
 0x43f   : > { %2162 = vmatmul.mubr.msk.bf16.vlgmr.msra.gmra.mrb[8].mxu0 %vm653_vm2, %v719_v25 }
 0x440   : > { %2174 = vmatpush3.bf16.msra.mxu0 %v2318_v24  ;;  %2177 = vmatprep.mubr.msk.bf16.mxu0 %vm2359_vm1, %v2358_v9 }
 0x441   : > { %2175 = vmatprep.subr.bf16.mxu0 %v2358_v9 }
 0x444   : > { %2176 = vmatpush3.bf16.msra.mxu0 %v2319_v26 }
 0x445   : > { %2189 = vmatprep.subr.bf16.mxu0 %v2358_v9 }
 0x447   : > { %2178 = vmatmul.mubr.msk.bf16.vlgmr.msra.gmra.mrb[12].mxu0 %vm427_vm0, %v2479_v22 }
 0x448   : > { %2191 = vmatprep.mubr.msk.bf16.mxu0 %vm2359_vm1, %v2358_v9 }
 0x512   : > { %v762_v27 = vpop.f32.mrb[8].mxu0 }
 0x513   : > { %v2163_v28 = vpop.f32.mrb[9].mxu0  ;;  %v768_v1 = vpack.c.bf16 %v762_v27, %v762_v27 }
 0x514   : > { %v765_v29 = vpop.f32.mrb[10].mxu0 }
 0x515   : > { %v2164_v30 = vpop.f32.mrb[11].mxu0 }
 0x51a   : > { %v894_v32 = vpop.f32.mrb[12].mxu0 }
 0x51b   : > { %v895_v33 = vadd.f32 %v1986_v31, %v894_v32  ;;  %v2179_v34 = vpop.f32.mrb[13].mxu0  ;;  %v2009_v31 = vld [vmem:[%s2752_s5 + $0x2] ss:$0 sm:$0xff] }
 0x51c   : > { %v897_v35 = vpop.f32.mrb[14].mxu0 }
 0x51d   : > { %v966_v36 = vpack.c.bf16 %v895_v33, %v895_v33  ;;  %v2180_v37 = vpop.f32.mrb[15].mxu0 }
 0x51f   : > { %v971_v39 = vsel %vm653_vm2, %v966_v36, 0 }
 0x520   : > { %2190 = vmatpush3.bf16.xpose.msra.mxu0 %v971_v39 }
 0x521   : > { %2201 = vmatprep.subr.bf16.mxu0 %v2358_v9 }
 0x527   : > { %2192 = vmatmul.mubr.msk.bf16.vlgmr.msra.gmra.mrb[16].mxu0 %vm653_vm2, %v965_v41 }
 0x528   : > { %2203 = vmatprep.mubr.msk.bf16.mxu0 %vm2359_vm1, %v2358_v9  ;;  %2202 = vmatpush3.bf16.msra.mxu0 %v1081_v55 }
 0x529   : > { %2213 = vmatprep.subr.bf16.mxu0 %v2358_v9 }
 0x5fa   : > { %v1007_v42 = vpop.f32.mrb[16].mxu0 }
 0x5fb   : > { %v1013_v43 = vmul.f32 0.17677669, %v1007_v42  ;;  %v2193_v44 = vpop.f32.mrb[17].mxu0 }
 0x5fc   : > { %v1010_v45 = vpop.f32.mrb[18].mxu0 }
 0x5fd   : > { %v2194_v46 = vpop.f32.mrb[19].mxu0  ;;  %v1014_v47 = vsel %vm706_vm5, -100000.0, %v1013_v43 }
 0x5fe   : > { %v1015_v48 = vsel %vm653_vm2, %v1014_v47, -inf }
 0x5ff   : > { %1016 = vmax.xlane.f32.xlu0 %v1015_v48 }
 0x68c   : > { %v1017_v49 = vpop.xlane.xlu0 %1016 }
 0x68d   : > { %v1018_v50 = vsub.f32 %v1014_v47, %v1017_v49 }
 0x68f   : > { %v1019_v51 = vmul.f32 1.442695, %v1018_v50 }
 0x691   : > { %2338 = vpow2.f32 %v1019_v51 }
 0x69b   : > { %v2339_v52 = vpop.eup %2338 }
 0x69c   : > { %v1021_v53 = vsel %vm653_vm2, %v2339_v52, 0.0 }
 0x69d   : > { %1022 = vadd.xlane.f32.xlu1 %v1021_v53 }
 0x72a   : > { %v1023_v56 = vpop.xlane.xlu1 %1022 }
 0x72b   : > { %2340 = vrcp.f32 %v1023_v56 }
 0x735   : > { %v2341_v58 = vpop.eup %2340 }
 0x736   : > { %v1025_v60 = vmul.f32 %v2341_v58, %v2339_v52 }
 0x738   : > { %v1026_v61 = vpack.c.bf16 %v1025_v60, %v1025_v60  ;;  %v1480_v60 = vsel %vm724_vm3, %v2033_v59, 0 }
 0x73a   : > { %2198 = vmatmul.mubr.msk.bf16.vlgmr.msra.gmra.mrb[16].mxu1 %vm653_vm2, %v1026_v61 }
 0x73b   : > { %2208 = vmatpush3.bf16.msra.mxu1 %v1127_v62  ;;  %2209 = vmatprep.mubr.msk.bf16.mxu1 %vm2359_vm1, %v2358_v9 }
 0x73c   : > { %2221 = vmatprep.subr.bf16.mxu1 %v2358_v9 }
 0x742   : > { %2210 = vmatmul.mubr.msk.bf16.vlgmr.msra.gmra.mrb[20].mxu1 %vm653_vm2, %v768_v1  ;;  %v2326_v1 = vld [vmem:[%s2751_s4 + $0x30] sm:$0xff]  }
 0x743   : > { %2222 = vmatpush3.bf16.msra.mxu1 %v2320_v63  ;;  %2225 = vmatprep.mubr.msk.bf16.mxu1 %vm2359_vm1, %v2358_v9 }
 0x744   : > { %2223 = vmatprep.subr.bf16.mxu1 %v2358_v9 }
 0x747   : > { %2224 = vmatpush3.bf16.msra.mxu1 %v2321_v2 }
 0x748   : > { %2237 = vmatprep.subr.bf16.mxu1 %v2358_v9 }
 0x74a   : > { %2226 = vmatmul.mubr.msk.bf16.vlgmr.msra.gmra.mrb[24].mxu1 %vm427_vm0, %v2479_v22 }
 0x74b   : > { %2239 = vmatprep.mubr.msk.bf16.mxu1 %vm2359_vm1, %v2358_v9 }
 0x80d   : > { %v1068_v3 = vpop.f32.mrb[16].mxu1 }
 0x80e   : > { %v1074_v5 = vpack.c.bf16 %v1068_v3, %v1068_v3  ;;  %v2199_v6 = vpop.f32.mrb[17].mxu1  ;;  %v2327_v3 = vld [vmem:[%s2751_s4 + $0x38] sm:$0xff]  }
 0x80f   : > { %v1071_v7 = vpop.f32.mrb[18].mxu1 }
 0x810   : > { %v2200_v8 = vpop.f32.mrb[19].mxu1  ;;  %2204 = vmatmul.mubr.msk.bf16.vlgmr.msra.gmra.mrb[20].mxu0 %vm653_vm2, %v1074_v5  ;;  %v2329_v5 = vld [vmem:[%s2755_s8 + $0x38] sm:$0xff]   ;;  %v2330_v7 = vld [vmem:[%s2753_s6 + $0x30] sm:$0xff]  }
 0x811   : > { %2214 = vmatpush3.bf16.msra.mxu0 %v2322_v4  ;;  %2217 = vmatprep.mubr.msk.bf16.mxu0 %vm2359_vm1, %v2358_v9  ;;  %v2328_v4 = vld [vmem:[%s2755_s8 + $0x30] sm:$0xff]  }
 0x812   : > { %2215 = vmatprep.subr.bf16.mxu0 %v2358_v9 }
 0x815   : > { %v1163_v11 = vpop.f32.mrb[20].mxu1  ;;  %2216 = vmatpush3.bf16.msra.mxu0 %v2323_v10 }
 0x816   : > { %v2211_v13 = vpop.f32.mrb[21].mxu1  ;;  %2229 = vmatprep.subr.bf16.mxu0 %v2358_v9 }
 0x817   : > { %v1166_v14 = vpop.f32.mrb[22].mxu1  ;;  %v2331_v13 = vld [vmem:[%s2753_s6 + $0x38] sm:$0xff]  }
 0x818   : > { %v2212_v15 = vpop.f32.mrb[23].mxu1  ;;  %2218 = vmatmul.mubr.msk.bf16.vlgmr.msra.gmra.mrb[24].mxu0 %vm427_vm0, %v2479_v22 }
 0x819   : > { %2230 = vmatpush3.bf16.msra.mxu0 %v2324_v12  ;;  %2233 = vmatprep.mubr.msk.bf16.mxu0 %vm2359_vm1, %v2358_v9 }
 0x81a   : > { %2231 = vmatprep.subr.bf16.mxu0 %v2358_v9 }
 0x81d   : > { %v1293_v18 = vpop.f32.mrb[24].mxu1  ;;  %2232 = vmatpush3.bf16.msra.mxu0 %v2325_v16 }
 0x81e   : > { %v1294_v19 = vadd.f32 %v2018_v17, %v1293_v18  ;;  %v2227_v20 = vpop.f32.mrb[25].mxu1  ;;  %2243 = vmatprep.subr.bf16.mxu0 %v2358_v9  ;;  %v2058_v18 = vld [vmem:[%s2756_s9 + $0x3] ss:$0 sm:$0xff] }
 0x81f   : > { %v1296_v21 = vpop.f32.mrb[26].mxu1 }
 0x820   : > { %v1365_v23 = vpack.c.bf16 %v1294_v19, %v1294_v19  ;;  %v2228_v24 = vpop.f32.mrb[27].mxu1  ;;  %2234 = vmatmul.mubr.msk.bf16.vlgmr.msra.gmra.mrb[28].mxu0 %vm427_vm0, %v2479_v22 }
 0x821   : > { %2245 = vmatprep.mubr.msk.bf16.mxu0 %vm2359_vm1, %v2358_v9 }
 0x822   : > { %v1370_v25 = vsel %vm653_vm2, %v1365_v23, 0 }
 0x823   : > { %2238 = vmatpush3.bf16.xpose.msra.mxu1 %v1370_v25 }
 0x824   : > { %2249 = vmatprep.subr.bf16.mxu1 %v2358_v9 }
 0x8e3   : > { %v1117_v26 = vpop.f32.mrb[20].mxu0 }
 0x8e4   : > { %v2644_v27 = vadd.f32 %v1163_v11, %v1117_v26  ;;  %v2205_v28 = vpop.f32.mrb[21].mxu0 }
 0x8e5   : > { %v1120_v29 = vpop.f32.mrb[22].mxu0 }
 0x8e6   : > { %v2206_v30 = vpop.f32.mrb[23].mxu0 }
 0x8eb   : > { %v1228_v32 = vpop.f32.mrb[24].mxu0 }
 0x8ec   : > { %v1229_v33 = vadd.f32 %v2009_v31, %v1228_v32  ;;  %v2219_v34 = vpop.f32.mrb[25].mxu0  ;;  %v2049_v32 = vld [vmem:[%s2754_s7 + $0x3] ss:$0 sm:$0xff] }
 0x8ed   : > { %v1231_v35 = vpop.f32.mrb[26].mxu0 }
 0x8ee   : > { %v1364_v36 = vpack.c.bf16 %v1229_v33, %v1229_v33  ;;  %v2220_v37 = vpop.f32.mrb[27].mxu0 }
 0x8f0   : > { %2240 = vmatmul.mubr.msk.bf16.vlgmr.msra.gmra.mrb[28].mxu1 %vm653_vm2, %v1364_v36 }
 0x8f1   : > { %2251 = vmatprep.mubr.msk.bf16.mxu1 %vm2359_vm1, %v2358_v9  ;;  %2250 = vmatpush3.bf16.msra.mxu1 %v1480_v60 }
 0x8f2   : > { %2263 = vmatprep.subr.bf16.mxu1 %v2358_v9 }
 0x8f3   : > { %v1358_v39 = vpop.f32.mrb[28].mxu0 }
 0x8f4   : > { %v1359_v40 = vadd.f32 %v2027_v38, %v1358_v39  ;;  %v2235_v41 = vpop.f32.mrb[29].mxu0  ;;  %v2040_v39 = vld [vmem:[%s2752_s5 + $0x3] ss:$0 sm:$0xff] }
 0x8f5   : > { %v1361_v42 = vpop.f32.mrb[30].mxu0 }
 0x8f6   : > { %v1426_v43 = vpack.c.bf16 %v1359_v40, %v1359_v40  ;;  %v2236_v44 = vpop.f32.mrb[31].mxu0 }
 0x8f8   : > { %v1431_v45 = vsel %vm724_vm3, %v1426_v43, 0 }
 0x8f9   : > { %2244 = vmatpush3.bf16.msra.mxu0 %v1431_v45 }
 0x8fa   : > { %2255 = vmatprep.subr.bf16.mxu0 %v2358_v9 }
 0x9c3   : > { %v1406_v46 = vpop.f32.mrb[28].mxu1 }
 0x9c4   : > { %v1412_v47 = vmul.f32 0.17677669, %v1406_v46  ;;  %v2241_v48 = vpop.f32.mrb[29].mxu1 }
 0x9c5   : > { %v1409_v49 = vpop.f32.mrb[30].mxu1 }
 0x9c6   : > { %v2242_v50 = vpop.f32.mrb[31].mxu1  ;;  %v1413_v51 = vsel %vm706_vm5, -100000.0, %v1412_v47 }
 0x9c7   : > { %v1414_v52 = vsel %vm653_vm2, %v1413_v51, -inf }
 0x9c8   : > { %1415 = vmax.xlane.f32.xlu0 %v1414_v52 }
 0xa55   : > { %v1416_v53 = vpop.xlane.xlu0 %1415 }
 0xa56   : > { %v1417_v54 = vsub.f32 %v1413_v51, %v1416_v53 }
 0xa58   : > { %v1418_v55 = vmul.f32 1.442695, %v1417_v54 }
 0xa5a   : > { %2342 = vpow2.f32 %v1418_v55 }
 0xa64   : > { %v2343_v56 = vpop.eup %2342 }
 0xa65   : > { %v1420_v58 = vsel %vm653_vm2, %v2343_v56, 0.0 }
 0xa66   : > { %1421 = vadd.xlane.f32.xlu1 %v1420_v58 }
 0xaf3   : > { %v1422_v61 = vpop.xlane.xlu1 %1421 }
 0xaf4   : > { %2344 = vrcp.f32 %v1422_v61 }
 0xafe   : > { %v2345_v62 = vpop.eup %2344 }
 0xaff   : > { %v1424_v63 = vmul.f32 %v2345_v62, %v2343_v56 }
 0xb01   : > { %v1425_v2 = vpack.c.bf16 %v1424_v63, %v1424_v63 }
 0xb03   : > { %2246 = vmatmul.mubr.msk.bf16.vlgmr.msra.gmra.mrb[32].mxu0 %vm653_vm2, %v1425_v2 }
 0xb04   : > { %2256 = vmatpush3.bf16.msra.mxu0 %v2326_v1  ;;  %2259 = vmatprep.mubr.msk.bf16.mxu0 %vm2359_vm1, %v2358_v9 }
 0xb05   : > { %2257 = vmatprep.subr.bf16.mxu0 %v2358_v9 }
 0xb08   : > { %2258 = vmatpush3.bf16.msra.mxu0 %v2327_v3 }
 0xb09   : > { %2271 = vmatprep.subr.bf16.mxu0 %v2358_v9 }
 0xb0b   : > { %2260 = vmatmul.mubr.msk.bf16.vlgmr.msra.gmra.mrb[36].mxu0 %vm427_vm0, %v2479_v22 }
 0xb0c   : > { %2272 = vmatpush3.bf16.msra.mxu0 %v2328_v4  ;;  %2275 = vmatprep.mubr.msk.bf16.mxu0 %vm2359_vm1, %v2358_v9  ;;  %v2066_v4 = vld [vmem:[%s2758_s11] ss:$0 sm:$0xff] }
 0xb0d   : > { %2273 = vmatprep.subr.bf16.mxu0 %v2358_v9 }
 0xb10   : > { %2274 = vmatpush3.bf16.msra.mxu0 %v2329_v5 }
 0xb11   : > { %2285 = vmatprep.subr.bf16.mxu0 %v2358_v9 }
 0xb13   : > { %2276 = vmatmul.mubr.msk.bf16.vlgmr.msra.gmra.mrb[40].mxu0 %vm427_vm0, %v2479_v22 }
 0xb14   : > { %2287 = vmatprep.mubr.msk.bf16.mxu0 %vm2359_vm1, %v2358_v9 }
 0xbd6   : > { %v1467_v6 = vpop.f32.mrb[32].mxu0 }
 0xbd7   : > { %v1473_v8 = vpack.c.bf16 %v1467_v6, %v1467_v6  ;;  %v2247_v10 = vpop.f32.mrb[33].mxu0 }
 0xbd8   : > { %v1470_v11 = vpop.f32.mrb[34].mxu0 }
 0xbd9   : > { %v2248_v12 = vpop.f32.mrb[35].mxu0  ;;  %2252 = vmatmul.mubr.msk.bf16.vlgmr.msra.gmra.mrb[32].mxu1 %vm653_vm2, %v1473_v8 }
 0xbda   : > { %2264 = vmatpush3.bf16.msra.mxu1 %v2330_v7  ;;  %2267 = vmatprep.mubr.msk.bf16.mxu1 %vm2359_vm1, %v2358_v9 }
 0xbdb   : > { %2265 = vmatprep.subr.bf16.mxu1 %v2358_v9 }
 0xbde   : > { %v1582_v14 = vpop.f32.mrb[36].mxu0  ;;  %2266 = vmatpush3.bf16.msra.mxu1 %v2331_v13 }
 0xbdf   : > { %v2261_v15 = vpop.f32.mrb[37].mxu0  ;;  %2279 = vmatprep.subr.bf16.mxu1 %v2358_v9 }
 0xbe0   : > { %v1585_v16 = vpop.f32.mrb[38].mxu0 }
 0xbe1   : > { %v2262_v17 = vpop.f32.mrb[39].mxu0  ;;  %2268 = vmatmul.mubr.msk.bf16.vlgmr.msra.gmra.mrb[36].mxu1 %vm427_vm0, %v2479_v22 }
 0xbe2   : > { %2281 = vmatprep.mubr.msk.bf16.mxu1 %vm2359_vm1, %v2358_v9 }
 0xbe6   : > { %v1712_v19 = vpop.f32.mrb[40].mxu0 }
 0xbe7   : > { %v1713_v20 = vadd.f32 %v2058_v18, %v1712_v19  ;;  %v2277_v21 = vpop.f32.mrb[41].mxu0 }
 0xbe8   : > { %v1715_v23 = vpop.f32.mrb[42].mxu0 }
 0xbe9   : > { %v1780_v24 = vpack.c.bf16 %v1713_v20, %v1713_v20  ;;  %v2278_v25 = vpop.f32.mrb[43].mxu0 }
 0xbeb   : > { %v1785_v26 = vsel %vm724_vm3, %v1780_v24, 0 }
 0xbec   : > { %2286 = vmatpush3.bf16.msra.mxu0 %v1785_v26 }
 0xcac   : > { %v1516_v28 = vpop.f32.mrb[32].mxu1 }
 0xcad   : > { %v1522_v29 = vadd.f32 %v1516_v28, %v2644_v27  ;;  %v2253_v22 = vpop.f32.mrb[33].mxu1  ;;  %v1583_v27 = vadd.f32 %v2040_v39, %v1582_v14 }
 0xcae   : > { %v1519_v30 = vpop.f32.mrb[34].mxu1 }
 0xcaf   : > { %v2254_v31 = vpop.f32.mrb[35].mxu1  ;;  %v1718_v41 = vpack.c.bf16 %v1583_v27, %v1583_v27 }
 0xcb4   : > { %v1647_v33 = vpop.f32.mrb[36].mxu1 }
 0xcb5   : > { %v1648_v34 = vadd.f32 %v2049_v32, %v1647_v33  ;;  %v2269_v35 = vpop.f32.mrb[37].mxu1 }
 0xcb6   : > { %v1650_v36 = vpop.f32.mrb[38].mxu1 }
 0xcb7   : > { %v1719_v37 = vpack.c.bf16 %v1648_v34, %v1648_v34  ;;  %v2270_v38 = vpop.f32.mrb[39].mxu1 }
 0xcb9   : > { %v1724_v40 = vsel %vm653_vm2, %v1719_v37, 0 }
 0xcba   : > { %2280 = vmatpush3.bf16.xpose.msra.mxu1 %v1724_v40 }
 0xcbb   : > { %2291 = vmatprep.subr.bf16.mxu1 %v2358_v9 }
 0xcc1   : > { %2282 = vmatmul.mubr.msk.bf16.vlgmr.msra.gmra.mrb[40].mxu1 %vm653_vm2, %v1718_v41 }
 0xcc2   : > { %2293 = vmatprep.mubr.msk.bf16.mxu1 %vm2359_vm1, %v2358_v9  ;;  %v2064_v9 = vld [vmem:[%s2757_s10 + $0xc] sm:$0xf] }
 0xcc3   : > { %v1834_v54 = vsel %vm724_vm3, %v2064_v9, 0 }
 0xcc4   : > { %2292 = vmatpush3.bf16.msra.mxu1 %v1834_v54 }
 0xd94   : > { %v1760_v42 = vpop.f32.mrb[40].mxu1 }
 0xd95   : > { %v1766_v43 = vmul.f32 0.17677669, %v1760_v42  ;;  %v2283_v44 = vpop.f32.mrb[41].mxu1 }
 0xd96   : > { %v1763_v45 = vpop.f32.mrb[42].mxu1 }
 0xd97   : > { %v2284_v46 = vpop.f32.mrb[43].mxu1  ;;  %v1767_v47 = vsel %vm706_vm5, -100000.0, %v1766_v43 }
 0xd98   : > { %v1768_v48 = vsel %vm653_vm2, %v1767_v47, -inf }
 0xd99   : > { %1769 = vmax.xlane.f32.xlu0 %v1768_v48 }
 0xe26   : > { %v1770_v49 = vpop.xlane.xlu0 %1769 }
 0xe27   : > { %v1771_v50 = vsub.f32 %v1767_v47, %v1770_v49 }
 0xe29   : > { %v1772_v51 = vmul.f32 1.442695, %v1771_v50 }
 0xe2b   : > { %2346 = vpow2.f32 %v1772_v51 }
 0xe35   : > { %v2347_v52 = vpop.eup %2346 }
 0xe36   : > { %v1774_v53 = vsel %vm653_vm2, %v2347_v52, 0.0 }
 0xe37   : > { %1775 = vadd.xlane.f32.xlu1 %v1774_v53 }
 0xec4   : > { %v1776_v57 = vpop.xlane.xlu1 %1775 }
 0xec5   : > { %2348 = vrcp.f32 %v1776_v57 }
 0xecf   : > { %v2349_v55 = vpop.eup %2348 }
 0xed0   : > { %v1778_v56 = vmul.f32 %v2349_v55, %v2347_v52 }
 0xed2   : > { %v1779_v58 = vpack.c.bf16 %v1778_v56, %v1778_v56 }
 0xed4   : > { %2288 = vmatmul.mubr.msk.bf16.vlgmr.msra.gmra.mrb[44].mxu0 %vm653_vm2, %v1779_v58 }
 0xfa7   : > { %v1821_v59 = vpop.f32.mrb[44].mxu0 }
 0xfa8   : > { %v1827_v60 = vpack.c.bf16 %v1821_v59, %v1821_v59  ;;  %v2289_v61 = vpop.f32.mrb[45].mxu0 }
 0xfa9   : > { %v1824_v62 = vpop.f32.mrb[46].mxu0 }
 0xfaa   : > { %v2290_v63 = vpop.f32.mrb[47].mxu0  ;;  %2294 = vmatmul.mubr.msk.bf16.vlgmr.msra.gmra.mrb[44].mxu1 %vm653_vm2, %v1827_v60 }
0x107d   : > { %v1870_v1 = vpop.f32.mrb[44].mxu1 }
0x107e   : > { %v1876_v2 = vadd.f32 %v1870_v1, %v1522_v29  ;;  %v2295_v3 = vpop.f32.mrb[45].mxu1 }
0x107f   : > { %v1873_v5 = vpop.f32.mrb[46].mxu1 }
0x1080   : > { %v1877_v6 = vadd.f32 %v1876_v2, %v2442_v0  ;;  %v2296_v7 = vpop.f32.mrb[47].mxu1 }
0x1082   : > { %v1885_v8 = vadd.f32 %v2066_v4, %v1877_v6 }
0x1084   : > { %1886 = vst.msk [vmem:[%s422_s28] sm:$0xff] %vm427_vm0, %v1885_v8 }
0x1085 PF: > { %s22_s21 = sadd.s32 1, %s2356_s21  }
0x1086   : > { %p19_p4 = scmp.ge.s32.totalorder %s22_s21, 4  }
0x1088   :  { %21 = sbr.rel (!%p19_p4) target bundleno = 1 (0x1), region = 122 }

// kernel: transformer_forward.21
= control target key start
LH: loop header
LB: loop body
LE: loop exit
PB: predicated region body
PF: predicated region fallthrough
CT: control target
= control target key end

     0   :  { %vm31_vm0 = vcmask 261120   ;;  %v326_v15 = vmov 0.0   ;;  %vm327_vm1 = vmmov 0   ;;  %vm235_vm2 = vcmask 523264   ;;  %s426_s0 = inlined_call_operand.vmem [shape: f32[16,32], index: 0, kind: input, shape index: {}]   ;;  %s427_s3 = inlined_call_operand.vmem [shape: bf16[32,32], index: 3, kind: input, shape index: {}]   ;;  %s428_s5 = inlined_call_operand.vmem [shape: bf16[64,32], index: 5, kind: input, shape index: {}]   ;;  %s429_s1 = inlined_call_operand.vmem [shape: f32[1,32], index: 1, kind: input, shape index: {}]   ;;  %s430_s2 = inlined_call_operand.vmem [shape: f32[1,32], index: 2, kind: input, shape index: {}]   ;;  %s431_s4 = inlined_call_operand.vmem [shape: f32[1,32], index: 4, kind: input, shape index: {}]   ;;  %s432_s6 = inlined_call_operand.vmem [shape: f32[1,64], index: 6, kind: input, shape index: {}]   ;;  %s433_s7 = inlined_call_operand.vmem [shape: f32[16,64], index: 7, kind: output, shape index: {}]  }
   0x1   :  { %v27_v0 = vld [vmem:[%s426_s0] sm:$0xff]  ;;  %v28_v1 = vld [vmem:[%s426_s0 + $0x8] sm:$0xff]  ;;  %286 = vmatprep.subr.bf16.mxu0 %v326_v15  ;;  %294 = vmatprep.subr.bf16.mxu1 %v326_v15  ;;  %v312_v21 = vld [vmem:[%s428_s5 + $0x10] sm:$0xff]  }
   0x2   :  { %v32_v2 = vsel %vm31_vm0, %v27_v0, 0.0  ;;  %v35_v3 = vsel %vm31_vm0, %v28_v1, 0.0  ;;  %v308_v14 = vld [vmem:[%s427_s3] sm:$0xff]   ;;  %v309_v16 = vld [vmem:[%s427_s3 + $0x8] sm:$0xff]   ;;  %290 = vmatprep.mubr.msk.bf16.mxu0 %vm327_vm1, %v326_v15  ;;  %302 = vmatprep.mubr.msk.bf16.mxu1 %vm327_vm1, %v326_v15  ;;  %v189_v22 = vsel %vm31_vm0, %v312_v21, 0  ;;  %v313_v40 = vld [vmem:[%s428_s5 + $0x18] sm:$0xff]  }
   0x3   :  { %33 = vadd.xlane.f32.xlu0 %v32_v2  ;;  %287 = vmatpush3.bf16.msra.mxu0 %v308_v14  ;;  %v310_v17 = vld [vmem:[%s428_s5] sm:$0xff]   ;;  %v311_v19 = vld [vmem:[%s428_s5 + $0x8] sm:$0xff]   ;;  %v192_v41 = vsel %vm31_vm0, %v313_v40, 0 }
   0x4   :  { %288 = vmatprep.subr.bf16.mxu0 %v326_v15  ;;  %v183_v18 = vsel %vm31_vm0, %v310_v17, 0  ;;  %v186_v20 = vsel %vm31_vm0, %v311_v19, 0  ;;  %v266_v31 = vld [vmem:[%s429_s1] ss:$0 sm:$0xff] }
   0x5   :  { %295 = vmatpush3.bf16.xpose.msra.mxu1 %v183_v18  ;;  %v267_v35 = vld [vmem:[%s430_s2] ss:$0 sm:$0xff] }
   0x6   :  { %296 = vmatprep.subr.bf16.mxu1 %v326_v15  ;;  %v268_v42 = vld [vmem:[%s431_s4] ss:$0 sm:$0xff] }
   0x7   :  { %36 = vadd.xlane.f32.xlu0 %v35_v3  ;;  %289 = vmatpush3.bf16.msra.mxu0 %v309_v16  ;;  %v272_v50 = vld [vmem:[%s432_s6] ss:$0 sm:$0xff] }
   0xd   :  { %297 = vmatpush3.bf16.xpose.msra.mxu1 %v186_v20 }
   0xe   :  { %298 = vmatprep.subr.bf16.mxu1 %v326_v15 }
  0x15   :  { %299 = vmatpush3.bf16.xpose.msra.mxu1 %v189_v22 }
  0x16   :  { %300 = vmatprep.subr.bf16.mxu1 %v326_v15 }
  0x1d   :  { %301 = vmatpush3.bf16.xpose.msra.mxu1 %v192_v41 }
  0x90   :  { %v34_v4 = vpop.xlane.xlu0 %33 }
  0x91   :  { %v39_v5 = vmul.f32 0.03125, %v34_v4 }
  0x93   :  { %v41_v6 = vsub.f32 %v27_v0, %v39_v5 }
  0x94   :  { %v37_v7 = vpop.xlane.xlu0 %36 }
  0x95   :  { %v40_v8 = vmul.f32 0.03125, %v37_v7  ;;  %v43_v9 = vmul.f32 %v41_v6, %v41_v6 }
  0x97   :  { %v42_v10 = vsub.f32 %v28_v1, %v40_v8  ;;  %v45_v11 = vsel %vm31_vm0, %v43_v9, 0.0 }
  0x98   :  { %46 = vadd.xlane.f32.xlu1 %v45_v11 }
  0x99   :  { %v44_v12 = vmul.f32 %v42_v10, %v42_v10 }
  0x9b   :  { %v48_v13 = vsel %vm31_vm0, %v44_v12, 0.0 }
  0x9c   :  { %49 = vadd.xlane.f32.xlu1 %v48_v13 }
 0x125   :  { %v47_v23 = vpop.xlane.xlu1 %46 }
 0x126   :  { %v51_v24 = vmul.f32 0.03125, %v47_v23 }
 0x128   :  { %v53_v25 = vadd.f32 1e-05, %v51_v24 }
 0x129   :  { %v50_v26 = vpop.xlane.xlu1 %49 }
 0x12a   :  { %314 = vrsqrt.f32 %v53_v25  ;;  %v52_v27 = vmul.f32 0.03125, %v50_v26 }
 0x12c   :  { %v54_v28 = vadd.f32 1e-05, %v52_v27 }
 0x12e   :  { %316 = vrsqrt.f32 %v54_v28 }
 0x134   :  { %v315_v29 = vpop.eup %314 }
 0x135   :  { %v57_v30 = vmul.f32 %v315_v29, %v41_v6 }
 0x137   :  { %v65_v34 = vmul.f32 %v266_v31, %v57_v30 }
 0x138   :  { %v317_v32 = vpop.eup %316 }
 0x139   :  { %v58_v33 = vmul.f32 %v317_v32, %v42_v10  ;;  %v73_v37 = vadd.f32 %v267_v35, %v65_v34 }
 0x13b   :  { %v66_v36 = vmul.f32 %v266_v31, %v58_v33 }
 0x13d   :  { %v74_v38 = vadd.f32 %v267_v35, %v66_v36 }
 0x13f   :  { %v75_v39 = vpack.c.bf16 %v74_v38, %v73_v37 }
 0x141   :  { %291 = vmatmul.mubr.msk.bf16.vlgmr.msra.gmra.mrb[0].mxu0 %vm31_vm0, %v75_v39 }
 0x214   :  { %v136_v43 = vpop.f32.mrb[0].mxu0 }
 0x215   :  { %v292_v44 = vpop.f32.mrb[1].mxu0  ;;  %v137_v46 = vadd.f32 %v268_v42, %v136_v43 }
 0x216   :  { %v139_v45 = vpop.f32.mrb[2].mxu0 }
 0x217   :  { %v140_v47 = vadd.f32 %v268_v42, %v139_v45  ;;  %v293_v48 = vpop.f32.mrb[3].mxu0 }
 0x219   :  { %v143_v49 = vpack.c.bf16 %v140_v47, %v137_v46 }
 0x21b   :  { %303 = vmatmul.mubr.msk.bf16.vlgmr.msra.gmra.mrb[0].mxu1 %vm31_vm0, %v143_v49 }
 0x2ee   :  { %v228_v51 = vpop.f32.mrb[0].mxu1 }
 0x2ef   :  { %v229_v52 = vadd.f32 %v272_v50, %v228_v51  ;;  %v304_v53 = vpop.f32.mrb[1].mxu1 }
 0x2f0   :  { %v231_v54 = vpop.f32.mrb[2].mxu1 }
 0x2f1   :  { %v232_v55 = vadd.f32 %v272_v50, %v231_v54  ;;  %v305_v56 = vpop.f32.mrb[3].mxu1  ;;  %v236_v57 = vsel %vm235_vm2, %v229_v52, -inf }
 0x2f2   :  { %237 = vmax.xlane.f32.xlu0 %v236_v57 }
 0x2f3   :  { %v239_v58 = vsel %vm235_vm2, %v232_v55, -inf }
 0x2f4   :  { %240 = vmax.xlane.f32.xlu1 %v239_v58 }
 0x37f   :  { %v238_v59 = vpop.xlane.xlu0 %237 }
 0x380   :  { %v242_v60 = vsub.f32 %v229_v52, %v238_v59 }
 0x381   :  { %v241_v61 = vpop.xlane.xlu1 %240 }
 0x382   :  { %v244_v62 = vmul.f32 1.442695, %v242_v60  ;;  %v243_v63 = vsub.f32 %v232_v55, %v241_v61 }
 0x384   :  { %318 = vpow2.f32 %v244_v62  ;;  %v246_v0 = vmul.f32 1.442695, %v243_v63 }
 0x386   :  { %320 = vpow2.f32 %v246_v0 }
 0x38e   :  { %v319_v1 = vpop.eup %318 }
 0x38f   :  { %v248_v2 = vsel %vm235_vm2, %v319_v1, 0.0 }
 0x390   :  { %v321_v3 = vpop.eup %320  ;;  %249 = vadd.xlane.f32.xlu0 %v248_v2 }
 0x391   :  { %v251_v4 = vsel %vm235_vm2, %v321_v3, 0.0 }
 0x392   :  { %252 = vadd.xlane.f32.xlu1 %v251_v4 }
 0x41d   :  { %v250_v5 = vpop.xlane.xlu0 %249 }
 0x41e   :  { %322 = vlog2.f32 %v250_v5 }
 0x41f   :  { %v253_v6 = vpop.xlane.xlu1 %252 }
 0x420   :  { %324 = vlog2.f32 %v253_v6 }
 0x428   :  { %v323_v7 = vpop.eup %322 }
 0x429   :  { %v255_v8 = vmul.f32 0.6931472, %v323_v7 }
 0x42a   :  { %v325_v9 = vpop.eup %324 }
 0x42b   :  { %v258_v10 = vsub.f32 %v242_v60, %v255_v8  ;;  %v257_v11 = vmul.f32 0.6931472, %v325_v9 }
 0x42d   :  { %260 = vst.msk [vmem:[%s433_s7] sm:$0xff] %vm235_vm2, %v258_v10  ;;  %v259_v12 = vsub.f32 %v243_v63, %v257_v11 }
 0x42f   :  { %261 = vst.msk [vmem:[%s433_s7 + $0x8] sm:$0xff] %vm235_vm2, %v259_v12 }

// kernel: transformer_forward.16
= control target key start
LH: loop header
LB: loop body
LE: loop exit
PB: predicated region body
PF: predicated region fallthrough
CT: control target
= control target key end

     0   :  { %s2493_s25 = smov 0   ;;  %s2827_s0 = inlined_call_operand.vmem [shape: f32[2,8,32], index: 0, kind: input, shape index: {}]   ;;  %s2828_s1 = inlined_call_operand.vmem [shape: f32[2,8,32], index: 1, kind: input, shape index: {}]   ;;  %s2829_s2 = inlined_call_operand.vmem [shape: f32[2,1,8], index: 2, kind: input, shape index: {}]   ;;  %s2830_s3 = inlined_call_operand.vmem [shape: f32[1,32], index: 3, kind: input, shape index: {}]   ;;  %s2831_s4 = inlined_call_operand.vmem [shape: f32[1,32], index: 4, kind: input, shape index: {}]   ;;  %s2832_s5 = inlined_call_operand.vmem [shape: bf16[4,32,8], index: 5, kind: input, shape index: {}]   ;;  %s2833_s6 = inlined_call_operand.vmem [shape: f32[4,1,8], index: 6, kind: input, shape index: {}]   ;;  %s2834_s7 = inlined_call_operand.vmem [shape: bf16[4,32,8], index: 7, kind: input, shape index: {}]   ;;  %s2835_s8 = inlined_call_operand.vmem [shape: f32[4,1,8], index: 8, kind: input, shape index: {}]   ;;  %s2836_s9 = inlined_call_operand.vmem [shape: bf16[4,32,8], index: 9, kind: input, shape index: {}]   ;;  %s2837_s10 = inlined_call_operand.vmem [shape: f32[4,1,8], index: 10, kind: input, shape index: {}]   ;;  %s2838_s11 = inlined_call_operand.vmem [shape: bf16[4,8,32], index: 11, kind: input, shape index: {}]   ;;  %s2839_s12 = inlined_call_operand.vmem [shape: f32[1,32], index: 12, kind: input, shape index: {}]   ;;  %s2840_s13 = inlined_call_operand.vmem [shape: f32[2,8,32], index: 13, kind: output, shape index: {}]  }
   0x1 LB: > { %s2010_s26 = sadd.s32 4294967295, %s2418_s25   ;;  %p2014_p0 = scmp.ge.s32.totalorder %s2418_s25, 1  ;;  %s2418_s25 = sphi %s2493_s25, %s23_s25  }
   0x2   : > { %p403_p1 = scmp.lt.s32.totalorder %s2418_s25, 3 }
   0x4   : > { %p404_p2 = pnand %p2014_p0, %p403_p1 }
   0x5   : > { %p452_p3 = scmp.lt.s32.totalorder (!%p404_p2), %s2010_s26, 1  ;;  %vm471_vm0 = vcmask (!%p404_p2), 261120   ;;  %v2370_v7 = vld [vmem:[%s2834_s7] sm:$0xff] (!%p404_p2)   ;;  %v2420_v8 = vmov (!%p404_p2), 0.0   ;;  %v2371_v11 = vld [vmem:[%s2834_s7 + $0x8] sm:$0xff] (!%p404_p2)   ;;  %vm2421_vm1 = vmmov (!%p404_p2), 0   ;;  %v751_v43 = vlaneseq (!%p404_p2) }
   0x6   : > { %407 = sbr.rel (%p404_p2) target bundleno = 4221 (0x107d), region = 72  ;;  %2199 = vmatprep.subr.bf16.mxu1 (!%p404_p2), %v2420_v8  ;;  %2191 = vmatprep.subr.bf16.mxu0 (!%p404_p2), %v2420_v8  ;;  %v2372_v9 = vld [vmem:[%s2832_s5] sm:$0xff] (!%p404_p2)   ;;  %v2373_v12 = vld [vmem:[%s2832_s5 + $0x8] sm:$0xff] (!%p404_p2)   ;;  %vm702_vm2 = vcmask (!%p404_p2), 64512   ;;  %v2374_v37 = vld [vmem:[%s2832_s5 + $0x10] sm:$0xff] (!%p404_p2)   ;;  %v2422_v47 = vmov (!%p404_p2), 0  }
   0x7   : > { %2200 = vmatpush3.bf16.msra.mxu1 (!%p404_p2), %v2370_v7  ;;  %2203 = vmatprep.mubr.msk.bf16.mxu1 (!%p404_p2), %vm2421_vm1, %v2420_v8  ;;  %v2018_v18 = vld [vmem:[%s2830_s3] ss:$0 sm:$0xff] (!%p404_p2)  ;;  %v2375_v40 = vld [vmem:[%s2832_s5 + $0x18] sm:$0xff] (!%p404_p2)   ;;  %v2377_v42 = vld [vmem:[%s2836_s9 + $0x8] sm:$0xff] (!%p404_p2)   ;;  %v752_v45 = vshrl.u32 (!%p404_p2), %v751_v43, 7  ;;  %vm773_vm5 = vcmask (!%p404_p2), 1043456  }
   0x8   : > { %2201 = vmatprep.subr.bf16.mxu1 (!%p404_p2), %v2420_v8  ;;  %2192 = vmatpush3.bf16.msra.mxu0 (!%p404_p2), %v2372_v9  ;;  %v2019_v20 = vld [vmem:[%s2831_s4] ss:$0 sm:$0xff] (!%p404_p2) }
   0x9   : > { %2193 = vmatprep.subr.bf16.mxu0 (!%p404_p2), %v2420_v8  ;;  %2195 = vmatprep.mubr.msk.bf16.mxu0 (!%p404_p2), %vm2421_vm1, %v2420_v8  ;;  %v2024_v24 = vld [vmem:[%s2835_s8] ss:$0 sm:$0xff] (!%p404_p2)  ;;  %v753_v46 = vsub.s32 (!%p404_p2), 0, %v752_v45 }
   0xa   : > { %v2020_v32 = vld [vmem:[%s2833_s6] ss:$0 sm:$0xff] (!%p404_p2) }
   0xb   : > { %2202 = vmatpush3.bf16.msra.mxu1 (!%p404_p2), %v2371_v11  ;;  %v2376_v41 = vld [vmem:[%s2836_s9] sm:$0xff] (!%p404_p2)  }
   0xc   : > { %2194 = vmatpush3.bf16.msra.mxu0 (!%p404_p2), %v2373_v12  ;;  %2215 = vmatprep.subr.bf16.mxu1 (!%p404_p2), %v2420_v8 }
   0xd   : > { %s2842_s26 = smov (!%p452_p3, %s2010_s26), 1  ;;  %2207 = vmatprep.subr.bf16.mxu0 %v2420_v8 }
   0xe   : > { %s2504_s27 = sshll.u32 %s2842_s26, 3  ;;  %s462_s15 = scalar_lea.vmem %s2829_s2, %s2842_s26 }
   0xf   : > { %s455_s30 = scalar_lea.vmem %s2827_s0, %s2504_s27  ;;  %s459_s16 = scalar_lea.vmem %s2828_s1, %s2504_s27  ;;  %v503_v44 = vld [vmem:[%s462_s15] sm:$0x1] }
  0x10   : > { %v2510_v0 = vld [vmem:[%s455_s30] sm:$0xff]  ;;  %vm504_vm3 = vcmp.gt.f32.partialorder %v503_v44, 0.5  ;;  %s466_s19 = scalar_lea.vmem %s2840_s13, %s2504_s27 }
  0x11   : > { %v472_v1 = vsel %vm471_vm0, %v2510_v0, 0.0  ;;  %v501_v10 = vld [vmem:[%s459_s16] sm:$0xff]  ;;  %v750_v48 = vsel %vm504_vm3, 1, %v2422_v47 }
  0x12   : > { %473 = vadd.xlane.f32.xlu0 %v472_v1  ;;  %v2540_v13 = vpack.c.bf16 %v501_v10, %v501_v10  ;;  %v2599_v49 = vrot.slane %v750_v48, %v753_v46  ;;  %v2057_v44 = vld [vmem:[%s2837_s10 + $0x1] ss:$0 sm:$0xff] }
  0x14   : > { %2204 = vmatmul.mubr.msk.bf16.vlgmr.msra.gmra.mrb[0].mxu1 %vm471_vm0, %v2540_v13  ;;  %vm755_vm4 = vcmp.eq.s32.totalorder %v2599_v49, 1 }
  0x15   : > { %2217 = vmatprep.mubr.msk.bf16.mxu1 %vm2421_vm1, %v2420_v8 }
  0x9f   : > { %v474_v2 = vpop.xlane.xlu0 %473 }
  0xa0   : > { %v476_v3 = vmul.f32 0.03125, %v474_v2 }
  0xa2   : > { %v477_v4 = vsub.f32 %v2510_v0, %v476_v3 }
  0xa4   : > { %v478_v5 = vmul.f32 %v477_v4, %v477_v4 }
  0xa6   : > { %v479_v6 = vsel %vm471_vm0, %v478_v5, 0.0 }
  0xa7   : > { %480 = vadd.xlane.f32.xlu0 %v479_v6  ;;  %v2028_v6 = vld [vmem:[%s2837_s10] ss:$0 sm:$0xff] }
  0xe7   : > { %v631_v25 = vpop.f32.mrb[0].mxu1 }
  0xe8   : > { %v632_v26 = vadd.f32 %v2024_v24, %v631_v25  ;;  %v2205_v27 = vpop.f32.mrb[1].mxu1  ;;  %v2048_v24 = vld [vmem:[%s2835_s8 + $0x1] ss:$0 sm:$0xff] }
  0xe9   : > { %v634_v28 = vpop.f32.mrb[2].mxu1 }
  0xea   : > { %v701_v29 = vpack.c.bf16 %v632_v26, %v632_v26  ;;  %v2206_v30 = vpop.f32.mrb[3].mxu1 }
  0xec   : > { %v707_v31 = vsel %vm702_vm2, %v701_v29, 0 }
  0xed   : > { %2216 = vmatpush3.bf16.xpose.msra.mxu1 %v707_v31  ;;  %v2039_v31 = vld [vmem:[%s2833_s6 + $0x1] ss:$0 sm:$0xff] }
  0xee   : > { %2227 = vmatprep.subr.bf16.mxu1 %v2420_v8 }
 0x134   : > { %v481_v14 = vpop.xlane.xlu0 %480 }
 0x135   : > { %v482_v15 = vmul.f32 0.03125, %v481_v14 }
 0x137   : > { %v483_v16 = vadd.f32 1e-05, %v482_v15 }
 0x139   : > { %2394 = vrsqrt.f32 %v483_v16  ;;  %v2378_v16 = vld [vmem:[%s2834_s7 + $0x10] sm:$0xff]  }
 0x143   : > { %v2395_v17 = vpop.eup %2394 }
 0x144   : > { %v485_v19 = vmul.f32 %v2395_v17, %v477_v4 }
 0x146   : > { %v492_v21 = vmul.f32 %v2018_v18, %v485_v19  ;;  %v2379_v18 = vld [vmem:[%s2834_s7 + $0x18] sm:$0xff]  }
 0x148   : > { %v499_v22 = vadd.f32 %v2019_v20, %v492_v21 }
 0x14a   : > { %v2554_v23 = vpack.c.bf16 %v499_v22, %v499_v22 }
 0x14c   : > { %2196 = vmatmul.mubr.msk.bf16.vlgmr.msra.gmra.mrb[0].mxu0 %vm471_vm0, %v2554_v23 }
 0x14d   : > { %2211 = vmatprep.mubr.msk.bf16.mxu0 %vm2421_vm1, %v2420_v8  ;;  %2208 = vmatpush3.bf16.msra.mxu0 %v2376_v41 }
 0x14e   : > { %2209 = vmatprep.subr.bf16.mxu0 %v2420_v8 }
 0x151   : > { %2210 = vmatpush3.bf16.msra.mxu0 %v2377_v42 }
 0x152   : > { %2221 = vmatprep.subr.bf16.mxu0 %v2420_v8 }
 0x154   : > { %2212 = vmatmul.mubr.msk.bf16.vlgmr.msra.gmra.mrb[4].mxu0 %vm471_vm0, %v2540_v13 }
 0x155   : > { %2223 = vmatprep.mubr.msk.bf16.mxu0 %vm2421_vm1, %v2420_v8 }
 0x21f   : > { %v565_v33 = vpop.f32.mrb[0].mxu0 }
 0x220   : > { %v566_v34 = vadd.f32 %v2020_v32, %v565_v33  ;;  %v2197_v35 = vpop.f32.mrb[1].mxu0 }
 0x221   : > { %v568_v36 = vpop.f32.mrb[2].mxu0  ;;  %v2380_v35 = vld [vmem:[%s2836_s9 + $0x10] sm:$0xff]  }
 0x222   : > { %v700_v38 = vpack.c.bf16 %v566_v34, %v566_v34  ;;  %v2198_v39 = vpop.f32.mrb[3].mxu0  ;;  %v2381_v36 = vld [vmem:[%s2836_s9 + $0x18] sm:$0xff]  }
 0x224   : > { %2218 = vmatmul.mubr.msk.bf16.vlgmr.msra.gmra.mrb[4].mxu1 %vm702_vm2, %v700_v38 }
 0x225   : > { %2228 = vmatpush3.bf16.msra.mxu1 %v2374_v37  ;;  %2231 = vmatprep.mubr.msk.bf16.mxu1 %vm2421_vm1, %v2420_v8 }
 0x226   : > { %2229 = vmatprep.subr.bf16.mxu1 %v2420_v8 }
 0x227   : > { %v694_v3 = vpop.f32.mrb[4].mxu0 }
 0x228   : > { %v2213_v4 = vpop.f32.mrb[5].mxu0  ;;  %v695_v9 = vadd.f32 %v2028_v6, %v694_v3  ;;  %v2382_v3 = vld [vmem:[%s2834_s7 + $0x20] sm:$0xff]  }
 0x229   : > { %2230 = vmatpush3.bf16.msra.mxu1 %v2375_v40  ;;  %v697_v5 = vpop.f32.mrb[6].mxu0 }
 0x22a   : > { %2243 = vmatprep.subr.bf16.mxu1 %v2420_v8  ;;  %v2214_v7 = vpop.f32.mrb[7].mxu0  ;;  %v769_v10 = vpack.c.bf16 %v695_v9, %v695_v9  ;;  %v2383_v5 = vld [vmem:[%s2834_s7 + $0x28] sm:$0xff]  }
 0x22b   : > { %v2384_v7 = vld [vmem:[%s2832_s5 + $0x20] sm:$0xff]  }
 0x22c   : > { %2232 = vmatmul.mubr.msk.bf16.vlgmr.msra.gmra.mrb[8].mxu1 %vm471_vm0, %v2554_v23  ;;  %v775_v11 = vsel %vm773_vm5, %v769_v10, 0 }
 0x22d   : > { %2247 = vmatprep.mubr.msk.bf16.mxu1 %vm2421_vm1, %v2420_v8  ;;  %2222 = vmatpush3.bf16.msra.mxu0 %v775_v11 }
 0x22e   : > { %2235 = vmatprep.subr.bf16.mxu0 %v2420_v8  ;;  %2244 = vmatpush3.bf16.msra.mxu1 %v2380_v35 }
 0x22f   : > { %2245 = vmatprep.subr.bf16.mxu1 %v2420_v8 }
 0x232   : > { %2246 = vmatpush3.bf16.msra.mxu1 %v2381_v36 }
 0x233   : > { %2257 = vmatprep.subr.bf16.mxu1 %v2420_v8 }
 0x235   : > { %2248 = vmatmul.mubr.msk.bf16.vlgmr.msra.gmra.mrb[12].mxu1 %vm471_vm0, %v2540_v13 }
 0x236   : > { %2259 = vmatprep.mubr.msk.bf16.mxu1 %vm2421_vm1, %v2420_v8 }
 0x2f7   : > { %v743_v50 = vpop.f32.mrb[4].mxu1 }
 0x2f8   : > { %v749_v51 = vmul.f32 0.17677669, %v743_v50  ;;  %v2219_v52 = vpop.f32.mrb[5].mxu1 }
 0x2f9   : > { %v746_v53 = vpop.f32.mrb[6].mxu1 }
 0x2fa   : > { %v2220_v54 = vpop.f32.mrb[7].mxu1  ;;  %v756_v55 = vsel %vm755_vm4, -100000.0, %v749_v51 }
 0x2fb   : > { %v757_v56 = vsel %vm702_vm2, %v756_v55, -inf }
 0x2fc   : > { %758 = vmax.xlane.f32.xlu1 %v757_v56 }
 0x2ff   : > { %v878_v57 = vpop.f32.mrb[8].mxu1 }
 0x300   : > { %v2233_v58 = vpop.f32.mrb[9].mxu1  ;;  %v879_v33 = vadd.f32 %v2039_v31, %v878_v57 }
 0x301   : > { %v881_v59 = vpop.f32.mrb[10].mxu1  ;;  %v2063_v58 = vld [vmem:[%s2838_s11 + $0x4] sm:$0xf] }
 0x302   : > { %v2234_v60 = vpop.f32.mrb[11].mxu1  ;;  %v1014_v34 = vpack.c.bf16 %v879_v33, %v879_v33  ;;  %v1130_v59 = vsel %vm773_vm5, %v2063_v58, 0  ;;  %v2071_v33 = vld [vmem:[%s2833_s6 + $0x2] ss:$0 sm:$0xff] }
 0x303   : > { %v2089_v58 = vld [vmem:[%s2837_s10 + $0x2] ss:$0 sm:$0xff] }
 0x308   : > { %v1008_v45 = vpop.f32.mrb[12].mxu1 }
 0x309   : > { %v1009_v46 = vadd.f32 %v2057_v44, %v1008_v45  ;;  %v2249_v47 = vpop.f32.mrb[13].mxu1 }
 0x30a   : > { %v1011_v48 = vpop.f32.mrb[14].mxu1 }
 0x30b   : > { %v1076_v50 = vpack.c.bf16 %v1009_v46, %v1009_v46  ;;  %v2250_v51 = vpop.f32.mrb[15].mxu1 }
 0x30d   : > { %v1081_v52 = vsel %vm773_vm5, %v1076_v50, 0 }
 0x30e   : > { %2258 = vmatpush3.bf16.msra.mxu1 %v1081_v52 }
 0x30f   : > { %2269 = vmatprep.subr.bf16.mxu1 %v2420_v8 }
 0x389   : > { %v759_v61 = vpop.xlane.xlu1 %758 }
 0x38a   : > { %v760_v62 = vsub.f32 %v756_v55, %v759_v61 }
 0x38c   : > { %v761_v63 = vmul.f32 1.442695, %v760_v62  ;;  %v818_v62 = vld [vmem:[%s2838_s11] sm:$0xf] }
 0x38e   : > { %2396 = vpow2.f32 %v761_v63 }
 0x398   : > { %v2397_v1 = vpop.eup %2396 }
 0x399   : > { %v763_v2 = vsel %vm702_vm2, %v2397_v1, 0.0 }
 0x39a   : > { %764 = vadd.xlane.f32.xlu1 %v763_v2  ;;  %v1176_v2 = vsel %vm773_vm5, %v818_v62, 0 }
 0x427   : > { %v765_v12 = vpop.xlane.xlu1 %764 }
 0x428   : > { %2398 = vrcp.f32 %v765_v12 }
 0x432   : > { %v2399_v14 = vpop.eup %2398 }
 0x433   : > { %v767_v15 = vmul.f32 %v2399_v14, %v2397_v1  ;;  %v2385_v14 = vld [vmem:[%s2832_s5 + $0x28] sm:$0xff]  }
 0x435   : > { %v768_v17 = vpack.c.bf16 %v767_v15, %v767_v15 }
 0x437   : > { %2224 = vmatmul.mubr.msk.bf16.vlgmr.msra.gmra.mrb[8].mxu0 %vm702_vm2, %v768_v17 }
 0x438   : > { %2236 = vmatpush3.bf16.msra.mxu0 %v2378_v16  ;;  %2239 = vmatprep.mubr.msk.bf16.mxu0 %vm2421_vm1, %v2420_v8 }
 0x439   : > { %2237 = vmatprep.subr.bf16.mxu0 %v2420_v8 }
 0x43c   : > { %2238 = vmatpush3.bf16.msra.mxu0 %v2379_v18 }
 0x43d   : > { %2251 = vmatprep.subr.bf16.mxu0 %v2420_v8 }
 0x43f   : > { %2240 = vmatmul.mubr.msk.bf16.vlgmr.msra.gmra.mrb[12].mxu0 %vm471_vm0, %v2540_v13 }
 0x440   : > { %2253 = vmatprep.mubr.msk.bf16.mxu0 %vm2421_vm1, %v2420_v8 }
 0x50a   : > { %v2626_v19 = vpop.f32.mrb[8].mxu0 }
 0x50b   : > { %v2225_v20 = vpop.f32.mrb[9].mxu0  ;;  %v817_v4 = vpack.c.bf16 %v2626_v19, %v2626_v19  ;;  %v2080_v19 = vld [vmem:[%s2835_s8 + $0x2] ss:$0 sm:$0xff] }
 0x50c   : > { %v814_v21 = vpop.f32.mrb[10].mxu0 }
 0x50d   : > { %v2226_v22 = vpop.f32.mrb[11].mxu0 }
 0x512   : > { %v943_v25 = vpop.f32.mrb[12].mxu0 }
 0x513   : > { %v944_v26 = vadd.f32 %v2048_v24, %v943_v25  ;;  %v2241_v27 = vpop.f32.mrb[13].mxu0 }
 0x514   : > { %v946_v28 = vpop.f32.mrb[14].mxu0 }
 0x515   : > { %v1015_v29 = vpack.c.bf16 %v944_v26, %v944_v26  ;;  %v2242_v30 = vpop.f32.mrb[15].mxu0 }
 0x517   : > { %v1020_v32 = vsel %vm702_vm2, %v1015_v29, 0 }
 0x518   : > { %2252 = vmatpush3.bf16.xpose.msra.mxu0 %v1020_v32 }
 0x519   : > { %2263 = vmatprep.subr.bf16.mxu0 %v2420_v8 }
 0x51f   : > { %2254 = vmatmul.mubr.msk.bf16.vlgmr.msra.gmra.mrb[16].mxu0 %vm702_vm2, %v1014_v34 }
 0x520   : > { %2265 = vmatprep.mubr.msk.bf16.mxu0 %vm2421_vm1, %v2420_v8  ;;  %2264 = vmatpush3.bf16.msra.mxu0 %v1130_v59 }
 0x521   : > { %2275 = vmatprep.subr.bf16.mxu0 %v2420_v8 }
 0x5f2   : > { %v1056_v37 = vpop.f32.mrb[16].mxu0 }
 0x5f3   : > { %v1062_v38 = vmul.f32 0.17677669, %v1056_v37  ;;  %v2255_v39 = vpop.f32.mrb[17].mxu0 }
 0x5f4   : > { %v1059_v40 = vpop.f32.mrb[18].mxu0 }
 0x5f5   : > { %v2256_v41 = vpop.f32.mrb[19].mxu0  ;;  %v1063_v42 = vsel %vm755_vm4, -100000.0, %v1062_v38  ;;  %v2386_v40 = vld [vmem:[%s2836_s9 + $0x20] sm:$0xff]  }
 0x5f6   : > { %v1064_v43 = vsel %vm702_vm2, %v1063_v42, -inf  ;;  %v2387_v41 = vld [vmem:[%s2836_s9 + $0x28] sm:$0xff]  }
 0x5f7   : > { %1065 = vmax.xlane.f32.xlu0 %v1064_v43 }
 0x684   : > { %v1066_v53 = vpop.xlane.xlu0 %1065 }
 0x685   : > { %v1067_v54 = vsub.f32 %v1063_v42, %v1066_v53 }
 0x687   : > { %v1068_v55 = vmul.f32 1.442695, %v1067_v54 }
 0x689   : > { %2400 = vpow2.f32 %v1068_v55 }
 0x693   : > { %v2401_v56 = vpop.eup %2400 }
 0x694   : > { %v1070_v57 = vsel %vm702_vm2, %v2401_v56, 0.0 }
 0x695   : > { %1071 = vadd.xlane.f32.xlu1 %v1070_v57 }
 0x722   : > { %v1072_v60 = vpop.xlane.xlu1 %1071 }
 0x723   : > { %2402 = vrcp.f32 %v1072_v60 }
 0x72d   : > { %v2403_v61 = vpop.eup %2402 }
 0x72e   : > { %v1074_v63 = vmul.f32 %v2403_v61, %v2401_v56 }
 0x730   : > { %v1075_v1 = vpack.c.bf16 %v1074_v63, %v1074_v63  ;;  %v2095_v63 = vld [vmem:[%s2838_s11 + $0x8] sm:$0xf] }
 0x732   : > { %2260 = vmatmul.mubr.msk.bf16.vlgmr.msra.gmra.mrb[16].mxu1 %vm702_vm2, %v1075_v1  ;;  %v1529_v1 = vsel %vm773_vm5, %v2095_v63, 0 }
 0x733   : > { %2270 = vmatpush3.bf16.msra.mxu1 %v1176_v2  ;;  %2271 = vmatprep.mubr.msk.bf16.mxu1 %vm2421_vm1, %v2420_v8 }
 0x734   : > { %2283 = vmatprep.subr.bf16.mxu1 %v2420_v8 }
 0x73a   : > { %2272 = vmatmul.mubr.msk.bf16.vlgmr.msra.gmra.mrb[20].mxu1 %vm702_vm2, %v817_v4 }
 0x73b   : > { %2284 = vmatpush3.bf16.msra.mxu1 %v2382_v3  ;;  %2287 = vmatprep.mubr.msk.bf16.mxu1 %vm2421_vm1, %v2420_v8 }
 0x73c   : > { %2285 = vmatprep.subr.bf16.mxu1 %v2420_v8 }
 0x73f   : > { %2286 = vmatpush3.bf16.msra.mxu1 %v2383_v5  ;;  %v2388_v5 = vld [vmem:[%s2832_s5 + $0x30] sm:$0xff]  }
 0x740   : > { %2299 = vmatprep.subr.bf16.mxu1 %v2420_v8 }
 0x742   : > { %2288 = vmatmul.mubr.msk.bf16.vlgmr.msra.gmra.mrb[24].mxu1 %vm471_vm0, %v2540_v13 }
 0x743   : > { %2301 = vmatprep.mubr.msk.bf16.mxu1 %vm2421_vm1, %v2420_v8 }
 0x805   : > { %v1117_v6 = vpop.f32.mrb[16].mxu1 }
 0x806   : > { %v1123_v9 = vpack.c.bf16 %v1117_v6, %v1117_v6  ;;  %v2261_v10 = vpop.f32.mrb[17].mxu1 }
 0x807   : > { %v1120_v11 = vpop.f32.mrb[18].mxu1  ;;  %v2390_v10 = vld [vmem:[%s2834_s7 + $0x30] sm:$0xff]  }
 0x808   : > { %v2262_v12 = vpop.f32.mrb[19].mxu1  ;;  %2266 = vmatmul.mubr.msk.bf16.vlgmr.msra.gmra.mrb[20].mxu0 %vm702_vm2, %v1123_v9 }
 0x809   : > { %2276 = vmatpush3.bf16.msra.mxu0 %v2384_v7  ;;  %2279 = vmatprep.mubr.msk.bf16.mxu0 %vm2421_vm1, %v2420_v8  ;;  %v2389_v7 = vld [vmem:[%s2832_s5 + $0x38] sm:$0xff]  }
 0x80a   : > { %2277 = vmatprep.subr.bf16.mxu0 %v2420_v8 }
 0x80d   : > { %v1212_v15 = vpop.f32.mrb[20].mxu1  ;;  %2278 = vmatpush3.bf16.msra.mxu0 %v2385_v14 }
 0x80e   : > { %v2273_v16 = vpop.f32.mrb[21].mxu1  ;;  %2291 = vmatprep.subr.bf16.mxu0 %v2420_v8 }
 0x80f   : > { %v1215_v17 = vpop.f32.mrb[22].mxu1  ;;  %v2391_v16 = vld [vmem:[%s2834_s7 + $0x38] sm:$0xff]  }
 0x810   : > { %v2274_v18 = vpop.f32.mrb[23].mxu1  ;;  %2280 = vmatmul.mubr.msk.bf16.vlgmr.msra.gmra.mrb[24].mxu0 %vm471_vm0, %v2554_v23 }
 0x811   : > { %2295 = vmatprep.mubr.msk.bf16.mxu0 %vm2421_vm1, %v2420_v8  ;;  %2292 = vmatpush3.bf16.msra.mxu0 %v2386_v40 }
 0x812   : > { %2293 = vmatprep.subr.bf16.mxu0 %v2420_v8 }
 0x815   : > { %v1342_v20 = vpop.f32.mrb[24].mxu1  ;;  %2294 = vmatpush3.bf16.msra.mxu0 %v2387_v41 }
 0x816   : > { %v1343_v21 = vadd.f32 %v2080_v19, %v1342_v20  ;;  %v2289_v22 = vpop.f32.mrb[25].mxu1  ;;  %2305 = vmatprep.subr.bf16.mxu0 %v2420_v8 }
 0x817   : > { %v1345_v24 = vpop.f32.mrb[26].mxu1 }
 0x818   : > { %v1414_v25 = vpack.c.bf16 %v1343_v21, %v1343_v21  ;;  %v2290_v26 = vpop.f32.mrb[27].mxu1  ;;  %2296 = vmatmul.mubr.msk.bf16.vlgmr.msra.gmra.mrb[28].mxu0 %vm471_vm0, %v2540_v13 }
 0x819   : > { %2307 = vmatprep.mubr.msk.bf16.mxu0 %vm2421_vm1, %v2420_v8  ;;  %v2111_v26 = vld [vmem:[%s2835_s8 + $0x3] ss:$0 sm:$0xff] }
 0x81a   : > { %v1419_v27 = vsel %vm702_vm2, %v1414_v25, 0 }
 0x81b   : > { %2300 = vmatpush3.bf16.xpose.msra.mxu1 %v1419_v27 }
 0x81c   : > { %2311 = vmatprep.subr.bf16.mxu1 %v2420_v8 }
 0x8db   : > { %v1166_v28 = vpop.f32.mrb[20].mxu0 }
 0x8dc   : > { %v2710_v29 = vadd.f32 %v1212_v15, %v1166_v28  ;;  %v2267_v30 = vpop.f32.mrb[21].mxu0 }
 0x8dd   : > { %v1169_v31 = vpop.f32.mrb[22].mxu0 }
 0x8de   : > { %v2268_v32 = vpop.f32.mrb[23].mxu0 }
 0x8e3   : > { %v1277_v34 = vpop.f32.mrb[24].mxu0 }
 0x8e4   : > { %v1278_v35 = vadd.f32 %v2071_v33, %v1277_v34  ;;  %v2281_v36 = vpop.f32.mrb[25].mxu0  ;;  %v2102_v34 = vld [vmem:[%s2833_s6 + $0x3] ss:$0 sm:$0xff] }
 0x8e5   : > { %v1280_v37 = vpop.f32.mrb[26].mxu0 }
 0x8e6   : > { %v1413_v38 = vpack.c.bf16 %v1278_v35, %v1278_v35  ;;  %v2282_v39 = vpop.f32.mrb[27].mxu0  ;;  %v2392_v37 = vld [vmem:[%s2836_s9 + $0x30] sm:$0xff]  }
 0x8e8   : > { %2302 = vmatmul.mubr.msk.bf16.vlgmr.msra.gmra.mrb[28].mxu1 %vm702_vm2, %v1413_v38  ;;  %v2393_v38 = vld [vmem:[%s2836_s9 + $0x38] sm:$0xff]  }
 0x8e9   : > { %2313 = vmatprep.mubr.msk.bf16.mxu1 %vm2421_vm1, %v2420_v8  ;;  %2312 = vmatpush3.bf16.msra.mxu1 %v1529_v1 }
 0x8ea   : > { %2325 = vmatprep.subr.bf16.mxu1 %v2420_v8 }
 0x8eb   : > { %v1407_v55 = vpop.f32.mrb[28].mxu0 }
 0x8ec   : > { %v2297_v56 = vpop.f32.mrb[29].mxu0  ;;  %v1408_v60 = vadd.f32 %v2089_v58, %v1407_v55 }
 0x8ed   : > { %v1410_v57 = vpop.f32.mrb[30].mxu0 }
 0x8ee   : > { %v2298_v59 = vpop.f32.mrb[31].mxu0  ;;  %v1475_v61 = vpack.c.bf16 %v1408_v60, %v1408_v60  ;;  %v2126_v57 = vld [vmem:[%s2838_s11 + $0xc] sm:$0xf] }
 0x8ef   : > { %v1883_v58 = vsel %vm773_vm5, %v2126_v57, 0 }
 0x8f0   : > { %v1480_v62 = vsel %vm773_vm5, %v1475_v61, 0 }
 0x8f1   : > { %2306 = vmatpush3.bf16.msra.mxu0 %v1480_v62 }
 0x8f2   : > { %2317 = vmatprep.subr.bf16.mxu0 %v2420_v8 }
 0x9bb   : > { %v1455_v42 = vpop.f32.mrb[28].mxu1 }
 0x9bc   : > { %v1461_v43 = vmul.f32 0.17677669, %v1455_v42  ;;  %v2303_v44 = vpop.f32.mrb[29].mxu1 }
 0x9bd   : > { %v1458_v45 = vpop.f32.mrb[30].mxu1 }
 0x9be   : > { %v2304_v46 = vpop.f32.mrb[31].mxu1  ;;  %v1462_v47 = vsel %vm755_vm4, -100000.0, %v1461_v43 }
 0x9bf   : > { %v1463_v48 = vsel %vm702_vm2, %v1462_v47, -inf }
 0x9c0   : > { %1464 = vmax.xlane.f32.xlu0 %v1463_v48 }
 0xa4d   : > { %v1465_v50 = vpop.xlane.xlu0 %1464 }
 0xa4e   : > { %v1466_v51 = vsub.f32 %v1462_v47, %v1465_v50 }
 0xa50   : > { %v1467_v52 = vmul.f32 1.442695, %v1466_v51 }
 0xa52   : > { %2404 = vpow2.f32 %v1467_v52 }
 0xa5c   : > { %v2405_v53 = vpop.eup %2404 }
 0xa5d   : > { %v1469_v54 = vsel %vm702_vm2, %v2405_v53, 0.0 }
 0xa5e   : > { %1470 = vadd.xlane.f32.xlu1 %v1469_v54 }
 0xaeb   : > { %v1471_v2 = vpop.xlane.xlu1 %1470 }
 0xaec   : > { %2406 = vrcp.f32 %v1471_v2 }
 0xaf6   : > { %v2407_v3 = vpop.eup %2406 }
 0xaf7   : > { %v1473_v4 = vmul.f32 %v2407_v3, %v2405_v53  ;;  %v2120_v53 = vld [vmem:[%s2837_s10 + $0x3] ss:$0 sm:$0xff] }
 0xaf9   : > { %v1474_v6 = vpack.c.bf16 %v1473_v4, %v1473_v4 }
 0xafb   : > { %2308 = vmatmul.mubr.msk.bf16.vlgmr.msra.gmra.mrb[32].mxu0 %vm702_vm2, %v1474_v6 }
 0xafc   : > { %2318 = vmatpush3.bf16.msra.mxu0 %v2388_v5  ;;  %2321 = vmatprep.mubr.msk.bf16.mxu0 %vm2421_vm1, %v2420_v8 }
 0xafd   : > { %2319 = vmatprep.subr.bf16.mxu0 %v2420_v8 }
 0xb00   : > { %2320 = vmatpush3.bf16.msra.mxu0 %v2389_v7 }
 0xb01   : > { %2333 = vmatprep.subr.bf16.mxu0 %v2420_v8 }
 0xb03   : > { %2322 = vmatmul.mubr.msk.bf16.vlgmr.msra.gmra.mrb[36].mxu0 %vm471_vm0, %v2554_v23 }
 0xb04   : > { %2337 = vmatprep.mubr.msk.bf16.mxu0 %vm2421_vm1, %v2420_v8  ;;  %2334 = vmatpush3.bf16.msra.mxu0 %v2392_v37 }
 0xb05   : > { %2335 = vmatprep.subr.bf16.mxu0 %v2420_v8 }
 0xb08   : > { %2336 = vmatpush3.bf16.msra.mxu0 %v2393_v38 }
 0xb09   : > { %2347 = vmatprep.subr.bf16.mxu0 %v2420_v8 }
 0xb0b   : > { %2338 = vmatmul.mubr.msk.bf16.vlgmr.msra.gmra.mrb[40].mxu0 %vm471_vm0, %v2540_v13 }
 0xb0c   : > { %2349 = vmatprep.mubr.msk.bf16.mxu0 %vm2421_vm1, %v2420_v8 }
 0xbce   : > { %v1516_v9 = vpop.f32.mrb[32].mxu0 }
 0xbcf   : > { %v1522_v11 = vpack.c.bf16 %v1516_v9, %v1516_v9  ;;  %v2309_v12 = vpop.f32.mrb[33].mxu0  ;;  %v2128_v9 = vld [vmem:[%s2839_s12] ss:$0 sm:$0xff] }
 0xbd0   : > { %v1519_v14 = vpop.f32.mrb[34].mxu0 }
 0xbd1   : > { %v2310_v15 = vpop.f32.mrb[35].mxu0  ;;  %2314 = vmatmul.mubr.msk.bf16.vlgmr.msra.gmra.mrb[32].mxu1 %vm702_vm2, %v1522_v11 }
 0xbd2   : > { %2326 = vmatpush3.bf16.msra.mxu1 %v2390_v10  ;;  %2329 = vmatprep.mubr.msk.bf16.mxu1 %vm2421_vm1, %v2420_v8 }
 0xbd3   : > { %2327 = vmatprep.subr.bf16.mxu1 %v2420_v8 }
 0xbd6   : > { %v1631_v23 = vpop.f32.mrb[36].mxu0  ;;  %2328 = vmatpush3.bf16.msra.mxu1 %v2391_v16 }
 0xbd7   : > { %v2323_v17 = vpop.f32.mrb[37].mxu0  ;;  %2341 = vmatprep.subr.bf16.mxu1 %v2420_v8  ;;  %v1632_v35 = vadd.f32 %v2102_v34, %v1631_v23 }
 0xbd8   : > { %v1634_v18 = vpop.f32.mrb[38].mxu0 }
 0xbd9   : > { %v2324_v19 = vpop.f32.mrb[39].mxu0  ;;  %2330 = vmatmul.mubr.msk.bf16.vlgmr.msra.gmra.mrb[36].mxu1 %vm471_vm0, %v2540_v13  ;;  %v1767_v36 = vpack.c.bf16 %v1632_v35, %v1632_v35 }
 0xbda   : > { %2343 = vmatprep.mubr.msk.bf16.mxu1 %vm2421_vm1, %v2420_v8 }
 0xca4   : > { %v1565_v20 = vpop.f32.mrb[32].mxu1 }
 0xca5   : > { %v2775_v21 = vadd.f32 %v1565_v20, %v2710_v29  ;;  %v2315_v22 = vpop.f32.mrb[33].mxu1 }
 0xca6   : > { %v1568_v24 = vpop.f32.mrb[34].mxu1 }
 0xca7   : > { %v2316_v25 = vpop.f32.mrb[35].mxu1 }
 0xcac   : > { %v1696_v27 = vpop.f32.mrb[36].mxu1 }
 0xcad   : > { %v1697_v28 = vadd.f32 %v2111_v26, %v1696_v27  ;;  %v2331_v30 = vpop.f32.mrb[37].mxu1 }
 0xcae   : > { %v1699_v31 = vpop.f32.mrb[38].mxu1 }
 0xcaf   : > { %v1768_v32 = vpack.c.bf16 %v1697_v28, %v1697_v28  ;;  %v2332_v33 = vpop.f32.mrb[39].mxu1 }
 0xcb1   : > { %v1773_v29 = vsel %vm702_vm2, %v1768_v32, 0 }
 0xcb2   : > { %2342 = vmatpush3.bf16.xpose.msra.mxu1 %v1773_v29 }
 0xcb3   : > { %2353 = vmatprep.subr.bf16.mxu1 %v2420_v8 }
 0xcb9   : > { %2344 = vmatmul.mubr.msk.bf16.vlgmr.msra.gmra.mrb[40].mxu1 %vm702_vm2, %v1767_v36 }
 0xcba   : > { %2355 = vmatprep.mubr.msk.bf16.mxu1 %vm2421_vm1, %v2420_v8  ;;  %v1761_v8 = vpop.f32.mrb[40].mxu0  ;;  %2354 = vmatpush3.bf16.msra.mxu1 %v1883_v58 }
 0xcbb   : > { %v2339_v51 = vpop.f32.mrb[41].mxu0  ;;  %v1762_v54 = vadd.f32 %v2120_v53, %v1761_v8 }
 0xcbc   : > { %v1764_v52 = vpop.f32.mrb[42].mxu0 }
 0xcbd   : > { %v2340_v49 = vpop.f32.mrb[43].mxu0  ;;  %v1829_v55 = vpack.c.bf16 %v1762_v54, %v1762_v54 }
 0xcbf   : > { %v1834_v56 = vsel %vm773_vm5, %v1829_v55, 0 }
 0xcc0   : > { %2348 = vmatpush3.bf16.msra.mxu0 %v1834_v56 }
 0xd8c   : > { %v1809_v39 = vpop.f32.mrb[40].mxu1 }
 0xd8d   : > { %v1815_v40 = vmul.f32 0.17677669, %v1809_v39  ;;  %v2345_v41 = vpop.f32.mrb[41].mxu1 }
 0xd8e   : > { %v1812_v42 = vpop.f32.mrb[42].mxu1 }
 0xd8f   : > { %v2346_v43 = vpop.f32.mrb[43].mxu1  ;;  %v1816_v44 = vsel %vm755_vm4, -100000.0, %v1815_v40 }
 0xd90   : > { %v1817_v45 = vsel %vm702_vm2, %v1816_v44, -inf }
 0xd91   : > { %1818 = vmax.xlane.f32.xlu0 %v1817_v45 }
 0xe1e   : > { %v1819_v46 = vpop.xlane.xlu0 %1818 }
 0xe1f   : > { %v1820_v47 = vsub.f32 %v1816_v44, %v1819_v46 }
 0xe21   : > { %v1821_v48 = vmul.f32 1.442695, %v1820_v47 }
 0xe23   : > { %2408 = vpow2.f32 %v1821_v48 }
 0xe2d   : > { %v2409_v50 = vpop.eup %2408 }
 0xe2e   : > { %v1823_v13 = vsel %vm702_vm2, %v2409_v50, 0.0 }
 0xe2f   : > { %1824 = vadd.xlane.f32.xlu1 %v1823_v13 }
 0xebc   : > { %v1825_v59 = vpop.xlane.xlu1 %1824 }
 0xebd   : > { %2410 = vrcp.f32 %v1825_v59 }
 0xec7   : > { %v2411_v60 = vpop.eup %2410 }
 0xec8   : > { %v1827_v61 = vmul.f32 %v2411_v60, %v2409_v50 }
 0xeca   : > { %v1828_v62 = vpack.c.bf16 %v1827_v61, %v1827_v61 }
 0xecc   : > { %2350 = vmatmul.mubr.msk.bf16.vlgmr.msra.gmra.mrb[44].mxu0 %vm702_vm2, %v1828_v62 }
 0xf9f   : > { %v1870_v63 = vpop.f32.mrb[44].mxu0 }
 0xfa0   : > { %v1876_v1 = vpack.c.bf16 %v1870_v63, %v1870_v63  ;;  %v2351_v2 = vpop.f32.mrb[45].mxu0 }
 0xfa1   : > { %v1873_v3 = vpop.f32.mrb[46].mxu0 }
 0xfa2   : > { %v2352_v4 = vpop.f32.mrb[47].mxu0  ;;  %2356 = vmatmul.mubr.msk.bf16.vlgmr.msra.gmra.mrb[44].mxu1 %vm702_vm2, %v1876_v1 }
0x1075   : > { %v1919_v5 = vpop.f32.mrb[44].mxu1 }
0x1076   : > { %v1925_v6 = vadd.f32 %v1919_v5, %v2775_v21  ;;  %v2357_v7 = vpop.f32.mrb[45].mxu1 }
0x1077   : > { %v1922_v10 = vpop.f32.mrb[46].mxu1 }
0x1078   : > { %v1926_v11 = vadd.f32 %v1925_v6, %v2510_v0  ;;  %v2358_v12 = vpop.f32.mrb[47].mxu1 }
0x107a   : > { %v1934_v14 = vadd.f32 %v2128_v9, %v1926_v11 }
0x107c   : > { %1935 = vst.msk [vmem:[%s466_s19] sm:$0xff] %vm471_vm0, %v1934_v14 }
0x107d PF: > { %s23_s25 = sadd.s32 1, %s2418_s25  }
0x107e   : > { %p20_p4 = scmp.ge.s32.totalorder %s23_s25, 4  }
0x1080   :  { %22 = sbr.rel (!%p20_p4) target bundleno = 1 (0x1), region = 129 }

</bundles_post_ra>
